<compile_context>
chip_gen: v7x
topology: tpu7x:2x2x1
jax: 0.10.0
libtpu: 0.0.40
codegen_flags: <defaults>
</compile_context>

<pallas_src>
import jax
import jax.numpy as jnp
from jax.experimental import pallas as pl
from jax.experimental.pallas import tpu as pltpu


def mlp_kernel(x_ref, w1_ref, b1_ref, w2_ref, b2_ref, o_ref, acc_ref):
    """Fused 2-layer MLP with sigmoid activations.

    Grid axis 0 iterates over K-tiles of the fc1 reduction dimension (3072).
    acc_ref carries the fc1 pre-activation (initialized with b1); on the last
    K-step we apply sigmoid, run the small lane-padded fc2 matmul, and write
    the final (lane-dense) output.
    """
    k = pl.program_id(0)

    @pl.when(k == 0)
    def _():
        # Fold the fc1 bias into the accumulator init.
        acc_ref[...] = jnp.broadcast_to(b1_ref[...], acc_ref.shape)

    # fc1 partial product for this K tile: (B, tk) @ (tk, H).
    acc_ref[...] += jnp.dot(x_ref[k], w1_ref[...],
                            preferred_element_type=jnp.float32)

    @pl.when(k == pl.num_programs(0) - 1)
    def _():
        h = jax.nn.sigmoid(acc_ref[...])                                 # (B, 1024)
        out = jnp.dot(h, w2_ref[...],
                      preferred_element_type=jnp.float32) + b2_ref[...]  # (B, 128) lane-padded
        o_ref[...] = jax.nn.sigmoid(out).astype(o_ref.dtype)


def net_experiment_one(x_nchw, w1, b1, w2, b2, *, tk=1024):
    """x_nchw: (B, 3, 32, 32) float32.  w1: (3072, 1024), b1: (1024,),
    w2: (1024, 10), b2: (10,).  Returns (B, 10) float32."""
    B = x_nchw.shape[0]
    K1 = 3 * 32 * 32      # 3072
    H = 1024
    O = 10
    O_PAD = 128           # lane-dense padded fc2 output width

    assert K1 % tk == 0
    nk = K1 // tk

    # Same flattening order as torch's .view on a contiguous NCHW tensor, then
    # re-laid-out as (nk, B, tk) so the kernel picks its K tile with x_ref[k].
    x2d = x_nchw.reshape(B, K1)
    x3d = x2d.reshape(B, nk, tk).transpose(1, 0, 2)      # (nk, B, tk), tiny (48 KB)

    b1_2d = b1.reshape(1, H)
    # Zero-pad fc2 to a 128-wide lane dim (padded columns produce sigmoid(0)=0.5,
    # sliced off below).
    w2_pad = jnp.zeros((H, O_PAD), jnp.float32).at[:, :O].set(w2)
    b2_pad = jnp.zeros((1, O_PAD), jnp.float32).at[0, :O].set(b2)

    grid = (nk,)

    out_padded = pl.pallas_call(
        mlp_kernel,
        out_shape=jax.ShapeDtypeStruct((B, O_PAD), jnp.float32),
        grid_spec=pltpu.PrefetchScalarGridSpec(
            num_scalar_prefetch=0,
            grid=grid,
            in_specs=[
                pl.BlockSpec((nk, B, tk), lambda k: (0, 0, 0)),   # x, fully resident
                pl.BlockSpec((tk, H), lambda k: (k, 0)),          # w1 K-tile (streamed)
                pl.BlockSpec((1, H), lambda k: (0, 0)),           # b1 (resident)
                pl.BlockSpec((H, O_PAD), lambda k: (0, 0)),       # w2 padded (resident)
                pl.BlockSpec((1, O_PAD), lambda k: (0, 0)),       # b2 padded (resident)
            ],
            out_specs=pl.BlockSpec((B, O_PAD), lambda k: (0, 0)),
            scratch_shapes=[pltpu.VMEM((B, H), jnp.float32)],
        ),
        compiler_params=pltpu.CompilerParams(
            dimension_semantics=("arbitrary",),
            # Actual footprint ~9.5 MiB (2x4 MiB w1 buffers + x/w2/b1/b2 + acc);
            # request 32 MiB to leave the compiler headroom (fits v7x's 64 MiB VMEM).
            vmem_limit_bytes=32 << 20,
        ),
    )(x3d, w1, b1_2d, w2_pad, b2_pad)

    return out_padded[:, :O]


def init_params(key):
    """Deterministic init matching nn.Linear shapes (uniform +-1/sqrt(fan_in)).
    Weights are stored already transposed to (in_features, out_features)."""
    k1, k2, k3, k4 = jax.random.split(key, 4)
    fan1 = 3 * 32 * 32
    fan2 = 1024
    lim1 = 1.0 / jnp.sqrt(fan1)
    lim2 = 1.0 / jnp.sqrt(fan2)
    w1 = jax.random.uniform(k1, (fan1, 1024), jnp.float32, -lim1, lim1)
    b1 = jax.random.uniform(k2, (1024,), jnp.float32, -lim1, lim1)
    w2 = jax.random.uniform(k3, (fan2, 10), jnp.float32, -lim2, lim2)
    b2 = jax.random.uniform(k4, (10,), jnp.float32, -lim2, lim2)
    return w1, b1, w2, b2


if __name__ == "__main__":
    key = jax.random.PRNGKey(0)
    kx, kp = jax.random.split(key)

    B = 4
    x = jax.random.normal(kx, (B, 3, 32, 32), jnp.float32)
    w1, b1, w2, b2 = init_params(kp)

    out = net_experiment_one(x, w1, b1, w2, b2)
    out = jax.block_until_ready(out)

    # Pure-JAX reference check of the same math.
    x2d = x.reshape(B, 3 * 32 * 32)
    ref = jax.nn.sigmoid(jax.nn.sigmoid(x2d @ w1 + b1) @ w2 + b2)
    assert out.shape == (B, 10)
    assert jnp.allclose(out, ref, atol=1e-5, rtol=1e-5), "mismatch vs reference"

    print("KERNEL_OK")
</pallas_src>

<mosaic_0001>
module attributes {stable_mosaic.version = 11 : i64} {
  func.func @mlp_kernel(%arg0: i32, %arg1: memref<3x4x1024xf32, #tpu.memory_space<vmem>>, %arg2: memref<1024x1024xf32, #tpu.memory_space<vmem>>, %arg3: memref<1x1024xf32, #tpu.memory_space<vmem>>, %arg4: memref<1024x128xf32, #tpu.memory_space<vmem>>, %arg5: memref<1x128xf32, #tpu.memory_space<vmem>>, %arg6: memref<4x128xf32, #tpu.memory_space<vmem>>, %arg7: memref<4x1024xf32, #tpu.memory_space<vmem>>) attributes {dimension_semantics = [#tpu.dimension_semantics<arbitrary>], iteration_bounds = array<i64: 3>, scalar_prefetch = 0 : i64, scratch_operands = 1 : i64, tpu.core_type = #tpu.core_type<tc>, window_params = [{pipeline_mode = #tpu.pipeline_mode<synchronous>, transform_indices = @transform_0, window_bounds = array<i64: 3, 4, 1024>}, {transform_indices = @transform_1, window_bounds = array<i64: 1024, 1024>}, {pipeline_mode = #tpu.pipeline_mode<synchronous>, transform_indices = @transform_2, window_bounds = array<i64: 1, 1024>}, {pipeline_mode = #tpu.pipeline_mode<synchronous>, transform_indices = @transform_3, window_bounds = array<i64: 1024, 128>}, {pipeline_mode = #tpu.pipeline_mode<synchronous>, transform_indices = @transform_4, window_bounds = array<i64: 1, 128>}, {pipeline_mode = #tpu.pipeline_mode<synchronous>, transform_indices = @transform_5, window_bounds = array<i64: 4, 128>}]} {
    %c0_i32 = arith.constant 0 : i32
    %0 = arith.cmpi eq, %arg0, %c0_i32 : i32
    %1 = arith.extui %0 : i1 to i32
    %c0_i32_0 = arith.constant 0 : i32
    %2 = arith.cmpi ne, %1, %c0_i32_0 : i32
    scf.if %2 {
      %c0_9 = arith.constant 0 : index
      %c0_10 = arith.constant 0 : index
      %14 = vector.load %arg3[%c0_9, %c0_10] : memref<1x1024xf32, #tpu.memory_space<vmem>>, vector<1x1024xf32>
      %15 = vector.shape_cast %14 : vector<1x1024xf32> to vector<1x1024xf32>
      %16 = vector.broadcast %15 : vector<1x1024xf32> to vector<4x1024xf32>
      %c0_11 = arith.constant 0 : index
      %c0_12 = arith.constant 0 : index
      %17 = vector.load %arg7[%c0_11, %c0_12] : memref<4x1024xf32, #tpu.memory_space<vmem>>, vector<4x1024xf32>
      tpu.vector_store %arg7[%c0_11, %c0_12], %16 {strides = array<i32>} : memref<4x1024xf32, #tpu.memory_space<vmem>>, vector<4x1024xf32>,
    } else {
    }
    %c0 = arith.constant 0 : index
    %c0_1 = arith.constant 0 : index
    %3 = vector.load %arg7[%c0, %c0_1] : memref<4x1024xf32, #tpu.memory_space<vmem>>, vector<4x1024xf32>
    %4 = arith.index_cast %arg0 : i32 to index
    %c0_2 = arith.constant 0 : index
    %c0_3 = arith.constant 0 : index
    %5 = vector.load %arg1[%4, %c0_2, %c0_3] : memref<3x4x1024xf32, #tpu.memory_space<vmem>>, vector<1x4x1024xf32>
    %6 = vector.shape_cast %5 : vector<1x4x1024xf32> to vector<4x1024xf32>
    %c0_4 = arith.constant 0 : index
    %c0_5 = arith.constant 0 : index
    %7 = vector.load %arg2[%c0_4, %c0_5] : memref<1024x1024xf32, #tpu.memory_space<vmem>>, vector<1024x1024xf32>
    %cst = arith.constant dense<0.000000e+00> : vector<4x1024xf32>
    %8 = tpu.matmul %6, %7, %cst {dimension_numbers = #tpu.dot_dimension_numbers<[1], [0], [0], [1], [0, 0, 1, 1], [], []>} : vector<4x1024xf32>, vector<1024x1024xf32>, vector<4x1024xf32> -> vector<4x1024xf32>
    %9 = arith.addf %3, %8 : vector<4x1024xf32>
    %c0_6 = arith.constant 0 : index
    %c0_7 = arith.constant 0 : index
    %10 = vector.load %arg7[%c0_6, %c0_7] : memref<4x1024xf32, #tpu.memory_space<vmem>>, vector<4x1024xf32>
    tpu.vector_store %arg7[%c0_6, %c0_7], %9 {strides = array<i32>} : memref<4x1024xf32, #tpu.memory_space<vmem>>, vector<4x1024xf32>,
    %c2_i32 = arith.constant 2 : i32
    %11 = arith.cmpi eq, %arg0, %c2_i32 : i32
    %12 = arith.extui %11 : i1 to i32
    %c0_i32_8 = arith.constant 0 : i32
    %13 = arith.cmpi ne, %12, %c0_i32_8 : i32
    scf.if %13 {
      %c0_9 = arith.constant 0 : index
      %c0_10 = arith.constant 0 : index
      %14 = vector.load %arg7[%c0_9, %c0_10] : memref<4x1024xf32, #tpu.memory_space<vmem>>, vector<4x1024xf32>
      %15 = arith.negf %14 : vector<4x1024xf32>
      %16 = math.exp %15 : vector<4x1024xf32>
      %cst_11 = arith.constant 1.000000e+00 : f32
      %17 = vector.broadcast %cst_11 : f32 to vector<4x1024xf32>
      %18 = arith.addf %17, %16 : vector<4x1024xf32>
      %19 = arith.divf %17, %18 : vector<4x1024xf32>
      %c0_12 = arith.constant 0 : index
      %c0_13 = arith.constant 0 : index
      %20 = vector.load %arg4[%c0_12, %c0_13] : memref<1024x128xf32, #tpu.memory_space<vmem>>, vector<1024x128xf32>
      %cst_14 = arith.constant dense<0.000000e+00> : vector<4x128xf32>
      %21 = tpu.matmul %19, %20, %cst_14 {dimension_numbers = #tpu.dot_dimension_numbers<[1], [0], [0], [1], [0, 0, 1, 1], [], []>} : vector<4x1024xf32>, vector<1024x128xf32>, vector<4x128xf32> -> vector<4x128xf32>
      %c0_15 = arith.constant 0 : index
      %c0_16 = arith.constant 0 : index
      %22 = vector.load %arg5[%c0_15, %c0_16] : memref<1x128xf32, #tpu.memory_space<vmem>>, vector<1x128xf32>
      %23 = vector.broadcast %22 : vector<1x128xf32> to vector<4x128xf32>
      %24 = arith.addf %21, %23 : vector<4x128xf32>
      %25 = arith.negf %24 : vector<4x128xf32>
      %26 = math.exp %25 : vector<4x128xf32>
      %cst_17 = arith.constant 1.000000e+00 : f32
      %27 = vector.broadcast %cst_17 : f32 to vector<4x128xf32>
      %28 = arith.addf %27, %26 : vector<4x128xf32>
      %29 = arith.divf %27, %28 : vector<4x128xf32>
      %c0_18 = arith.constant 0 : index
      %c0_19 = arith.constant 0 : index
      %30 = vector.load %arg6[%c0_18, %c0_19] : memref<4x128xf32, #tpu.memory_space<vmem>>, vector<4x128xf32>
      tpu.vector_store %arg6[%c0_18, %c0_19], %29 {strides = array<i32>} : memref<4x128xf32, #tpu.memory_space<vmem>>, vector<4x128xf32>,
    } else {
    }
    return
  }
  func.func @transform_0(%arg0: i32) -> (i32, i32, i32) {
    %c0_i32 = arith.constant 0 : i32
    %c0_i32_0 = arith.constant 0 : i32
    %c0_i32_1 = arith.constant 0 : i32
    %c0_i32_2 = arith.constant 0 : i32
    return %c0_i32, %c0_i32_0, %c0_i32_1 : i32, i32, i32
  }
  func.func @transform_1(%arg0: i32) -> (i32, i32) {
    %c0_i32 = arith.constant 0 : i32
    %c0_i32_0 = arith.constant 0 : i32
    return %arg0, %c0_i32 : i32, i32
  }
  func.func @transform_2(%arg0: i32) -> (i32, i32) {
    %c0_i32 = arith.constant 0 : i32
    %c0_i32_0 = arith.constant 0 : i32
    %c0_i32_1 = arith.constant 0 : i32
    return %c0_i32, %c0_i32_0 : i32, i32
  }
  func.func @transform_3(%arg0: i32) -> (i32, i32) {
    %c0_i32 = arith.constant 0 : i32
    %c0_i32_0 = arith.constant 0 : i32
    %c0_i32_1 = arith.constant 0 : i32
    return %c0_i32, %c0_i32_0 : i32, i32
  }
  func.func @transform_4(%arg0: i32) -> (i32, i32) {
    %c0_i32 = arith.constant 0 : i32
    %c0_i32_0 = arith.constant 0 : i32
    %c0_i32_1 = arith.constant 0 : i32
    return %c0_i32, %c0_i32_0 : i32, i32
  }
  func.func @transform_5(%arg0: i32) -> (i32, i32) {
    %c0_i32 = arith.constant 0 : i32
    %c0_i32_0 = arith.constant 0 : i32
    %c0_i32_1 = arith.constant 0 : i32
    return %c0_i32, %c0_i32_0 : i32, i32
  }
}

</mosaic_0001>

<bundles_post_ra>
// kernel: tpu_custom_call.1
= control target key start
LH: loop header
LB: loop body
LE: loop exit
PB: predicated region body
PF: predicated region fallthrough
CT: control target
= control target key end

     0   :  { %10 = vsyncpa [#allocation4], 0  ;;  %s6173_s0 = inlined_call_operand.hbm [shape: f32[3,4,1024], index: 0, kind: input, shape index: {}]   ;;  %s6174_s1 = inlined_call_operand.hbm [shape: f32[3072,1024], index: 1, kind: input, shape index: {}]   ;;  %s6175_s2 = inlined_call_operand.hbm [shape: f32[1,1024], index: 2, kind: input, shape index: {}]   ;;  %s6176_s3 = inlined_call_operand.hbm [shape: f32[1024,128], index: 3, kind: input, shape index: {}]   ;;  %s6177_s4 = inlined_call_operand.hbm [shape: f32[1,128], index: 4, kind: input, shape index: {}]   ;;  %s6178_s5 = inlined_call_operand.hbm [shape: f32[4,128], index: 5, kind: output, shape index: {}]  }
   0x1   :  { %11 = vsyncpa [#allocation7], 0 }
   0x2   :  { %13 = vsyncpa [#allocation7 + $0x1], 0 }
   0x3   :  { %14 = vsyncpa [#allocation10], 0 }
   0x4   :  { %15 = vsyncpa [#allocation5], 0  ;;  %s4842_s18 = smov 0   ;;  %s4844_s19 = smov 0  }
   0x5   :  { %s4846_s20 = smov 0   ;;  %s4848_s21 = smov 0  }
   0x6 LB: > { %s4861_s22 = sadd.s32 4294967295, %s4798_s21   ;;  %p62_p0 = scmp.ne.s32.totalorder %s4790_s19, %s4786_s18  ;;  %s4798_s21 = sphi %s4848_s21, %s6199_s21   ;;  %s4794_s20 = sphi %s4846_s20, %s6198_s20   ;;  %s4790_s19 = sphi %s4844_s19, %s6197_s19   ;;  %s4786_s18 = sphi %s4842_s18, %s6196_s18  }
   0x7   : > { %p6179_p1 = scmp.eq.s32.totalorder %s4861_s22, 0  ;;  %p3110_p2 = scmp.ge.s32.totalorder %s4798_s21, 1 }
   0x8   : > { %p157_p3 = scmp.lt.s32.totalorder %s4798_s21, 4  ;;  %s4800_s25 = smov [#allocation8]  }
   0x9   : > { %p4870_p5 = por %p6179_p1, %p62_p0  ;;  %s183_s26 = sshll.u32 %s4800_s25, 4  ;;  %s184_s26 = int_to_ptr.vmem [resolvable:$true] %s183_s26 }
   0xa   : > { %p4874_p6 = pnand %p3110_p2, %p157_p3  ;;  %s4801_s27 = smov [#allocation9]  }
   0xb   : > { %s6182_s23 = scalar_select %p4870_p5, 1, 0 }
   0xc   : > { %s6183_s24 = scalar_select %p4874_p6, 1, 0 }
   0xd   : > { %p4481_p7 = pneg %p4874_p6  ;;  %s193_s28 = sshll.u32 %s4801_s27, 4  ;;  %s4886_s28 = int_to_ptr.vmem [resolvable:$true] %s193_s28 }
   0xe   : > { %s4802_s30 = smov [#allocation3]   ;;  %s4580_s9 = scalar_lea.hbm %s6175_s2, 128 }
   0xf   : > { %p4882_p8 = pnand %p4481_p7, %p6179_p1  ;;  %s4888_s6 = sshll.u32 %s4802_s30, 4  ;;  %s170_s6 = int_to_ptr.vmem [resolvable:$true] %s4888_s6 }
  0x10   : > { %p4581_p9 = scmp.ne.s32.totalorder %s6175_s2, %s4580_s9  ;;  %p4587_p13 = scmp.lt.u32.totalorder %s4580_s9, %s6175_s2 }
  0x11   : > { %p4898_p10 = pneg %p4882_p8 }
  0x13   : > { %p4583_p11 = pnand %p4898_p10, %p4581_p9 }
  0x15   : > { %p4584_p12 = pneg %p4583_p11 }
  0x17   : > { %p4589_p0 = pnand %p4587_p13, %p4584_p12 }
  0x19   : > { %4592 = shalt.err (!%p4589_p0)
}
  0x1a   : > { %s4593_s15 = scalar_lea.vmem %s184_s26, 128  ;;  %p4601_p4 = scmp.lt.s32.totalorder %s184_s26, %s184_s26 }
  0x1b   : > { %p4594_p2 = scmp.ne.s32.totalorder %s184_s26, %s4593_s15  ;;  %p4602_p1 = scmp.lt.s32.totalorder %s4593_s15, %s4593_s15 }
  0x1d   : > { %p4596_p3 = pnand %p4594_p2, %p4898_p10  ;;  %p4603_p5 = por %p4602_p1, %p4601_p4 }
  0x1f   : > { %p4597_p7 = pneg %p4596_p3 }
  0x21   : > { %p4604_p6 = pnand %p4603_p5, %p4597_p7 }
  0x23   : > { %4607 = shalt.err (!%p4604_p6)
}
  0x24   : > { %4487 = dma.hbm_to_vmem [thread:$0]  (!%p4882_p8), %s6175_s2, 128, %s184_s26, [#allocation7]  }
  0x25   : > { %s4608_s27 = scalar_lea.hbm %s6176_s3, 16384 }
  0x26   : > { %p4609_p9 = scmp.ne.s32.totalorder %s6176_s3, %s4608_s27  ;;  %p4615_p4 = scmp.lt.u32.totalorder %s4608_s27, %s6176_s3 }
  0x28   : > { %p4611_p11 = pnand %p4609_p9, %p4898_p10 }
  0x2a   : > { %p4612_p1 = pneg %p4611_p11 }
  0x2c   : > { %p4617_p5 = pnand %p4615_p4, %p4612_p1 }
  0x2e   : > { %4620 = shalt.err (!%p4617_p5)
}
  0x2f   : > { %s4621_s26 = scalar_lea.vmem %s4886_s28, 16384  ;;  %p4629_p0 = scmp.lt.s32.totalorder %s4886_s28, %s4886_s28 }
  0x30   : > { %p4622_p6 = scmp.ne.s32.totalorder %s4886_s28, %s4621_s26  ;;  %p4630_p2 = scmp.lt.s32.totalorder %s4621_s26, %s4621_s26 }
  0x32   : > { %p4624_p12 = pnand %p4622_p6, %p4898_p10  ;;  %p4631_p3 = por %p4630_p2, %p4629_p0 }
  0x34   : > { %p4625_p13 = pneg %p4624_p12 }
  0x36   : > { %p4632_p7 = pnand %p4631_p3, %p4625_p13 }
  0x38   : > { %4635 = shalt.err (!%p4632_p7)
}
  0x39   : > { %s4803_s10 = smov 128   ;;  %s4804_s11 = smov 8  }
  0x3a   : > { %4490 = dma.hbm_to_vmem [thread:$0]  (!%p4882_p8), %s6176_s3, 16384, %s4886_s28, [#allocation10], %s4803_s10, %s4803_s10, %s4804_s11  }
  0x3b   : > { %s4636_s17 = scalar_lea.hbm %s6173_s0, 1536 }
  0x3c   : > { %p4637_p9 = scmp.ne.s32.totalorder %s6173_s0, %s4636_s17  ;;  %p4643_p4 = scmp.lt.u32.totalorder %s4636_s17, %s6173_s0 }
  0x3e   : > { %p4639_p11 = pnand %p4637_p9, %p4898_p10 }
  0x40   : > { %p4640_p1 = pneg %p4639_p11 }
  0x42   : > { %p4645_p5 = pnand %p4643_p4, %p4640_p1 }
  0x44   : > { %4648 = shalt.err (!%p4645_p5)
}
  0x45   : > { %s4649_s7 = scalar_lea.vmem %s170_s6, 1536  ;;  %p4657_p0 = scmp.lt.s32.totalorder %s170_s6, %s170_s6 }
  0x46   : > { %p4650_p6 = scmp.ne.s32.totalorder %s170_s6, %s4649_s7  ;;  %p4658_p2 = scmp.lt.s32.totalorder %s4649_s7, %s4649_s7 }
  0x48   : > { %p4652_p12 = pnand %p4650_p6, %p4898_p10  ;;  %p4659_p3 = por %p4658_p2, %p4657_p0 }
  0x4a   : > { %p4653_p13 = pneg %p4652_p12 }
  0x4c   : > { %p4660_p7 = pnand %p4659_p3, %p4653_p13 }
  0x4e   : > { %4663 = shalt.err (!%p4660_p7)
}
  0x4f   : > { %s4805_s28 = smov 512   ;;  %s4806_s8 = smov 32  }
  0x50   : > { %4484 = dma.hbm_to_vmem [thread:$0]  (!%p4882_p8), %s6173_s0, 1536, %s170_s6, [#allocation4], %s4805_s28, %s4805_s28, %s4806_s8  }
  0x51   : > { %s4807_s10 = smov [#allocation11]   ;;  %s4664_s15 = scalar_lea.hbm %s6177_s4, 16 }
  0x52   : > { %s207_s11 = sshll.u32 %s4807_s10, 4  ;;  %p4665_p9 = scmp.ne.s32.totalorder %s6177_s4, %s4664_s15  ;;  %s208_s11 = int_to_ptr.vmem [resolvable:$true] %s207_s11 }
  0x53   : > { %p4671_p4 = scmp.lt.u32.totalorder %s4664_s15, %s6177_s4 }
  0x54   : > { %p4667_p11 = pnand %p4665_p9, %p4898_p10 }
  0x56   : > { %p4668_p1 = pneg %p4667_p11 }
  0x58   : > { %p4673_p5 = pnand %p4671_p4, %p4668_p1 }
  0x5a   : > { %4676 = shalt.err (!%p4673_p5)
}
  0x5b   : > { %s4677_s6 = scalar_lea.vmem %s208_s11, 16  ;;  %s4684_s27 = scalar_lea.vmem %s208_s11, 32 }
  0x5c   : > { %p4678_p6 = scmp.ne.s32.totalorder %s208_s11, %s4677_s6  ;;  %p4685_p0 = scmp.lt.s32.totalorder %s208_s11, %s208_s11 }
  0x5d   : > { %p4686_p2 = scmp.lt.s32.totalorder %s4684_s27, %s4677_s6 }
  0x5e   : > { %p4680_p12 = pnand %p4678_p6, %p4898_p10 }
  0x5f   : > { %p4687_p3 = por %p4686_p2, %p4685_p0 }
  0x60   : > { %p4681_p13 = pneg %p4680_p12 }
  0x62   : > { %p4688_p7 = pnand %p4687_p3, %p4681_p13 }
  0x64   : > { %4691 = shalt.err (!%p4688_p7)
}
  0x65   : > { %4493 = dma.hbm_to_vmem [thread:$0]  (!%p4882_p8), %s6177_s4, 16, %s208_s11, [#allocation10]  }
  0x66   : > { %s4975_s12 = sadd.s32 1, %s4798_s21   ;;  %s49_s28 = sadd.s32 1, %s4794_s20 }
  0x67   : > { %s46_s29 = ssub.s32 %s4798_s21, %s4975_s12  ;;  %p56_p10 = scmp.ne.s32.totalorder %s4794_s20, %s4790_s19 }
  0x68   : > { %p47_p9 = scmp.eq.s32.totalorder %s46_s29, 0  ;;  %p57_p11 = scmp.eq.s32.totalorder %s4798_s21, 0 }
  0x69   : > { %p4502_p1 = scmp.lt.s32.totalorder %s4798_s21, 3  ;;  %s218_s8 = sand.u32 1, %s4798_s21  }
  0x6a   : > { %s4986_s9 = scalar_select %p47_p9, %s4794_s20, %s49_s28  }
  0x6b   : > { %p58_p4 = por %p57_p11, %p56_p10  ;;  %s220_s26 = sand.u32 1, %s4794_s20  }
  0x6c   : > { %s3141_s10 = sshll.u32 %s4798_s21, 17  ;;  %s3116_s13 = sshll.u32 %s220_s26, 13 }
  0x6d   : > { %s4993_s11 = scalar_lea.hbm %s6174_s1, %s3141_s10  ;;  %p4995_p8 = pnand %p4502_p1, %p58_p4 }
  0x6e   : > { %s222_s17 = scalar_lea.vmem [#allocation6], %s3116_s13  ;;  %s5001_s21 = scalar_lea.sflag [#allocation7], %s218_s8 }
  0x6f   : > { %s230_s18 = sshll.u32 %s222_s17, 4  ;;  %s4692_s25 = scalar_lea.hbm %s4993_s11, 131072  ;;  %s4999_s18 = int_to_ptr.vmem [resolvable:$true] %s230_s18 }
  0x70   : > { %p4693_p5 = scmp.ne.s32.totalorder %s4993_s11, %s4692_s25  ;;  %p4694_p6 = pneg %p4995_p8 }
  0x71   : > { %s4697_s30 = scalar_lea.hbm %s6174_s1, 393216  ;;  %p4698_p0 = scmp.lt.u32.totalorder %s4993_s11, %s6174_s1 }
  0x72   : > { %p4695_p12 = pnand %p4694_p6, %p4693_p5  ;;  %p4699_p2 = scmp.lt.u32.totalorder %s4697_s30, %s4692_s25 }
  0x73   : > { %p4701_p7 = scmp.lt.u32.totalorder %s4692_s25, %s4993_s11 }
  0x74   : > { %p4696_p13 = pneg %p4695_p12  ;;  %p4700_p3 = por %p4699_p2, %p4698_p0 }
  0x76   : > { %p4702_p10 = por %p4701_p7, %p4700_p3 }
  0x78   : > { %p4703_p9 = pnand %p4702_p10, %p4696_p13 }
  0x7a   : > { %4706 = shalt.err (!%p4703_p9)
}
  0x7b   : > { %s4707_s29 = scalar_lea.vmem %s4999_s18, 131072  ;;  %s4808_s8 = smov [#allocation6]  }
  0x7c   : > { %p4708_p11 = scmp.ne.s32.totalorder %s4999_s18, %s4707_s29  ;;  %s4712_s26 = sshll.u32 %s4808_s8, 4  ;;  %s4713_s26 = int_to_ptr.vmem [resolvable:$false] %s4712_s26 }
  0x7d   : > { %s4714_s10 = scalar_lea.vmem %s4713_s26, 262144  ;;  %p4715_p5 = scmp.lt.s32.totalorder %s4999_s18, %s4713_s26 }
  0x7e   : > { %p4710_p1 = pnand %p4708_p11, %p4694_p6  ;;  %p4716_p12 = scmp.lt.s32.totalorder %s4714_s10, %s4707_s29 }
  0x80   : > { %p4711_p4 = pneg %p4710_p1  ;;  %p4717_p0 = por %p4716_p12, %p4715_p5 }
  0x82   : > { %p4718_p2 = pnand %p4717_p0, %p4711_p4 }
  0x84   : > { %4721 = shalt.err (!%p4718_p2)
}
  0x85   : > { %s4809_s13 = smov 1024   ;;  %s4810_s14 = smov 64  }
  0x86   : > { %4497 = dma.hbm_to_vmem [thread:$0]  (!%p4995_p8), %s4993_s11, 131072, %s4999_s18, %s5001_s21, %s4809_s13, %s4809_s13, %s4810_s14  }
  0x87   : > { %p6187_p6 = scmp.ne.s32.totalorder %s6183_s24, 0 }
  0x88   : > { %p6188_p13 = scmp.eq.s32.totalorder (!%p6187_p6), %s4861_s22, 0 }
  0x89   : > { %242 = sbr.rel (%p6187_p6) target bundleno = 1222 (0x4c6), region = 40 }
  0x90   : > { %4765 = dma.done.wait (%p6188_p13), [#allocation4], 1536   ;;  %p6189_p3 = pmov %p6188_p13 }
  0x91   : > { %s248_s15 = sand.u32 1, %s4861_s22   ;;  %s250_s17 = sand.u32 1, %s4790_s19  }
  0x92   : > { %4767 = vsyncadd (%p6189_p3), [#allocation4], 4294965760  ;;  %s3122_s25 = sshll.u32 %s250_s17, 13  ;;  %s249_s6 = scalar_lea.sflag [#allocation7], %s248_s15 }
  0x93   : > { %s5037_s27 = scalar_lea.vmem [#allocation6], %s3122_s25  ;;  %p6190_p7 = scmp.ne.s32.totalorder %s6182_s23, 0 }
  0x95   : > { %4769 = dma.done.wait (%p6190_p7), %s249_s6, 131072  }
  0x96   : > { %4771 = vsyncadd (%p6190_p7), %s249_s6, 4294836224  ;;  %p6191_p8 = pmov %p6189_p3 }
  0x97   : > { %p6192_p10 = pmov %p6189_p3 }
  0x98   : > { %4773 = dma.done.wait (%p6191_p8), [#allocation7], 128  }
  0x99   : > { %4775 = vsyncadd (%p6192_p10), [#allocation7], 4294967168  ;;  %p6193_p9 = pmov %p6189_p3 }
  0x9a   : > { %p6194_p11 = pmov %p6189_p3 }
  0x9b   : > { %4777 = dma.done.wait (%p6193_p9), [#allocation10], 16400  }
  0x9c   : > { %4779 = vsyncadd (%p6194_p11), [#allocation10], 4294950896  ;;  %p6195_p1 = scmp.ne.s32.totalorder %s4861_s22, 0 }
  0x9d   : > { %v293_v0 = vlaneseq (!%p6195_p1)  ;;  %v291_v2 = vld [vmem:[#allocation8] sm:$0xff] (!%p6195_p1) }
  0x9e   : > { %290 = sbr.rel (%p6195_p1) target bundleno = 169 (0xa9), region = 64 }
  0x9f   : > { %v294_v1 = vshrl.u32 (!%p6195_p1), %v293_v0, 7 }
  0xa1   : > { %v295_v3 = vsub.s32 (!%p6195_p1), 0, %v294_v1  ;;  %v299_v4 = vsub.s32 (!%p6195_p1), 1, %v294_v1  ;;  %v303_v5 = vsub.s32 (!%p6195_p1), 2, %v294_v1  ;;  %v307_v6 = vsub.s32 (!%p6195_p1), 3, %v294_v1 }
  0xa2   : > { %v311_v7 = vsub.s32 (!%p6195_p1), 4, %v294_v1  ;;  %v315_v8 = vsub.s32 (!%p6195_p1), 5, %v294_v1  ;;  %v319_v9 = vsub.s32 (!%p6195_p1), 6, %v294_v1  ;;  %v323_v10 = vsub.s32 (!%p6195_p1), 7, %v294_v1 }
  0xa3   : > { %v296_v11 = vrot.slane (!%p6195_p1), %v291_v2, %v295_v3  ;;  %v300_v12 = vrot.slane (!%p6195_p1), %v291_v2, %v299_v4  ;;  %v304_v13 = vrot.slane (!%p6195_p1), %v291_v2, %v303_v5  ;;  %v308_v14 = vrot.slane (!%p6195_p1), %v291_v2, %v307_v6 }
  0xa4   : > { %v312_v15 = vrot.slane (!%p6195_p1), %v291_v2, %v311_v7  ;;  %v316_v16 = vrot.slane (!%p6195_p1), %v291_v2, %v315_v8  ;;  %v320_v17 = vrot.slane (!%p6195_p1), %v291_v2, %v319_v9  ;;  %v324_v18 = vrot.slane (!%p6195_p1), %v291_v2, %v323_v10 }
  0xa5   : > { %v325_v19 = vcombine.low %v296_v11, %v300_v12  ;;  %v326_v20 = vcombine.low %v304_v13, %v308_v14 }
  0xa6   : > { %v327_v21 = vcombine.low %v312_v15, %v316_v16  ;;  %v328_v22 = vcombine.low %v320_v17, %v324_v18 }
  0xa7   : > { %333 = vst [vmem:[#allocation2] sm:$0xff] %v325_v19  ;;  %334 = vst [vmem:[#allocation2 + $0x8] sm:$0xff] %v326_v20 }
  0xa8   : > { %335 = vst [vmem:[#allocation2 + $0x10] sm:$0xff] %v327_v21  ;;  %336 = vst [vmem:[#allocation2 + $0x18] sm:$0xff] %v328_v22 }
  0xa9 PF: > { %v349_v23 = vld [vmem:[%s5037_s27 + $0x8] sm:$0xff]  ;;  %v351_v25 = vld [vmem:[%s5037_s27 + $0x18] sm:$0xff]  ;;  %v348_v28 = vld [vmem:[%s5037_s27] sm:$0xff]  ;;  %s3142_s23 = sshll.u32 %s4861_s22, 5  ;;  %p3129_p4 = scmp.ne.s32.totalorder %s4861_s22, 2 }
  0xaa   : > { %v357_v24 = vld [vmem:[%s5037_s27 + $0x48] sm:$0xff]  ;;  %v359_v27 = vld [vmem:[%s5037_s27 + $0x58] sm:$0xff]  ;;  %v356_v29 = vld [vmem:[%s5037_s27 + $0x40] sm:$0xff]  ;;  %s5152_s24 = scalar_lea.vmem [#allocation3], %s3142_s23 }
  0xab   : > { %v3283_v26 = vpack.c.bf16 %v357_v24, %v349_v23  ;;  %v3539_v30 = vpack.c.bf16 %v359_v27, %v351_v25  ;;  %v3285_v31 = vpack.c.bf16 %v356_v29, %v348_v28  ;;  %v350_v32 = vld [vmem:[%s5037_s27 + $0x10] sm:$0xff]  ;;  %v365_v34 = vld [vmem:[%s5037_s27 + $0x88] sm:$0xff]  ;;  %v367_v37 = vld [vmem:[%s5037_s27 + $0x98] sm:$0xff] }
  0xac   : > { %v358_v33 = vld [vmem:[%s5037_s27 + $0x50] sm:$0xff]  ;;  %v373_v36 = vld [vmem:[%s5037_s27 + $0xc8] sm:$0xff]  ;;  %v375_v38 = vld [vmem:[%s5037_s27 + $0xd8] sm:$0xff] }
  0xad   : > { %3284 = vmatprep.subr.bf16.mxu0 %v3283_v26  ;;  %v3541_v35 = vpack.c.bf16 %v358_v33, %v350_v32  ;;  %3540 = vmatprep.subr.bf16.mxu1 %v3539_v30  ;;  %v3287_v39 = vpack.c.bf16 %v373_v36, %v365_v34  ;;  %v3543_v40 = vpack.c.bf16 %v375_v38, %v367_v37  ;;  %v364_v41 = vld [vmem:[%s5037_s27 + $0x80] sm:$0xff]  ;;  %v366_v43 = vld [vmem:[%s5037_s27 + $0x90] sm:$0xff]  ;;  %v381_v46 = vld [vmem:[%s5037_s27 + $0x108] sm:$0xff] }
  0xae   : > { %3286 = vmatpush1.bf16.msra.mxu0 %v3285_v31  ;;  %v372_v42 = vld [vmem:[%s5037_s27 + $0xc0] sm:$0xff]  ;;  %v374_v45 = vld [vmem:[%s5037_s27 + $0xd0] sm:$0xff]  ;;  %v389_v47 = vld [vmem:[%s5037_s27 + $0x148] sm:$0xff] }
  0xaf   : > { %3542 = vmatpush1.bf16.msra.mxu1 %v3541_v35  ;;  %v3289_v44 = vpack.c.bf16 %v372_v42, %v364_v41  ;;  %3288 = vmatprep.subr.bf16.mxu0 %v3287_v39  ;;  %v3545_v48 = vpack.c.bf16 %v374_v45, %v366_v43  ;;  %v3291_v49 = vpack.c.bf16 %v389_v47, %v381_v46  ;;  %v383_v50 = vld [vmem:[%s5037_s27 + $0x118] sm:$0xff]  ;;  %v380_v52 = vld [vmem:[%s5037_s27 + $0x100] sm:$0xff]  ;;  %v382_v55 = vld [vmem:[%s5037_s27 + $0x110] sm:$0xff] }
  0xb0   : > { %3544 = vmatprep.subr.bf16.mxu1 %v3543_v40  ;;  %v391_v51 = vld [vmem:[%s5037_s27 + $0x158] sm:$0xff]  ;;  %v388_v54 = vld [vmem:[%s5037_s27 + $0x140] sm:$0xff]  ;;  %v390_v56 = vld [vmem:[%s5037_s27 + $0x150] sm:$0xff] }
  0xb1   : > { %v3547_v53 = vpack.c.bf16 %v391_v51, %v383_v50  ;;  %v3293_v57 = vpack.c.bf16 %v388_v54, %v380_v52  ;;  %v397_v58 = vld [vmem:[%s5037_s27 + $0x188] sm:$0xff]  ;;  %v399_v60 = vld [vmem:[%s5037_s27 + $0x198] sm:$0xff]  ;;  %v3549_v61 = vpack.c.bf16 %v390_v56, %v382_v55  ;;  %v396_v0 = vld [vmem:[%s5037_s27 + $0x180] sm:$0xff] }
  0xb2   : > { %3290 = vmatpush1.bf16.msra.mxu0 %v3289_v44  ;;  %v405_v59 = vld [vmem:[%s5037_s27 + $0x1c8] sm:$0xff]  ;;  %v407_v63 = vld [vmem:[%s5037_s27 + $0x1d8] sm:$0xff]  ;;  %v404_v1 = vld [vmem:[%s5037_s27 + $0x1c0] sm:$0xff] }
  0xb3   : > { %3546 = vmatpush1.bf16.msra.mxu1 %v3545_v48  ;;  %3292 = vmatprep.subr.bf16.mxu0 %v3291_v49  ;;  %v3295_v62 = vpack.c.bf16 %v405_v59, %v397_v58  ;;  %v3551_v2 = vpack.c.bf16 %v407_v63, %v399_v60  ;;  %v398_v3 = vld [vmem:[%s5037_s27 + $0x190] sm:$0xff]  ;;  %v413_v5 = vld [vmem:[%s5037_s27 + $0x208] sm:$0xff]  ;;  %v415_v7 = vld [vmem:[%s5037_s27 + $0x218] sm:$0xff]  ;;  %v3297_v9 = vpack.c.bf16 %v404_v1, %v396_v0 }
  0xb4   : > { %3548 = vmatprep.subr.bf16.mxu1 %v3547_v53  ;;  %v406_v4 = vld [vmem:[%s5037_s27 + $0x1d0] sm:$0xff]  ;;  %v421_v6 = vld [vmem:[%s5037_s27 + $0x248] sm:$0xff]  ;;  %v423_v8 = vld [vmem:[%s5037_s27 + $0x258] sm:$0xff] }
  0xb5   : > { %v3553_v10 = vpack.c.bf16 %v406_v4, %v398_v3  ;;  %v3299_v11 = vpack.c.bf16 %v421_v6, %v413_v5  ;;  %v412_v12 = vld [vmem:[%s5037_s27 + $0x200] sm:$0xff]  ;;  %v414_v14 = vld [vmem:[%s5037_s27 + $0x210] sm:$0xff]  ;;  %v3555_v15 = vpack.c.bf16 %v423_v8, %v415_v7  ;;  %v429_v17 = vld [vmem:[%s5037_s27 + $0x288] sm:$0xff] }
  0xb6   : > { %3294 = vmatpush1.bf16.msra.mxu0 %v3293_v57  ;;  %v420_v13 = vld [vmem:[%s5037_s27 + $0x240] sm:$0xff]  ;;  %v422_v16 = vld [vmem:[%s5037_s27 + $0x250] sm:$0xff]  ;;  %v437_v18 = vld [vmem:[%s5037_s27 + $0x2c8] sm:$0xff] }
  0xb7   : > { %3550 = vmatpush1.bf16.msra.mxu1 %v3549_v61  ;;  %3296 = vmatprep.subr.bf16.mxu0 %v3295_v62  ;;  %v431_v19 = vld [vmem:[%s5037_s27 + $0x298] sm:$0xff]  ;;  %v3301_v21 = vpack.c.bf16 %v420_v13, %v412_v12  ;;  %v3557_v22 = vpack.c.bf16 %v422_v16, %v414_v14  ;;  %v3303_v23 = vpack.c.bf16 %v437_v18, %v429_v17  ;;  %v428_v24 = vld [vmem:[%s5037_s27 + $0x280] sm:$0xff]  ;;  %v430_v26 = vld [vmem:[%s5037_s27 + $0x290] sm:$0xff] }
  0xb8   : > { %3552 = vmatprep.subr.bf16.mxu1 %v3551_v2  ;;  %v439_v20 = vld [vmem:[%s5037_s27 + $0x2d8] sm:$0xff]  ;;  %v436_v25 = vld [vmem:[%s5037_s27 + $0x2c0] sm:$0xff]  ;;  %v438_v28 = vld [vmem:[%s5037_s27 + $0x2d0] sm:$0xff] }
  0xb9   : > { %v3559_v27 = vpack.c.bf16 %v439_v20, %v431_v19  ;;  %v445_v29 = vld [vmem:[%s5037_s27 + $0x308] sm:$0xff]  ;;  %v447_v31 = vld [vmem:[%s5037_s27 + $0x318] sm:$0xff]  ;;  %v3305_v33 = vpack.c.bf16 %v436_v25, %v428_v24  ;;  %v3561_v34 = vpack.c.bf16 %v438_v28, %v430_v26  ;;  %v444_v36 = vld [vmem:[%s5037_s27 + $0x300] sm:$0xff] }
  0xba   : > { %3298 = vmatpush1.bf16.msra.mxu0 %v3297_v9  ;;  %v453_v30 = vld [vmem:[%s5037_s27 + $0x348] sm:$0xff]  ;;  %v455_v32 = vld [vmem:[%s5037_s27 + $0x358] sm:$0xff]  ;;  %v452_v37 = vld [vmem:[%s5037_s27 + $0x340] sm:$0xff] }
  0xbb   : > { %3554 = vmatpush1.bf16.msra.mxu1 %v3553_v10  ;;  %3300 = vmatprep.subr.bf16.mxu0 %v3299_v11  ;;  %v3307_v35 = vpack.c.bf16 %v453_v30, %v445_v29  ;;  %v446_v38 = vld [vmem:[%s5037_s27 + $0x310] sm:$0xff]  ;;  %v3563_v39 = vpack.c.bf16 %v455_v32, %v447_v31  ;;  %v461_v41 = vld [vmem:[%s5037_s27 + $0x388] sm:$0xff]  ;;  %v463_v43 = vld [vmem:[%s5037_s27 + $0x398] sm:$0xff]  ;;  %v3309_v45 = vpack.c.bf16 %v452_v37, %v444_v36 }
  0xbc   : > { %3556 = vmatprep.subr.bf16.mxu1 %v3555_v15  ;;  %v454_v40 = vld [vmem:[%s5037_s27 + $0x350] sm:$0xff]  ;;  %v469_v42 = vld [vmem:[%s5037_s27 + $0x3c8] sm:$0xff]  ;;  %v471_v44 = vld [vmem:[%s5037_s27 + $0x3d8] sm:$0xff] }
  0xbd   : > { %v3565_v46 = vpack.c.bf16 %v454_v40, %v446_v38  ;;  %v3311_v47 = vpack.c.bf16 %v469_v42, %v461_v41  ;;  %v460_v48 = vld [vmem:[%s5037_s27 + $0x380] sm:$0xff]  ;;  %v462_v50 = vld [vmem:[%s5037_s27 + $0x390] sm:$0xff]  ;;  %v3567_v51 = vpack.c.bf16 %v471_v44, %v463_v43  ;;  %v477_v53 = vld [vmem:[%s5037_s27 + $0x408] sm:$0xff] }
  0xbe   : > { %3302 = vmatpush1.bf16.msra.mxu0 %v3301_v21  ;;  %v468_v49 = vld [vmem:[%s5037_s27 + $0x3c0] sm:$0xff]  ;;  %v470_v52 = vld [vmem:[%s5037_s27 + $0x3d0] sm:$0xff]  ;;  %v485_v54 = vld [vmem:[%s5037_s27 + $0x448] sm:$0xff] }
  0xbf   : > { %3558 = vmatpush1.bf16.msra.mxu1 %v3557_v22  ;;  %3304 = vmatprep.subr.bf16.mxu0 %v3303_v23  ;;  %v479_v55 = vld [vmem:[%s5037_s27 + $0x418] sm:$0xff]  ;;  %v3313_v57 = vpack.c.bf16 %v468_v49, %v460_v48  ;;  %v3569_v58 = vpack.c.bf16 %v470_v52, %v462_v50  ;;  %v3315_v59 = vpack.c.bf16 %v485_v54, %v477_v53  ;;  %v476_v60 = vld [vmem:[%s5037_s27 + $0x400] sm:$0xff]  ;;  %v478_v62 = vld [vmem:[%s5037_s27 + $0x410] sm:$0xff] }
  0xc0   : > { %3560 = vmatprep.subr.bf16.mxu1 %v3559_v27  ;;  %v487_v56 = vld [vmem:[%s5037_s27 + $0x458] sm:$0xff]  ;;  %v484_v61 = vld [vmem:[%s5037_s27 + $0x440] sm:$0xff]  ;;  %v486_v0 = vld [vmem:[%s5037_s27 + $0x450] sm:$0xff] }
  0xc1   : > { %v3571_v63 = vpack.c.bf16 %v487_v56, %v479_v55  ;;  %v493_v1 = vld [vmem:[%s5037_s27 + $0x488] sm:$0xff]  ;;  %v495_v3 = vld [vmem:[%s5037_s27 + $0x498] sm:$0xff]  ;;  %v3317_v5 = vpack.c.bf16 %v484_v61, %v476_v60  ;;  %v3573_v6 = vpack.c.bf16 %v486_v0, %v478_v62  ;;  %v492_v8 = vld [vmem:[%s5037_s27 + $0x480] sm:$0xff] }
  0xc2   : > { %3306 = vmatpush1.bf16.msra.mxu0 %v3305_v33  ;;  %v501_v2 = vld [vmem:[%s5037_s27 + $0x4c8] sm:$0xff]  ;;  %v503_v4 = vld [vmem:[%s5037_s27 + $0x4d8] sm:$0xff]  ;;  %v500_v9 = vld [vmem:[%s5037_s27 + $0x4c0] sm:$0xff] }
  0xc3   : > { %3562 = vmatpush1.bf16.msra.mxu1 %v3561_v34  ;;  %3308 = vmatprep.subr.bf16.mxu0 %v3307_v35  ;;  %v3319_v7 = vpack.c.bf16 %v501_v2, %v493_v1  ;;  %v494_v10 = vld [vmem:[%s5037_s27 + $0x490] sm:$0xff]  ;;  %v3575_v11 = vpack.c.bf16 %v503_v4, %v495_v3  ;;  %v509_v13 = vld [vmem:[%s5037_s27 + $0x508] sm:$0xff]  ;;  %v511_v15 = vld [vmem:[%s5037_s27 + $0x518] sm:$0xff]  ;;  %v3321_v17 = vpack.c.bf16 %v500_v9, %v492_v8 }
  0xc4   : > { %3564 = vmatprep.subr.bf16.mxu1 %v3563_v39  ;;  %v502_v12 = vld [vmem:[%s5037_s27 + $0x4d0] sm:$0xff]  ;;  %v517_v14 = vld [vmem:[%s5037_s27 + $0x548] sm:$0xff]  ;;  %v519_v16 = vld [vmem:[%s5037_s27 + $0x558] sm:$0xff] }
  0xc5   : > { %v3577_v18 = vpack.c.bf16 %v502_v12, %v494_v10  ;;  %v3323_v19 = vpack.c.bf16 %v517_v14, %v509_v13  ;;  %v508_v20 = vld [vmem:[%s5037_s27 + $0x500] sm:$0xff]  ;;  %v510_v22 = vld [vmem:[%s5037_s27 + $0x510] sm:$0xff]  ;;  %v3579_v23 = vpack.c.bf16 %v519_v16, %v511_v15  ;;  %v525_v25 = vld [vmem:[%s5037_s27 + $0x588] sm:$0xff] }
  0xc6   : > { %3310 = vmatpush1.bf16.msra.mxu0 %v3309_v45  ;;  %v516_v21 = vld [vmem:[%s5037_s27 + $0x540] sm:$0xff]  ;;  %v518_v24 = vld [vmem:[%s5037_s27 + $0x550] sm:$0xff]  ;;  %v533_v26 = vld [vmem:[%s5037_s27 + $0x5c8] sm:$0xff] }
  0xc7   : > { %3566 = vmatpush1.bf16.msra.mxu1 %v3565_v46  ;;  %3312 = vmatprep.subr.bf16.mxu0 %v3311_v47  ;;  %v527_v27 = vld [vmem:[%s5037_s27 + $0x598] sm:$0xff]  ;;  %v3325_v29 = vpack.c.bf16 %v516_v21, %v508_v20  ;;  %v524_v30 = vld [vmem:[%s5037_s27 + $0x580] sm:$0xff]  ;;  %v3581_v31 = vpack.c.bf16 %v518_v24, %v510_v22  ;;  %v3327_v32 = vpack.c.bf16 %v533_v26, %v525_v25  ;;  %v526_v34 = vld [vmem:[%s5037_s27 + $0x590] sm:$0xff] }
  0xc8   : > { %3568 = vmatprep.subr.bf16.mxu1 %v3567_v51  ;;  %v535_v28 = vld [vmem:[%s5037_s27 + $0x5d8] sm:$0xff]  ;;  %v532_v33 = vld [vmem:[%s5037_s27 + $0x5c0] sm:$0xff]  ;;  %v534_v35 = vld [vmem:[%s5037_s27 + $0x5d0] sm:$0xff] }
  0xc9   : > { %v3583_v36 = vpack.c.bf16 %v535_v28, %v527_v27  ;;  %v541_v37 = vld [vmem:[%s5037_s27 + $0x608] sm:$0xff]  ;;  %v5155_v39 = vld [vmem:[%s5152_s24] sm:$0xff]  ;;  %v543_v40 = vld [vmem:[%s5037_s27 + $0x618] sm:$0xff]  ;;  %v3329_v43 = vpack.c.bf16 %v532_v33, %v524_v30  ;;  %v3585_v44 = vpack.c.bf16 %v534_v35, %v526_v34 }
  0xca   : > { %3314 = vmatpush1.bf16.msra.mxu0 %v3313_v57  ;;  %v549_v38 = vld [vmem:[%s5037_s27 + $0x648] sm:$0xff]  ;;  %v551_v41 = vld [vmem:[%s5037_s27 + $0x658] sm:$0xff]  ;;  %v5161_v42 = vcombine.high %v5155_v39, %v5155_v39  ;;  %v540_v46 = vld [vmem:[%s5037_s27 + $0x600] sm:$0xff] }
  0xcb   : > { %3570 = vmatpush1.bf16.msra.mxu1 %v3569_v58  ;;  %3316 = vmatprep.subr.bf16.mxu0 %v3315_v59  ;;  %v3331_v45 = vpack.c.bf16 %v549_v38, %v541_v37  ;;  %v548_v47 = vld [vmem:[%s5037_s27 + $0x640] sm:$0xff]  ;;  %v542_v48 = vld [vmem:[%s5037_s27 + $0x610] sm:$0xff]  ;;  %v3587_v49 = vpack.c.bf16 %v551_v41, %v543_v40  ;;  %v557_v51 = vld [vmem:[%s5037_s27 + $0x688] sm:$0xff] }
  0xcc   : > { %3572 = vmatprep.subr.bf16.mxu1 %v3571_v63  ;;  %v550_v50 = vld [vmem:[%s5037_s27 + $0x650] sm:$0xff]  ;;  %v565_v52 = vld [vmem:[%s5037_s27 + $0x6c8] sm:$0xff]  ;;  %1448 = vmatprep.mubr.f32.mxu0 %v5161_v42  ;;  %v559_v53 = vld [vmem:[%s5037_s27 + $0x698] sm:$0xff]  ;;  %v3333_v55 = vpack.c.bf16 %v548_v47, %v540_v46 }
  0xcd   : > { %v567_v54 = vld [vmem:[%s5037_s27 + $0x6d8] sm:$0xff]  ;;  %1732 = vmatprep.mubr.f32.mxu1 %v5161_v42  ;;  %v3589_v56 = vpack.c.bf16 %v550_v50, %v542_v48  ;;  %v3335_v57 = vpack.c.bf16 %v565_v52, %v557_v51  ;;  %v556_v58 = vld [vmem:[%s5037_s27 + $0x680] sm:$0xff]  ;;  %v558_v60 = vld [vmem:[%s5037_s27 + $0x690] sm:$0xff] }
  0xce   : > { %3318 = vmatpush1.bf16.msra.mxu0 %v3317_v5  ;;  %v564_v59 = vld [vmem:[%s5037_s27 + $0x6c0] sm:$0xff]  ;;  %v3591_v61 = vpack.c.bf16 %v567_v54, %v559_v53  ;;  %v566_v62 = vld [vmem:[%s5037_s27 + $0x6d0] sm:$0xff]  ;;  %v573_v63 = vld [vmem:[%s5037_s27 + $0x708] sm:$0xff] }
  0xcf   : > { %3574 = vmatpush1.bf16.msra.mxu1 %v3573_v6  ;;  %3320 = vmatprep.subr.bf16.mxu0 %v3319_v7  ;;  %v581_v0 = vld [vmem:[%s5037_s27 + $0x748] sm:$0xff]  ;;  %v575_v1 = vld [vmem:[%s5037_s27 + $0x718] sm:$0xff]  ;;  %v3337_v3 = vpack.c.bf16 %v564_v59, %v556_v58  ;;  %v3593_v4 = vpack.c.bf16 %v566_v62, %v558_v60  ;;  %v572_v6 = vld [vmem:[%s5037_s27 + $0x700] sm:$0xff] }
  0xd0   : > { %3576 = vmatprep.subr.bf16.mxu1 %v3575_v11  ;;  %v583_v2 = vld [vmem:[%s5037_s27 + $0x758] sm:$0xff]  ;;  %v3339_v5 = vpack.c.bf16 %v581_v0, %v573_v63  ;;  %v580_v7 = vld [vmem:[%s5037_s27 + $0x740] sm:$0xff]  ;;  %v574_v8 = vld [vmem:[%s5037_s27 + $0x710] sm:$0xff] }
  0xd1   : > { %v3595_v9 = vpack.c.bf16 %v583_v2, %v575_v1  ;;  %v582_v10 = vld [vmem:[%s5037_s27 + $0x750] sm:$0xff]  ;;  %v589_v11 = vld [vmem:[%s5037_s27 + $0x788] sm:$0xff]  ;;  %v591_v13 = vld [vmem:[%s5037_s27 + $0x798] sm:$0xff]  ;;  %v3341_v15 = vpack.c.bf16 %v580_v7, %v572_v6 }
  0xd2   : > { %3322 = vmatpush1.bf16.msra.mxu0 %v3321_v17  ;;  %v597_v12 = vld [vmem:[%s5037_s27 + $0x7c8] sm:$0xff]  ;;  %v599_v14 = vld [vmem:[%s5037_s27 + $0x7d8] sm:$0xff]  ;;  %v3597_v16 = vpack.c.bf16 %v582_v10, %v574_v8  ;;  %v590_v20 = vld [vmem:[%s5037_s27 + $0x790] sm:$0xff] }
  0xd3   : > { %3578 = vmatpush1.bf16.msra.mxu1 %v3577_v18  ;;  %3324 = vmatprep.subr.bf16.mxu0 %v3323_v19  ;;  %v3343_v17 = vpack.c.bf16 %v597_v12, %v589_v11  ;;  %v588_v18 = vld [vmem:[%s5037_s27 + $0x780] sm:$0xff]  ;;  %v3599_v21 = vpack.c.bf16 %v599_v14, %v591_v13  ;;  %v598_v22 = vld [vmem:[%s5037_s27 + $0x7d0] sm:$0xff]  ;;  %v613_v24 = vld [vmem:[%s5037_s27 + $0x848] sm:$0xff] }
  0xd4   : > { %3580 = vmatprep.subr.bf16.mxu1 %v3579_v23  ;;  %v596_v19 = vld [vmem:[%s5037_s27 + $0x7c0] sm:$0xff]  ;;  %v605_v23 = vld [vmem:[%s5037_s27 + $0x808] sm:$0xff]  ;;  %v607_v25 = vld [vmem:[%s5037_s27 + $0x818] sm:$0xff]  ;;  %v3601_v28 = vpack.c.bf16 %v598_v22, %v590_v20 }
  0xd5   : > { %v615_v26 = vld [vmem:[%s5037_s27 + $0x858] sm:$0xff]  ;;  %v3345_v27 = vpack.c.bf16 %v596_v19, %v588_v18  ;;  %v604_v30 = vld [vmem:[%s5037_s27 + $0x800] sm:$0xff]  ;;  %v614_v34 = vld [vmem:[%s5037_s27 + $0x850] sm:$0xff] }
  0xd6   : > { %3326 = vmatpush1.bf16.msra.mxu0 %v3325_v29  ;;  %v3347_v29 = vpack.c.bf16 %v613_v24, %v605_v23  ;;  %v3603_v33 = vpack.c.bf16 %v615_v26, %v607_v25  ;;  %v621_v35 = vld [vmem:[%s5037_s27 + $0x888] sm:$0xff]  ;;  %v623_v37 = vld [vmem:[%s5037_s27 + $0x898] sm:$0xff]  ;;  %v622_v46 = vld [vmem:[%s5037_s27 + $0x890] sm:$0xff] }
  0xd7   : > { %3582 = vmatpush1.bf16.msra.mxu1 %v3581_v31  ;;  %3328 = vmatprep.subr.bf16.mxu0 %v3327_v32  ;;  %v612_v31 = vld [vmem:[%s5037_s27 + $0x840] sm:$0xff]  ;;  %v606_v32 = vld [vmem:[%s5037_s27 + $0x810] sm:$0xff]  ;;  %v631_v38 = vld [vmem:[%s5037_s27 + $0x8d8] sm:$0xff] }
  0xd8   : > { %3584 = vmatprep.subr.bf16.mxu1 %v3583_v36  ;;  %v629_v36 = vld [vmem:[%s5037_s27 + $0x8c8] sm:$0xff]  ;;  %v3349_v40 = vpack.c.bf16 %v612_v31, %v604_v30  ;;  %v3605_v41 = vpack.c.bf16 %v614_v34, %v606_v32  ;;  %v3607_v47 = vpack.c.bf16 %v631_v38, %v623_v37  ;;  %v630_v48 = vld [vmem:[%s5037_s27 + $0x8d0] sm:$0xff]  ;;  %v639_v51 = vld [vmem:[%s5037_s27 + $0x918] sm:$0xff] }
  0xd9   : > { %v645_v50 = vld [vmem:[%s5037_s27 + $0x948] sm:$0xff]  ;;  %v647_v52 = vld [vmem:[%s5037_s27 + $0x958] sm:$0xff]  ;;  %v3609_v54 = vpack.c.bf16 %v630_v48, %v622_v46  ;;  %v638_v58 = vld [vmem:[%s5037_s27 + $0x910] sm:$0xff] }
  0xda   : > { %3330 = vmatpush1.bf16.msra.mxu0 %v3329_v43  ;;  %v3351_v43 = vpack.c.bf16 %v629_v36, %v621_v35  ;;  %v3611_v59 = vpack.c.bf16 %v647_v52, %v639_v51  ;;  %v646_v60 = vld [vmem:[%s5037_s27 + $0x950] sm:$0xff]  ;;  %v661_v62 = vld [vmem:[%s5037_s27 + $0x9c8] sm:$0xff]  ;;  %v663_v63 = vld [vmem:[%s5037_s27 + $0x9d8] sm:$0xff] }
  0xdb   : > { %3586 = vmatpush1.bf16.msra.mxu1 %v3585_v44  ;;  %3332 = vmatprep.subr.bf16.mxu0 %v3331_v45  ;;  %v620_v44 = vld [vmem:[%s5037_s27 + $0x880] sm:$0xff]  ;;  %v3613_v1 = vpack.c.bf16 %v646_v60, %v638_v58  ;;  %v662_v7 = vld [vmem:[%s5037_s27 + $0x9d0] sm:$0xff]  ;;  %v669_v8 = vld [vmem:[%s5037_s27 + $0xa08] sm:$0xff] }
  0xdc   : > { %3588 = vmatprep.subr.bf16.mxu1 %v3587_v49  ;;  %v628_v45 = vld [vmem:[%s5037_s27 + $0x8c0] sm:$0xff]  ;;  %v637_v49 = vld [vmem:[%s5037_s27 + $0x908] sm:$0xff]  ;;  %v671_v10 = vld [vmem:[%s5037_s27 + $0xa18] sm:$0xff] }
  0xdd   : > { %v3353_v53 = vpack.c.bf16 %v628_v45, %v620_v44  ;;  %v679_v11 = vld [vmem:[%s5037_s27 + $0xa58] sm:$0xff]  ;;  %v678_v19 = vld [vmem:[%s5037_s27 + $0xa50] sm:$0xff]  ;;  %v685_v20 = vld [vmem:[%s5037_s27 + $0xa88] sm:$0xff] }
  0xde   : > { %3334 = vmatpush1.bf16.msra.mxu0 %v3333_v55  ;;  %v3355_v55 = vpack.c.bf16 %v645_v50, %v637_v49  ;;  %v3619_v18 = vpack.c.bf16 %v679_v11, %v671_v10  ;;  %v687_v22 = vld [vmem:[%s5037_s27 + $0xa98] sm:$0xff]  ;;  %v694_v31 = vld [vmem:[%s5037_s27 + $0xad0] sm:$0xff]  ;;  %v701_v32 = vld [vmem:[%s5037_s27 + $0xb08] sm:$0xff] }
  0xdf   : > { %3590 = vmatpush1.bf16.msra.mxu1 %v3589_v56  ;;  %3336 = vmatprep.subr.bf16.mxu0 %v3335_v57  ;;  %v636_v56 = vld [vmem:[%s5037_s27 + $0x900] sm:$0xff]  ;;  %v695_v23 = vld [vmem:[%s5037_s27 + $0xad8] sm:$0xff]  ;;  %v5251_v44 = vld [vmem:[%s5152_s24 + $0x8] sm:$0xff] }
  0xe0   : > { %3592 = vmatprep.subr.bf16.mxu1 %v3591_v61  ;;  %v644_v57 = vld [vmem:[%s5037_s27 + $0x940] sm:$0xff]  ;;  %v653_v61 = vld [vmem:[%s5037_s27 + $0x988] sm:$0xff]  ;;  %v3623_v30 = vpack.c.bf16 %v695_v23, %v687_v22  ;;  %v703_v34 = vld [vmem:[%s5037_s27 + $0xb18] sm:$0xff]  ;;  %v5258_v49 = vcombine.high %v5251_v44, %v5251_v44 }
  0xe1   : > { %v3357_v0 = vpack.c.bf16 %v644_v57, %v636_v56  ;;  %v3359_v2 = vpack.c.bf16 %v661_v62, %v653_v61  ;;  %v711_v35 = vld [vmem:[%s5037_s27 + $0xb58] sm:$0xff]  ;;  %v700_v37 = vld [vmem:[%s5037_s27 + $0xb00] sm:$0xff]  ;;  %v710_v46 = vld [vmem:[%s5037_s27 + $0xb50] sm:$0xff] }
  0xe2   : > { %3338 = vmatpush1.bf16.msra.mxu0 %v3337_v3  ;;  %v652_v3 = vld [vmem:[%s5037_s27 + $0x980] sm:$0xff]  ;;  %v3627_v45 = vpack.c.bf16 %v711_v35, %v703_v34  ;;  %v725_v48 = vld [vmem:[%s5037_s27 + $0xbc8] sm:$0xff]  ;;  %v719_v50 = vld [vmem:[%s5037_s27 + $0xb98] sm:$0xff] }
  0xe3   : > { %3594 = vmatpush1.bf16.msra.mxu1 %v3593_v4  ;;  %3340 = vmatprep.subr.bf16.mxu0 %v3339_v5  ;;  %v660_v4 = vld [vmem:[%s5037_s27 + $0x9c0] sm:$0xff]  ;;  %v654_v5 = vld [vmem:[%s5037_s27 + $0x990] sm:$0xff]  ;;  %v727_v51 = vld [vmem:[%s5037_s27 + $0xbd8] sm:$0xff] }
  0xe4   : > { %3596 = vmatprep.subr.bf16.mxu1 %v3595_v9  ;;  %v677_v9 = vld [vmem:[%s5037_s27 + $0xa48] sm:$0xff]  ;;  %v3361_v12 = vpack.c.bf16 %v660_v4, %v652_v3  ;;  %v3617_v13 = vpack.c.bf16 %v662_v7, %v654_v5  ;;  %v724_v56 = vld [vmem:[%s5037_s27 + $0xbc0] sm:$0xff]  ;;  %v718_v57 = vld [vmem:[%s5037_s27 + $0xb90] sm:$0xff]  ;;  %v3631_v58 = vpack.c.bf16 %v727_v51, %v719_v50 }
  0xe5   : > { %v3363_v14 = vpack.c.bf16 %v677_v9, %v669_v8  ;;  %v733_v60 = vld [vmem:[%s5037_s27 + $0xc08] sm:$0xff]  ;;  %v735_v62 = vld [vmem:[%s5037_s27 + $0xc18] sm:$0xff]  ;;  %v740_v3 = vld [vmem:[%s5037_s27 + $0xc40] sm:$0xff] }
  0xe6   : > { %3342 = vmatpush1.bf16.msra.mxu0 %v3341_v15  ;;  %v668_v15 = vld [vmem:[%s5037_s27 + $0xa00] sm:$0xff]  ;;  %v741_v61 = vld [vmem:[%s5037_s27 + $0xc48] sm:$0xff]  ;;  %v734_v4 = vld [vmem:[%s5037_s27 + $0xc10] sm:$0xff] }
  0xe7   : > { %3598 = vmatpush1.bf16.msra.mxu1 %v3597_v16  ;;  %3344 = vmatprep.subr.bf16.mxu0 %v3343_v17  ;;  %v676_v16 = vld [vmem:[%s5037_s27 + $0xa40] sm:$0xff]  ;;  %v670_v17 = vld [vmem:[%s5037_s27 + $0xa10] sm:$0xff]  ;;  %v749_v7 = vld [vmem:[%s5037_s27 + $0xc88] sm:$0xff] }
  0xe8   : > { %3600 = vmatprep.subr.bf16.mxu1 %v3599_v21  ;;  %v693_v21 = vld [vmem:[%s5037_s27 + $0xac8] sm:$0xff]  ;;  %v3365_v24 = vpack.c.bf16 %v676_v16, %v668_v15  ;;  %v3621_v25 = vpack.c.bf16 %v678_v19, %v670_v17  ;;  %v751_v9 = vld [vmem:[%s5037_s27 + $0xc98] sm:$0xff]  ;;  %v756_v15 = vld [vmem:[%s5037_s27 + $0xcc0] sm:$0xff] }
  0xe9   : > { %v3367_v26 = vpack.c.bf16 %v693_v21, %v685_v20  ;;  %v757_v8 = vld [vmem:[%s5037_s27 + $0xcc8] sm:$0xff]  ;;  %v759_v10 = vld [vmem:[%s5037_s27 + $0xcd8] sm:$0xff]  ;;  %v750_v16 = vld [vmem:[%s5037_s27 + $0xc90] sm:$0xff] }
  0xea   : > { %3346 = vmatpush1.bf16.msra.mxu0 %v3345_v27  ;;  %v684_v27 = vld [vmem:[%s5037_s27 + $0xa80] sm:$0xff]  ;;  %v3639_v17 = vpack.c.bf16 %v759_v10, %v751_v9  ;;  %v765_v19 = vld [vmem:[%s5037_s27 + $0xd08] sm:$0xff]  ;;  %v767_v21 = vld [vmem:[%s5037_s27 + $0xd18] sm:$0xff] }
  0xeb   : > { %3602 = vmatpush1.bf16.msra.mxu1 %v3601_v28  ;;  %3348 = vmatprep.subr.bf16.mxu0 %v3347_v29  ;;  %v692_v28 = vld [vmem:[%s5037_s27 + $0xac0] sm:$0xff]  ;;  %v686_v29 = vld [vmem:[%s5037_s27 + $0xa90] sm:$0xff]  ;;  %v773_v20 = vld [vmem:[%s5037_s27 + $0xd48] sm:$0xff] }
  0xec   : > { %3604 = vmatprep.subr.bf16.mxu1 %v3603_v33  ;;  %v709_v33 = vld [vmem:[%s5037_s27 + $0xb48] sm:$0xff]  ;;  %v3369_v36 = vpack.c.bf16 %v692_v28, %v684_v27  ;;  %v3625_v38 = vpack.c.bf16 %v694_v31, %v686_v29  ;;  %v775_v22 = vld [vmem:[%s5037_s27 + $0xd58] sm:$0xff]  ;;  %v772_v27 = vld [vmem:[%s5037_s27 + $0xd40] sm:$0xff] }
  0xed   : > { %1449 = vmatmul.mubr.f32.vlgmr.msra.gmra.mrb[0].mxu0 %v5155_v39  ;;  %v766_v28 = vld [vmem:[%s5037_s27 + $0xd10] sm:$0xff]  ;;  %v3643_v29 = vpack.c.bf16 %v775_v22, %v767_v21  ;;  %v781_v31 = vld [vmem:[%s5037_s27 + $0xd88] sm:$0xff]  ;;  %v791_v34 = vld [vmem:[%s5037_s27 + $0xdd8] sm:$0xff] }
  0xee   : > { %3350 = vmatpush1.bf16.msra.mxu0 %v3349_v40  ;;  %1733 = vmatmul.mubr.f32.vlgmr.msra.gmra.mrb[0].mxu1 %v5155_v39  ;;  %v655_v39 = vld [vmem:[%s5037_s27 + $0x998] sm:$0xff]  ;;  %v3371_v40 = vpack.c.bf16 %v709_v33, %v701_v32  ;;  %v789_v32 = vld [vmem:[%s5037_s27 + $0xdc8] sm:$0xff] }
  0xef   : > { %3606 = vmatpush1.bf16.msra.mxu1 %v3605_v41  ;;  %3352 = vmatprep.subr.bf16.mxu0 %v3351_v43  ;;  %v3615_v6 = vpack.c.bf16 %v663_v63, %v655_v39  ;;  %v708_v41 = vld [vmem:[%s5037_s27 + $0xb40] sm:$0xff]  ;;  %v702_v43 = vld [vmem:[%s5037_s27 + $0xb10] sm:$0xff]  ;;  %v743_v39 = vld [vmem:[%s5037_s27 + $0xc58] sm:$0xff] }
  0xf0   : > { %3608 = vmatprep.subr.bf16.mxu1 %v3607_v47  ;;  %v717_v47 = vld [vmem:[%s5037_s27 + $0xb88] sm:$0xff]  ;;  %v3373_v52 = vpack.c.bf16 %v708_v41, %v700_v37  ;;  %1519 = vmatprep.mubr.f32.mxu0 %v5258_v49  ;;  %v3635_v5 = vpack.c.bf16 %v743_v39, %v735_v62  ;;  %v783_v33 = vld [vmem:[%s5037_s27 + $0xd98] sm:$0xff]  ;;  %v3391_v37 = vpack.c.bf16 %v789_v32, %v781_v31  ;;  %v782_v41 = vld [vmem:[%s5037_s27 + $0xd90] sm:$0xff] }
  0xf1   : > { %1803 = vmatprep.mubr.f32.mxu1 %v5258_v49  ;;  %v807_v50 = vld [vmem:[%s5037_s27 + $0xe58] sm:$0xff]  ;;  %v869_v31 = vld [vmem:[%s5037_s27 + $0x1048] sm:$0xff] }
  0xf2   : > { %3354 = vmatpush1.bf16.msra.mxu0 %v3353_v53  ;;  %v3629_v53 = vpack.c.bf16 %v710_v46, %v702_v43  ;;  %v3647_v43 = vpack.c.bf16 %v791_v34, %v783_v33  ;;  %v797_v46 = vld [vmem:[%s5037_s27 + $0xe08] sm:$0xff]  ;;  %v823_v62 = vld [vmem:[%s5037_s27 + $0xed8] sm:$0xff] }
  0xf3   : > { %3610 = vmatpush1.bf16.msra.mxu1 %v3609_v54  ;;  %3356 = vmatprep.subr.bf16.mxu0 %v3355_v55  ;;  %v3375_v54 = vpack.c.bf16 %v725_v48, %v717_v47  ;;  %v716_v55 = vld [vmem:[%s5037_s27 + $0xb80] sm:$0xff]  ;;  %v805_v47 = vld [vmem:[%s5037_s27 + $0xe48] sm:$0xff]  ;;  %v799_v48 = vld [vmem:[%s5037_s27 + $0xe18] sm:$0xff] }
  0xf4   : > { %3612 = vmatprep.subr.bf16.mxu1 %v3611_v59  ;;  %v726_v59 = vld [vmem:[%s5037_s27 + $0xbd0] sm:$0xff]  ;;  %v3377_v63 = vpack.c.bf16 %v724_v56, %v716_v55  ;;  %v804_v55 = vld [vmem:[%s5037_s27 + $0xe40] sm:$0xff]  ;;  %v839_v9 = vld [vmem:[%s5037_s27 + $0xf58] sm:$0xff] }
  0xf5   : > { %v798_v56 = vld [vmem:[%s5037_s27 + $0xe10] sm:$0xff]  ;;  %v855_v21 = vld [vmem:[%s5037_s27 + $0xfd8] sm:$0xff] }
  0xf6   : > { %3358 = vmatpush1.bf16.msra.mxu0 %v3357_v0  ;;  %v3633_v0 = vpack.c.bf16 %v726_v59, %v718_v57  ;;  %v3651_v57 = vpack.c.bf16 %v807_v50, %v799_v48  ;;  %v813_v59 = vld [vmem:[%s5037_s27 + $0xe88] sm:$0xff]  ;;  %v863_v32 = vld [vmem:[%s5037_s27 + $0x1018] sm:$0xff] }
  0xf7   : > { %3614 = vmatpush1.bf16.msra.mxu1 %v3613_v1  ;;  %3360 = vmatprep.subr.bf16.mxu0 %v3359_v2  ;;  %v3379_v1 = vpack.c.bf16 %v741_v61, %v733_v60  ;;  %v732_v2 = vld [vmem:[%s5037_s27 + $0xc00] sm:$0xff]  ;;  %v821_v60 = vld [vmem:[%s5037_s27 + $0xec8] sm:$0xff]  ;;  %v815_v61 = vld [vmem:[%s5037_s27 + $0xe98] sm:$0xff] }
  0xf8   : > { %3616 = vmatprep.subr.bf16.mxu1 %v3615_v6  ;;  %v742_v6 = vld [vmem:[%s5037_s27 + $0xc50] sm:$0xff]  ;;  %v3381_v11 = vpack.c.bf16 %v740_v3, %v732_v2  ;;  %v820_v2 = vld [vmem:[%s5037_s27 + $0xec0] sm:$0xff]  ;;  %v871_v33 = vld [vmem:[%s5037_s27 + $0x1058] sm:$0xff] }
  0xf9   : > { %v814_v3 = vld [vmem:[%s5037_s27 + $0xe90] sm:$0xff]  ;;  %v887_v48 = vld [vmem:[%s5037_s27 + $0x10d8] sm:$0xff] }
  0xfa   : > { %3362 = vmatpush1.bf16.msra.mxu0 %v3361_v12  ;;  %v3637_v12 = vpack.c.bf16 %v742_v6, %v734_v4  ;;  %v3655_v4 = vpack.c.bf16 %v823_v62, %v815_v61  ;;  %v829_v6 = vld [vmem:[%s5037_s27 + $0xf08] sm:$0xff]  ;;  %v895_v62 = vld [vmem:[%s5037_s27 + $0x1118] sm:$0xff] }
  0xfb   : > { %3618 = vmatpush1.bf16.msra.mxu1 %v3617_v13  ;;  %3364 = vmatprep.subr.bf16.mxu0 %v3363_v14  ;;  %v3383_v13 = vpack.c.bf16 %v757_v8, %v749_v7  ;;  %v748_v14 = vld [vmem:[%s5037_s27 + $0xc80] sm:$0xff]  ;;  %v837_v7 = vld [vmem:[%s5037_s27 + $0xf48] sm:$0xff]  ;;  %v831_v8 = vld [vmem:[%s5037_s27 + $0xf18] sm:$0xff] }
  0xfc   : > { %3620 = vmatprep.subr.bf16.mxu1 %v3619_v18  ;;  %v758_v18 = vld [vmem:[%s5037_s27 + $0xcd0] sm:$0xff]  ;;  %v3385_v23 = vpack.c.bf16 %v756_v15, %v748_v14  ;;  %v836_v14 = vld [vmem:[%s5037_s27 + $0xf40] sm:$0xff] }
  0xfd   : > { %v830_v15 = vld [vmem:[%s5037_s27 + $0xf10] sm:$0xff] }
  0xfe   : > { %3366 = vmatpush1.bf16.msra.mxu0 %v3365_v24  ;;  %v3641_v24 = vpack.c.bf16 %v758_v18, %v750_v16  ;;  %v3659_v16 = vpack.c.bf16 %v839_v9, %v831_v8  ;;  %v845_v18 = vld [vmem:[%s5037_s27 + $0xf88] sm:$0xff]  ;;  %v919_v9 = vld [vmem:[%s5037_s27 + $0x11d8] sm:$0xff] }
  0xff   : > { %3622 = vmatpush1.bf16.msra.mxu1 %v3621_v25  ;;  %3368 = vmatprep.subr.bf16.mxu0 %v3367_v26  ;;  %v3387_v25 = vpack.c.bf16 %v773_v20, %v765_v19  ;;  %v764_v26 = vld [vmem:[%s5037_s27 + $0xd00] sm:$0xff]  ;;  %v853_v19 = vld [vmem:[%s5037_s27 + $0xfc8] sm:$0xff]  ;;  %v847_v20 = vld [vmem:[%s5037_s27 + $0xf98] sm:$0xff] }
 0x100   : > { %3624 = vmatprep.subr.bf16.mxu1 %v3623_v30  ;;  %v774_v30 = vld [vmem:[%s5037_s27 + $0xd50] sm:$0xff]  ;;  %v3389_v35 = vpack.c.bf16 %v772_v27, %v764_v26  ;;  %v852_v26 = vld [vmem:[%s5037_s27 + $0xfc0] sm:$0xff]  ;;  %v917_v8 = vld [vmem:[%s5037_s27 + $0x11c8] sm:$0xff] }
 0x101   : > { %v846_v27 = vld [vmem:[%s5037_s27 + $0xf90] sm:$0xff] }
 0x102   : > { %3370 = vmatpush1.bf16.msra.mxu0 %v3369_v36  ;;  %v3645_v36 = vpack.c.bf16 %v774_v30, %v766_v28  ;;  %v3663_v28 = vpack.c.bf16 %v855_v21, %v847_v20  ;;  %v861_v30 = vld [vmem:[%s5037_s27 + $0x1008] sm:$0xff]  ;;  %v927_v20 = vld [vmem:[%s5037_s27 + $0x1218] sm:$0xff] }
 0x103   : > { %3626 = vmatpush1.bf16.msra.mxu1 %v3625_v38  ;;  %3372 = vmatprep.subr.bf16.mxu0 %v3371_v40  ;;  %v780_v38 = vld [vmem:[%s5037_s27 + $0xd80] sm:$0xff]  ;;  %v935_v21 = vld [vmem:[%s5037_s27 + $0x1258] sm:$0xff] }
 0x104   : > { %3628 = vmatprep.subr.bf16.mxu1 %v3627_v45  ;;  %v788_v40 = vld [vmem:[%s5037_s27 + $0xdc0] sm:$0xff]  ;;  %v790_v45 = vld [vmem:[%s5037_s27 + $0xdd0] sm:$0xff] }
 0x105   : > { %v3393_v51 = vpack.c.bf16 %v788_v40, %v780_v38  ;;  %v868_v38 = vld [vmem:[%s5037_s27 + $0x1040] sm:$0xff]  ;;  %v862_v40 = vld [vmem:[%s5037_s27 + $0x1010] sm:$0xff] }
 0x106   : > { %3374 = vmatpush1.bf16.msra.mxu0 %v3373_v52  ;;  %v3649_v52 = vpack.c.bf16 %v790_v45, %v782_v41  ;;  %v3667_v41 = vpack.c.bf16 %v871_v33, %v863_v32  ;;  %v877_v45 = vld [vmem:[%s5037_s27 + $0x1088] sm:$0xff]  ;;  %v943_v32 = vld [vmem:[%s5037_s27 + $0x1298] sm:$0xff] }
 0x107   : > { %3630 = vmatpush1.bf16.msra.mxu1 %v3629_v53  ;;  %3376 = vmatprep.subr.bf16.mxu0 %v3375_v54  ;;  %v3395_v53 = vpack.c.bf16 %v805_v47, %v797_v46  ;;  %v796_v54 = vld [vmem:[%s5037_s27 + $0xe00] sm:$0xff]  ;;  %v885_v46 = vld [vmem:[%s5037_s27 + $0x10c8] sm:$0xff]  ;;  %v879_v47 = vld [vmem:[%s5037_s27 + $0x1098] sm:$0xff] }
 0x108   : > { %3632 = vmatprep.subr.bf16.mxu1 %v3631_v58  ;;  %v806_v58 = vld [vmem:[%s5037_s27 + $0xe50] sm:$0xff]  ;;  %v3397_v39 = vpack.c.bf16 %v804_v55, %v796_v54  ;;  %v876_v54 = vld [vmem:[%s5037_s27 + $0x1080] sm:$0xff]  ;;  %v951_v33 = vld [vmem:[%s5037_s27 + $0x12d8] sm:$0xff] }
 0x109   : > { %v884_v55 = vld [vmem:[%s5037_s27 + $0x10c0] sm:$0xff] }
 0x10a   : > { %3378 = vmatpush1.bf16.msra.mxu0 %v3377_v63  ;;  %v3653_v63 = vpack.c.bf16 %v806_v58, %v798_v56  ;;  %v878_v56 = vld [vmem:[%s5037_s27 + $0x1090] sm:$0xff] }
 0x10b   : > { %3634 = vmatpush1.bf16.msra.mxu1 %v3633_v0  ;;  %3380 = vmatprep.subr.bf16.mxu0 %v3379_v1  ;;  %v3399_v0 = vpack.c.bf16 %v821_v60, %v813_v59  ;;  %v812_v1 = vld [vmem:[%s5037_s27 + $0xe80] sm:$0xff]  ;;  %v886_v58 = vld [vmem:[%s5037_s27 + $0x10d0] sm:$0xff]  ;;  %v893_v59 = vld [vmem:[%s5037_s27 + $0x1108] sm:$0xff] }
 0x10c   : > { %3636 = vmatprep.subr.bf16.mxu1 %v3635_v5  ;;  %v822_v5 = vld [vmem:[%s5037_s27 + $0xed0] sm:$0xff]  ;;  %v3401_v10 = vpack.c.bf16 %v820_v2, %v812_v1  ;;  %v901_v60 = vld [vmem:[%s5037_s27 + $0x1148] sm:$0xff]  ;;  %v892_v2 = vld [vmem:[%s5037_s27 + $0x1100] sm:$0xff] }
 0x10d   : > { %v3419_v1 = vpack.c.bf16 %v901_v60, %v893_v59  ;;  %v973_v59 = vld [vmem:[%s5037_s27 + $0x1388] sm:$0xff] }
 0x10e   : > { %3382 = vmatpush1.bf16.msra.mxu0 %v3381_v11  ;;  %v3657_v11 = vpack.c.bf16 %v822_v5, %v814_v3  ;;  %v900_v3 = vld [vmem:[%s5037_s27 + $0x1140] sm:$0xff]  ;;  %v981_v60 = vld [vmem:[%s5037_s27 + $0x13c8] sm:$0xff] }
 0x10f   : > { %3638 = vmatpush1.bf16.msra.mxu1 %v3637_v12  ;;  %3384 = vmatprep.subr.bf16.mxu0 %v3383_v13  ;;  %v3403_v12 = vpack.c.bf16 %v837_v7, %v829_v6  ;;  %v828_v13 = vld [vmem:[%s5037_s27 + $0xf00] sm:$0xff]  ;;  %v902_v6 = vld [vmem:[%s5037_s27 + $0x1150] sm:$0xff]  ;;  %v909_v7 = vld [vmem:[%s5037_s27 + $0x1188] sm:$0xff] }
 0x110   : > { %3640 = vmatprep.subr.bf16.mxu1 %v3639_v17  ;;  %v838_v17 = vld [vmem:[%s5037_s27 + $0xf50] sm:$0xff]  ;;  %v3405_v22 = vpack.c.bf16 %v836_v14, %v828_v13  ;;  %v908_v13 = vld [vmem:[%s5037_s27 + $0x1180] sm:$0xff] }
 0x111   : > { %v916_v14 = vld [vmem:[%s5037_s27 + $0x11c0] sm:$0xff] }
 0x112   : > { %3386 = vmatpush1.bf16.msra.mxu0 %v3385_v23  ;;  %v3661_v23 = vpack.c.bf16 %v838_v17, %v830_v15  ;;  %v910_v15 = vld [vmem:[%s5037_s27 + $0x1190] sm:$0xff] }
 0x113   : > { %3642 = vmatpush1.bf16.msra.mxu1 %v3641_v24  ;;  %3388 = vmatprep.subr.bf16.mxu0 %v3387_v25  ;;  %v3407_v24 = vpack.c.bf16 %v853_v19, %v845_v18  ;;  %v844_v25 = vld [vmem:[%s5037_s27 + $0xf80] sm:$0xff]  ;;  %v918_v17 = vld [vmem:[%s5037_s27 + $0x11d0] sm:$0xff]  ;;  %v925_v18 = vld [vmem:[%s5037_s27 + $0x1208] sm:$0xff] }
 0x114   : > { %3644 = vmatprep.subr.bf16.mxu1 %v3643_v29  ;;  %v854_v29 = vld [vmem:[%s5037_s27 + $0xfd0] sm:$0xff]  ;;  %v3409_v34 = vpack.c.bf16 %v852_v26, %v844_v25  ;;  %v933_v19 = vld [vmem:[%s5037_s27 + $0x1248] sm:$0xff]  ;;  %v924_v25 = vld [vmem:[%s5037_s27 + $0x1200] sm:$0xff] }
 0x115   : > { %v932_v26 = vld [vmem:[%s5037_s27 + $0x1240] sm:$0xff] }
 0x116   : > { %3390 = vmatpush1.bf16.msra.mxu0 %v3389_v35  ;;  %v3665_v35 = vpack.c.bf16 %v854_v29, %v846_v27  ;;  %v926_v27 = vld [vmem:[%s5037_s27 + $0x1210] sm:$0xff] }
 0x117   : > { %3646 = vmatpush1.bf16.msra.mxu1 %v3645_v36  ;;  %3392 = vmatprep.subr.bf16.mxu0 %v3391_v37  ;;  %v3411_v36 = vpack.c.bf16 %v869_v31, %v861_v30  ;;  %v860_v37 = vld [vmem:[%s5037_s27 + $0x1000] sm:$0xff]  ;;  %v934_v29 = vld [vmem:[%s5037_s27 + $0x1250] sm:$0xff]  ;;  %v941_v30 = vld [vmem:[%s5037_s27 + $0x1288] sm:$0xff] }
 0x118   : > { %3648 = vmatprep.subr.bf16.mxu1 %v3647_v43  ;;  %v870_v43 = vld [vmem:[%s5037_s27 + $0x1050] sm:$0xff]  ;;  %v3413_v50 = vpack.c.bf16 %v868_v38, %v860_v37  ;;  %v949_v31 = vld [vmem:[%s5037_s27 + $0x12c8] sm:$0xff]  ;;  %v940_v37 = vld [vmem:[%s5037_s27 + $0x1280] sm:$0xff] }
 0x119   : > { %v948_v38 = vld [vmem:[%s5037_s27 + $0x12c0] sm:$0xff] }
 0x11a   : > { %3394 = vmatpush1.bf16.msra.mxu0 %v3393_v51  ;;  %v5345_v51 = vld [vmem:[%s5152_s24 + $0x10] sm:$0xff] }
 0x11b   : > { %3650 = vmatpush1.bf16.msra.mxu1 %v3649_v52  ;;  %3396 = vmatprep.subr.bf16.mxu0 %v3395_v53  ;;  %v3669_v52 = vpack.c.bf16 %v870_v43, %v862_v40  ;;  %v3415_v53 = vpack.c.bf16 %v885_v46, %v877_v45  ;;  %v5355_v61 = vcombine.high %v5345_v51, %v5345_v51  ;;  %v942_v40 = vld [vmem:[%s5037_s27 + $0x1290] sm:$0xff]  ;;  %v957_v45 = vld [vmem:[%s5037_s27 + $0x1308] sm:$0xff] }
 0x11c   : > { %3652 = vmatprep.subr.bf16.mxu1 %v3651_v57  ;;  %v3671_v57 = vpack.c.bf16 %v887_v48, %v879_v47  ;;  %v950_v43 = vld [vmem:[%s5037_s27 + $0x12d0] sm:$0xff]  ;;  %v965_v46 = vld [vmem:[%s5037_s27 + $0x1348] sm:$0xff]  ;;  %v959_v47 = vld [vmem:[%s5037_s27 + $0x1318] sm:$0xff] }
 0x11d   : > { %v967_v48 = vld [vmem:[%s5037_s27 + $0x1358] sm:$0xff] }
 0x11e   : > { %3398 = vmatpush1.bf16.msra.mxu0 %v3397_v39  ;;  %v903_v39 = vld [vmem:[%s5037_s27 + $0x1158] sm:$0xff] }
 0x11f   : > { %3654 = vmatpush1.bf16.msra.mxu1 %v3653_v63  ;;  %3400 = vmatprep.subr.bf16.mxu0 %v3399_v0  ;;  %v3417_v63 = vpack.c.bf16 %v884_v55, %v876_v54  ;;  %v3673_v0 = vpack.c.bf16 %v886_v58, %v878_v56  ;;  %v3675_v5 = vpack.c.bf16 %v903_v39, %v895_v62  ;;  %v956_v54 = vld [vmem:[%s5037_s27 + $0x1300] sm:$0xff]  ;;  %v958_v56 = vld [vmem:[%s5037_s27 + $0x1310] sm:$0xff]  ;;  %v975_v62 = vld [vmem:[%s5037_s27 + $0x1398] sm:$0xff] }
 0x120   : > { %3656 = vmatprep.subr.bf16.mxu1 %v3655_v4  ;;  %v894_v4 = vld [vmem:[%s5037_s27 + $0x1110] sm:$0xff]  ;;  %v964_v55 = vld [vmem:[%s5037_s27 + $0x1340] sm:$0xff]  ;;  %v983_v39 = vld [vmem:[%s5037_s27 + $0x13d8] sm:$0xff] }
 0x121   : > { %v966_v58 = vld [vmem:[%s5037_s27 + $0x1350] sm:$0xff] }
 0x122   : > { %3402 = vmatpush1.bf16.msra.mxu0 %v3401_v10  ;;  %v3421_v10 = vpack.c.bf16 %v900_v3, %v892_v2  ;;  %v972_v2 = vld [vmem:[%s5037_s27 + $0x1380] sm:$0xff] }
 0x123   : > { %3658 = vmatpush1.bf16.msra.mxu1 %v3657_v11  ;;  %3404 = vmatprep.subr.bf16.mxu0 %v3403_v12  ;;  %v3677_v11 = vpack.c.bf16 %v902_v6, %v894_v4  ;;  %v3423_v12 = vpack.c.bf16 %v917_v8, %v909_v7  ;;  %v980_v3 = vld [vmem:[%s5037_s27 + $0x13c0] sm:$0xff]  ;;  %v974_v4 = vld [vmem:[%s5037_s27 + $0x1390] sm:$0xff]  ;;  %v989_v7 = vld [vmem:[%s5037_s27 + $0x1408] sm:$0xff] }
 0x124   : > { %3660 = vmatprep.subr.bf16.mxu1 %v3659_v16  ;;  %v982_v6 = vld [vmem:[%s5037_s27 + $0x13d0] sm:$0xff]  ;;  %v997_v8 = vld [vmem:[%s5037_s27 + $0x1448] sm:$0xff] }
 0x126   : > { %3406 = vmatpush1.bf16.msra.mxu0 %v3405_v22  ;;  %v3425_v22 = vpack.c.bf16 %v916_v14, %v908_v13  ;;  %v988_v13 = vld [vmem:[%s5037_s27 + $0x1400] sm:$0xff] }
 0x127   : > { %3662 = vmatpush1.bf16.msra.mxu1 %v3661_v23  ;;  %3408 = vmatprep.subr.bf16.mxu0 %v3407_v24  ;;  %v3681_v23 = vpack.c.bf16 %v918_v17, %v910_v15  ;;  %v3427_v24 = vpack.c.bf16 %v933_v19, %v925_v18  ;;  %v996_v14 = vld [vmem:[%s5037_s27 + $0x1440] sm:$0xff]  ;;  %v990_v15 = vld [vmem:[%s5037_s27 + $0x1410] sm:$0xff]  ;;  %v1005_v18 = vld [vmem:[%s5037_s27 + $0x1488] sm:$0xff] }
 0x128   : > { %3664 = vmatprep.subr.bf16.mxu1 %v3663_v28  ;;  %v3683_v28 = vpack.c.bf16 %v935_v21, %v927_v20  ;;  %v998_v17 = vld [vmem:[%s5037_s27 + $0x1450] sm:$0xff]  ;;  %v1013_v19 = vld [vmem:[%s5037_s27 + $0x14c8] sm:$0xff]  ;;  %v1007_v20 = vld [vmem:[%s5037_s27 + $0x1498] sm:$0xff] }
 0x129   : > { %v1015_v21 = vld [vmem:[%s5037_s27 + $0x14d8] sm:$0xff] }
 0x12a   : > { %3410 = vmatpush1.bf16.msra.mxu0 %v3409_v34  ;;  %v3429_v34 = vpack.c.bf16 %v932_v26, %v924_v25  ;;  %v1004_v25 = vld [vmem:[%s5037_s27 + $0x1480] sm:$0xff] }
 0x12b   : > { %3666 = vmatpush1.bf16.msra.mxu1 %v3665_v35  ;;  %3412 = vmatprep.subr.bf16.mxu0 %v3411_v36  ;;  %v3685_v35 = vpack.c.bf16 %v934_v29, %v926_v27  ;;  %v3431_v36 = vpack.c.bf16 %v949_v31, %v941_v30  ;;  %v1012_v26 = vld [vmem:[%s5037_s27 + $0x14c0] sm:$0xff]  ;;  %v1006_v27 = vld [vmem:[%s5037_s27 + $0x1490] sm:$0xff]  ;;  %v1021_v30 = vld [vmem:[%s5037_s27 + $0x1508] sm:$0xff] }
 0x12c   : > { %3668 = vmatprep.subr.bf16.mxu1 %v3667_v41  ;;  %v3687_v41 = vpack.c.bf16 %v951_v33, %v943_v32  ;;  %v1014_v29 = vld [vmem:[%s5037_s27 + $0x14d0] sm:$0xff]  ;;  %v1029_v31 = vld [vmem:[%s5037_s27 + $0x1548] sm:$0xff]  ;;  %v1023_v32 = vld [vmem:[%s5037_s27 + $0x1518] sm:$0xff] }
 0x12d   : > { %1520 = vmatmul.mubr.f32.vlgmr.msra.gmra.mrb[0].mxu0 %v5251_v44  ;;  %v1031_v33 = vld [vmem:[%s5037_s27 + $0x1558] sm:$0xff] }
 0x12e   : > { %3414 = vmatpush1.bf16.msra.mxu0 %v3413_v50  ;;  %1804 = vmatmul.mubr.f32.vlgmr.msra.gmra.mrb[0].mxu1 %v5251_v44  ;;  %v911_v44 = vld [vmem:[%s5037_s27 + $0x1198] sm:$0xff]  ;;  %v3433_v50 = vpack.c.bf16 %v948_v38, %v940_v37  ;;  %v1020_v37 = vld [vmem:[%s5037_s27 + $0x1500] sm:$0xff] }
 0x12f   : > { %3670 = vmatpush1.bf16.msra.mxu1 %v3669_v52  ;;  %3416 = vmatprep.subr.bf16.mxu0 %v3415_v53  ;;  %v3679_v16 = vpack.c.bf16 %v919_v9, %v911_v44  ;;  %v3689_v52 = vpack.c.bf16 %v950_v43, %v942_v40  ;;  %v3435_v53 = vpack.c.bf16 %v965_v46, %v957_v45  ;;  %v991_v44 = vld [vmem:[%s5037_s27 + $0x1418] sm:$0xff]  ;;  %v1028_v38 = vld [vmem:[%s5037_s27 + $0x1540] sm:$0xff]  ;;  %v1022_v40 = vld [vmem:[%s5037_s27 + $0x1510] sm:$0xff] }
 0x130   : > { %3672 = vmatprep.subr.bf16.mxu1 %v3671_v57  ;;  %1590 = vmatprep.mubr.f32.mxu0 %v5355_v61  ;;  %v3691_v57 = vpack.c.bf16 %v967_v48, %v959_v47  ;;  %v999_v9 = vld [vmem:[%s5037_s27 + $0x1458] sm:$0xff]  ;;  %v1030_v43 = vld [vmem:[%s5037_s27 + $0x1550] sm:$0xff]  ;;  %v1037_v45 = vld [vmem:[%s5037_s27 + $0x1588] sm:$0xff] }
 0x131   : > { %1874 = vmatprep.mubr.f32.mxu1 %v5355_v61  ;;  %v1045_v46 = vld [vmem:[%s5037_s27 + $0x15c8] sm:$0xff]  ;;  %v1039_v47 = vld [vmem:[%s5037_s27 + $0x1598] sm:$0xff] }
 0x132   : > { %3418 = vmatpush1.bf16.msra.mxu0 %v3417_v63  ;;  %v3437_v63 = vpack.c.bf16 %v964_v55, %v956_v54  ;;  %v1047_v48 = vld [vmem:[%s5037_s27 + $0x15d8] sm:$0xff]  ;;  %v1036_v54 = vld [vmem:[%s5037_s27 + $0x1580] sm:$0xff] }
 0x133   : > { %3674 = vmatpush1.bf16.msra.mxu1 %v3673_v0  ;;  %3420 = vmatprep.subr.bf16.mxu0 %v3419_v1  ;;  %v3693_v0 = vpack.c.bf16 %v966_v58, %v958_v56  ;;  %v3439_v1 = vpack.c.bf16 %v981_v60, %v973_v59  ;;  %v1044_v55 = vld [vmem:[%s5037_s27 + $0x15c0] sm:$0xff]  ;;  %v1038_v56 = vld [vmem:[%s5037_s27 + $0x1590] sm:$0xff]  ;;  %v1053_v59 = vld [vmem:[%s5037_s27 + $0x1608] sm:$0xff] }
 0x134   : > { %3676 = vmatprep.subr.bf16.mxu1 %v3675_v5  ;;  %v3695_v5 = vpack.c.bf16 %v983_v39, %v975_v62  ;;  %v1046_v58 = vld [vmem:[%s5037_s27 + $0x15d0] sm:$0xff]  ;;  %v1061_v60 = vld [vmem:[%s5037_s27 + $0x1648] sm:$0xff]  ;;  %v1055_v62 = vld [vmem:[%s5037_s27 + $0x1618] sm:$0xff] }
 0x135   : > { %v1063_v39 = vld [vmem:[%s5037_s27 + $0x1658] sm:$0xff] }
 0x136   : > { %3422 = vmatpush1.bf16.msra.mxu0 %v3421_v10  ;;  %v3441_v10 = vpack.c.bf16 %v980_v3, %v972_v2  ;;  %v1052_v2 = vld [vmem:[%s5037_s27 + $0x1600] sm:$0xff] }
 0x137   : > { %3678 = vmatpush1.bf16.msra.mxu1 %v3677_v11  ;;  %3424 = vmatprep.subr.bf16.mxu0 %v3423_v12  ;;  %v3697_v11 = vpack.c.bf16 %v982_v6, %v974_v4  ;;  %v3443_v12 = vpack.c.bf16 %v997_v8, %v989_v7  ;;  %v1060_v3 = vld [vmem:[%s5037_s27 + $0x1640] sm:$0xff]  ;;  %v1054_v4 = vld [vmem:[%s5037_s27 + $0x1610] sm:$0xff]  ;;  %v1069_v7 = vld [vmem:[%s5037_s27 + $0x1688] sm:$0xff] }
 0x138   : > { %3680 = vmatprep.subr.bf16.mxu1 %v3679_v16  ;;  %v3699_v16 = vpack.c.bf16 %v999_v9, %v991_v44  ;;  %v1062_v6 = vld [vmem:[%s5037_s27 + $0x1650] sm:$0xff]  ;;  %v1077_v8 = vld [vmem:[%s5037_s27 + $0x16c8] sm:$0xff]  ;;  %v1071_v44 = vld [vmem:[%s5037_s27 + $0x1698] sm:$0xff] }
 0x139   : > { %v1079_v9 = vld [vmem:[%s5037_s27 + $0x16d8] sm:$0xff] }
 0x13a   : > { %3426 = vmatpush1.bf16.msra.mxu0 %v3425_v22  ;;  %v3445_v22 = vpack.c.bf16 %v996_v14, %v988_v13  ;;  %v1068_v13 = vld [vmem:[%s5037_s27 + $0x1680] sm:$0xff] }
 0x13b   : > { %3682 = vmatpush1.bf16.msra.mxu1 %v3681_v23  ;;  %3428 = vmatprep.subr.bf16.mxu0 %v3427_v24  ;;  %v3701_v23 = vpack.c.bf16 %v998_v17, %v990_v15  ;;  %v3447_v24 = vpack.c.bf16 %v1013_v19, %v1005_v18  ;;  %v1076_v14 = vld [vmem:[%s5037_s27 + $0x16c0] sm:$0xff]  ;;  %v1070_v15 = vld [vmem:[%s5037_s27 + $0x1690] sm:$0xff]  ;;  %v1085_v18 = vld [vmem:[%s5037_s27 + $0x1708] sm:$0xff] }
 0x13c   : > { %3684 = vmatprep.subr.bf16.mxu1 %v3683_v28  ;;  %v3703_v28 = vpack.c.bf16 %v1015_v21, %v1007_v20  ;;  %v1078_v17 = vld [vmem:[%s5037_s27 + $0x16d0] sm:$0xff]  ;;  %v1093_v19 = vld [vmem:[%s5037_s27 + $0x1748] sm:$0xff]  ;;  %v1087_v20 = vld [vmem:[%s5037_s27 + $0x1718] sm:$0xff] }
 0x13d   : > { %v1095_v21 = vld [vmem:[%s5037_s27 + $0x1758] sm:$0xff] }
 0x13e   : > { %3430 = vmatpush1.bf16.msra.mxu0 %v3429_v34  ;;  %v3449_v34 = vpack.c.bf16 %v1012_v26, %v1004_v25  ;;  %v1084_v25 = vld [vmem:[%s5037_s27 + $0x1700] sm:$0xff] }
 0x13f   : > { %3686 = vmatpush1.bf16.msra.mxu1 %v3685_v35  ;;  %3432 = vmatprep.subr.bf16.mxu0 %v3431_v36  ;;  %v3705_v35 = vpack.c.bf16 %v1014_v29, %v1006_v27  ;;  %v3451_v36 = vpack.c.bf16 %v1029_v31, %v1021_v30  ;;  %v1092_v26 = vld [vmem:[%s5037_s27 + $0x1740] sm:$0xff]  ;;  %v1086_v27 = vld [vmem:[%s5037_s27 + $0x1710] sm:$0xff]  ;;  %v1101_v30 = vld [vmem:[%s5037_s27 + $0x1788] sm:$0xff] }
 0x140   : > { %3688 = vmatprep.subr.bf16.mxu1 %v3687_v41  ;;  %v3707_v41 = vpack.c.bf16 %v1031_v33, %v1023_v32  ;;  %v1094_v29 = vld [vmem:[%s5037_s27 + $0x1750] sm:$0xff]  ;;  %v1109_v31 = vld [vmem:[%s5037_s27 + $0x17c8] sm:$0xff]  ;;  %v1103_v32 = vld [vmem:[%s5037_s27 + $0x1798] sm:$0xff] }
 0x141   : > { %v1111_v33 = vld [vmem:[%s5037_s27 + $0x17d8] sm:$0xff] }
 0x142   : > { %3434 = vmatpush1.bf16.msra.mxu0 %v3433_v50  ;;  %v3453_v50 = vpack.c.bf16 %v1028_v38, %v1020_v37  ;;  %v1100_v37 = vld [vmem:[%s5037_s27 + $0x1780] sm:$0xff] }
 0x143   : > { %3690 = vmatpush1.bf16.msra.mxu1 %v3689_v52  ;;  %3436 = vmatprep.subr.bf16.mxu0 %v3435_v53  ;;  %v3709_v52 = vpack.c.bf16 %v1030_v43, %v1022_v40  ;;  %v3455_v53 = vpack.c.bf16 %v1045_v46, %v1037_v45  ;;  %v1108_v38 = vld [vmem:[%s5037_s27 + $0x17c0] sm:$0xff]  ;;  %v1102_v40 = vld [vmem:[%s5037_s27 + $0x1790] sm:$0xff]  ;;  %v1117_v45 = vld [vmem:[%s5037_s27 + $0x1808] sm:$0xff] }
 0x144   : > { %3692 = vmatprep.subr.bf16.mxu1 %v3691_v57  ;;  %v3711_v57 = vpack.c.bf16 %v1047_v48, %v1039_v47  ;;  %v1110_v43 = vld [vmem:[%s5037_s27 + $0x17d0] sm:$0xff]  ;;  %v1125_v46 = vld [vmem:[%s5037_s27 + $0x1848] sm:$0xff]  ;;  %v1119_v47 = vld [vmem:[%s5037_s27 + $0x1818] sm:$0xff] }
 0x145   : > { %v1127_v48 = vld [vmem:[%s5037_s27 + $0x1858] sm:$0xff] }
 0x146   : > { %3438 = vmatpush1.bf16.msra.mxu0 %v3437_v63  ;;  %v3457_v63 = vpack.c.bf16 %v1044_v55, %v1036_v54  ;;  %v1116_v54 = vld [vmem:[%s5037_s27 + $0x1800] sm:$0xff] }
 0x147   : > { %3694 = vmatpush1.bf16.msra.mxu1 %v3693_v0  ;;  %3440 = vmatprep.subr.bf16.mxu0 %v3439_v1  ;;  %v3713_v0 = vpack.c.bf16 %v1046_v58, %v1038_v56  ;;  %v3459_v1 = vpack.c.bf16 %v1061_v60, %v1053_v59  ;;  %v1124_v55 = vld [vmem:[%s5037_s27 + $0x1840] sm:$0xff]  ;;  %v1118_v56 = vld [vmem:[%s5037_s27 + $0x1810] sm:$0xff]  ;;  %v1133_v59 = vld [vmem:[%s5037_s27 + $0x1888] sm:$0xff] }
 0x148   : > { %3696 = vmatprep.subr.bf16.mxu1 %v3695_v5  ;;  %v3715_v5 = vpack.c.bf16 %v1063_v39, %v1055_v62  ;;  %v1126_v58 = vld [vmem:[%s5037_s27 + $0x1850] sm:$0xff]  ;;  %v1141_v60 = vld [vmem:[%s5037_s27 + $0x18c8] sm:$0xff]  ;;  %v1135_v62 = vld [vmem:[%s5037_s27 + $0x1898] sm:$0xff] }
 0x149   : > { %v1143_v39 = vld [vmem:[%s5037_s27 + $0x18d8] sm:$0xff] }
 0x14a   : > { %3442 = vmatpush1.bf16.msra.mxu0 %v3441_v10  ;;  %v3461_v10 = vpack.c.bf16 %v1060_v3, %v1052_v2  ;;  %v3479_v2 = vpack.c.bf16 %v1141_v60, %v1133_v59  ;;  %v1132_v3 = vld [vmem:[%s5037_s27 + $0x1880] sm:$0xff]  ;;  %v1206_v59 = vld [vmem:[%s5037_s27 + $0x1ad0] sm:$0xff]  ;;  %v1213_v60 = vld [vmem:[%s5037_s27 + $0x1b08] sm:$0xff] }
 0x14b   : > { %3698 = vmatpush1.bf16.msra.mxu1 %v3697_v11  ;;  %3444 = vmatprep.subr.bf16.mxu0 %v3443_v12  ;;  %v3717_v11 = vpack.c.bf16 %v1062_v6, %v1054_v4  ;;  %v3463_v12 = vpack.c.bf16 %v1077_v8, %v1069_v7  ;;  %v1140_v4 = vld [vmem:[%s5037_s27 + $0x18c0] sm:$0xff]  ;;  %v3735_v6 = vpack.c.bf16 %v1143_v39, %v1135_v62  ;;  %v1142_v7 = vld [vmem:[%s5037_s27 + $0x18d0] sm:$0xff]  ;;  %v1149_v8 = vld [vmem:[%s5037_s27 + $0x1908] sm:$0xff] }
 0x14c   : > { %3700 = vmatprep.subr.bf16.mxu1 %v3699_v16  ;;  %v3719_v16 = vpack.c.bf16 %v1079_v9, %v1071_v44  ;;  %v1157_v44 = vld [vmem:[%s5037_s27 + $0x1948] sm:$0xff]  ;;  %v1215_v39 = vld [vmem:[%s5037_s27 + $0x1b18] sm:$0xff] }
 0x14d   : > { %v1221_v62 = vld [vmem:[%s5037_s27 + $0x1b48] sm:$0xff] }
 0x14e   : > { %3446 = vmatpush1.bf16.msra.mxu0 %v3445_v22  ;;  %v3465_v22 = vpack.c.bf16 %v1076_v14, %v1068_v13  ;;  %v3483_v14 = vpack.c.bf16 %v1157_v44, %v1149_v8  ;;  %v1222_v8 = vld [vmem:[%s5037_s27 + $0x1b50] sm:$0xff]  ;;  %v1229_v44 = vld [vmem:[%s5037_s27 + $0x1b88] sm:$0xff] }
 0x14f   : > { %3702 = vmatpush1.bf16.msra.mxu1 %v3701_v23  ;;  %3448 = vmatprep.subr.bf16.mxu0 %v3447_v24  ;;  %v3721_v23 = vpack.c.bf16 %v1078_v17, %v1070_v15  ;;  %v3467_v24 = vpack.c.bf16 %v1093_v19, %v1085_v18  ;;  %v1148_v15 = vld [vmem:[%s5037_s27 + $0x1900] sm:$0xff]  ;;  %v1150_v17 = vld [vmem:[%s5037_s27 + $0x1910] sm:$0xff] }
 0x150   : > { %3704 = vmatprep.subr.bf16.mxu1 %v3703_v28  ;;  %v3723_v28 = vpack.c.bf16 %v1095_v21, %v1087_v20  ;;  %v1158_v19 = vld [vmem:[%s5037_s27 + $0x1950] sm:$0xff]  ;;  %v1165_v20 = vld [vmem:[%s5037_s27 + $0x1988] sm:$0xff] }
 0x151   : > { %v1173_v21 = vld [vmem:[%s5037_s27 + $0x19c8] sm:$0xff] }
 0x152   : > { %3450 = vmatpush1.bf16.msra.mxu0 %v3449_v34  ;;  %v3469_v34 = vpack.c.bf16 %v1092_v26, %v1084_v25  ;;  %v3487_v25 = vpack.c.bf16 %v1173_v21, %v1165_v20  ;;  %v1164_v26 = vld [vmem:[%s5037_s27 + $0x1980] sm:$0xff]  ;;  %v1238_v20 = vld [vmem:[%s5037_s27 + $0x1bd0] sm:$0xff]  ;;  %v1245_v21 = vld [vmem:[%s5037_s27 + $0x1c08] sm:$0xff] }
 0x153   : > { %3706 = vmatpush1.bf16.msra.mxu1 %v3705_v35  ;;  %3452 = vmatprep.subr.bf16.mxu0 %v3451_v36  ;;  %v3725_v35 = vpack.c.bf16 %v1094_v29, %v1086_v27  ;;  %v3471_v36 = vpack.c.bf16 %v1109_v31, %v1101_v30  ;;  %v1172_v27 = vld [vmem:[%s5037_s27 + $0x19c0] sm:$0xff]  ;;  %v1174_v30 = vld [vmem:[%s5037_s27 + $0x19d0] sm:$0xff]  ;;  %v1181_v31 = vld [vmem:[%s5037_s27 + $0x1a08] sm:$0xff] }
 0x154   : > { %3708 = vmatprep.subr.bf16.mxu1 %v3707_v41  ;;  %v3727_v41 = vpack.c.bf16 %v1111_v33, %v1103_v32  ;;  %v1189_v32 = vld [vmem:[%s5037_s27 + $0x1a48] sm:$0xff]  ;;  %v1183_v33 = vld [vmem:[%s5037_s27 + $0x1a18] sm:$0xff] }
 0x156   : > { %3454 = vmatpush1.bf16.msra.mxu0 %v3453_v50  ;;  %v3473_v50 = vpack.c.bf16 %v1108_v38, %v1100_v37  ;;  %v3491_v37 = vpack.c.bf16 %v1189_v32, %v1181_v31  ;;  %v1180_v38 = vld [vmem:[%s5037_s27 + $0x1a00] sm:$0xff]  ;;  %v1254_v31 = vld [vmem:[%s5037_s27 + $0x1c50] sm:$0xff]  ;;  %v1261_v32 = vld [vmem:[%s5037_s27 + $0x1c88] sm:$0xff] }
 0x157   : > { %3710 = vmatpush1.bf16.msra.mxu1 %v3709_v52  ;;  %3456 = vmatprep.subr.bf16.mxu0 %v3455_v53  ;;  %v3729_v52 = vpack.c.bf16 %v1110_v43, %v1102_v40  ;;  %v3475_v53 = vpack.c.bf16 %v1125_v46, %v1117_v45  ;;  %v1188_v40 = vld [vmem:[%s5037_s27 + $0x1a40] sm:$0xff]  ;;  %v1190_v45 = vld [vmem:[%s5037_s27 + $0x1a50] sm:$0xff]  ;;  %v1197_v46 = vld [vmem:[%s5037_s27 + $0x1a88] sm:$0xff] }
 0x158   : > { %3712 = vmatprep.subr.bf16.mxu1 %v3711_v57  ;;  %v3731_v57 = vpack.c.bf16 %v1127_v48, %v1119_v47  ;;  %v1205_v47 = vld [vmem:[%s5037_s27 + $0x1ac8] sm:$0xff]  ;;  %v1199_v48 = vld [vmem:[%s5037_s27 + $0x1a98] sm:$0xff] }
 0x15a   : > { %3458 = vmatpush1.bf16.msra.mxu0 %v3457_v63  ;;  %v5484_v63 = vld [vmem:[%s5152_s24 + $0x18] sm:$0xff] }
 0x15b   : > { %3714 = vmatpush1.bf16.msra.mxu1 %v3713_v0  ;;  %3460 = vmatprep.subr.bf16.mxu0 %v3459_v1  ;;  %v3477_v0 = vpack.c.bf16 %v1124_v55, %v1116_v54  ;;  %v3733_v1 = vpack.c.bf16 %v1126_v58, %v1118_v56  ;;  %v5494_v9 = vcombine.high %v5484_v63, %v5484_v63  ;;  %v1196_v55 = vld [vmem:[%s5037_s27 + $0x1a80] sm:$0xff] }
 0x15c   : > { %3716 = vmatprep.subr.bf16.mxu1 %v3715_v5  ;;  %v1134_v5 = vld [vmem:[%s5037_s27 + $0x1890] sm:$0xff]  ;;  %v3495_v54 = vpack.c.bf16 %v1205_v47, %v1197_v46  ;;  %v1204_v56 = vld [vmem:[%s5037_s27 + $0x1ac0] sm:$0xff]  ;;  %v1277_v47 = vld [vmem:[%s5037_s27 + $0x1d08] sm:$0xff] }
 0x15d   : > { %v3737_v13 = vpack.c.bf16 %v1142_v7, %v1134_v5  ;;  %v1220_v5 = vld [vmem:[%s5037_s27 + $0x1b40] sm:$0xff]  ;;  %v1270_v46 = vld [vmem:[%s5037_s27 + $0x1cd0] sm:$0xff] }
 0x15e   : > { %3462 = vmatpush1.bf16.msra.mxu0 %v3461_v10  ;;  %v1151_v10 = vld [vmem:[%s5037_s27 + $0x1918] sm:$0xff] }
 0x15f   : > { %3718 = vmatpush1.bf16.msra.mxu1 %v3717_v11  ;;  %3464 = vmatprep.subr.bf16.mxu0 %v3463_v12  ;;  %v1159_v11 = vld [vmem:[%s5037_s27 + $0x1958] sm:$0xff]  ;;  %v3481_v12 = vpack.c.bf16 %v1140_v4, %v1132_v3  ;;  %v3499_v3 = vpack.c.bf16 %v1221_v62, %v1213_v60  ;;  %v1212_v4 = vld [vmem:[%s5037_s27 + $0x1b00] sm:$0xff]  ;;  %v1286_v60 = vld [vmem:[%s5037_s27 + $0x1d50] sm:$0xff] }
 0x160   : > { %3720 = vmatprep.subr.bf16.mxu1 %v3719_v16  ;;  %v1156_v16 = vld [vmem:[%s5037_s27 + $0x1940] sm:$0xff]  ;;  %v3739_v18 = vpack.c.bf16 %v1159_v11, %v1151_v10  ;;  %v1237_v10 = vld [vmem:[%s5037_s27 + $0x1bc8] sm:$0xff]  ;;  %v1231_v11 = vld [vmem:[%s5037_s27 + $0x1b98] sm:$0xff] }
 0x161   : > { %v1293_v62 = vld [vmem:[%s5037_s27 + $0x1d88] sm:$0xff] }
 0x162   : > { %3466 = vmatpush1.bf16.msra.mxu0 %v3465_v22  ;;  %v1175_v22 = vld [vmem:[%s5037_s27 + $0x19d8] sm:$0xff] }
 0x163   : > { %3722 = vmatpush1.bf16.msra.mxu1 %v3721_v23  ;;  %3468 = vmatprep.subr.bf16.mxu0 %v3467_v24  ;;  %v3485_v23 = vpack.c.bf16 %v1156_v16, %v1148_v15  ;;  %v3741_v24 = vpack.c.bf16 %v1158_v19, %v1150_v17  ;;  %v3503_v15 = vpack.c.bf16 %v1237_v10, %v1229_v44  ;;  %v1228_v16 = vld [vmem:[%s5037_s27 + $0x1b80] sm:$0xff]  ;;  %v1302_v44 = vld [vmem:[%s5037_s27 + $0x1dd0] sm:$0xff]  ;;  %v1309_v10 = vld [vmem:[%s5037_s27 + $0x1e08] sm:$0xff] }
 0x164   : > { %3724 = vmatprep.subr.bf16.mxu1 %v3723_v28  ;;  %v1166_v28 = vld [vmem:[%s5037_s27 + $0x1990] sm:$0xff]  ;;  %v1236_v17 = vld [vmem:[%s5037_s27 + $0x1bc0] sm:$0xff] }
 0x166   : > { %3470 = vmatpush1.bf16.msra.mxu0 %v3469_v34  ;;  %v1191_v34 = vld [vmem:[%s5037_s27 + $0x1a58] sm:$0xff] }
 0x167   : > { %3726 = vmatpush1.bf16.msra.mxu1 %v3725_v35  ;;  %3472 = vmatprep.subr.bf16.mxu0 %v3471_v36  ;;  %v3489_v35 = vpack.c.bf16 %v1172_v27, %v1164_v26  ;;  %v3745_v36 = vpack.c.bf16 %v1174_v30, %v1166_v28  ;;  %v3747_v43 = vpack.c.bf16 %v1191_v34, %v1183_v33  ;;  %v1244_v27 = vld [vmem:[%s5037_s27 + $0x1c00] sm:$0xff]  ;;  %v1269_v33 = vld [vmem:[%s5037_s27 + $0x1cc8] sm:$0xff]  ;;  %v1263_v34 = vld [vmem:[%s5037_s27 + $0x1c98] sm:$0xff] }
 0x168   : > { %3728 = vmatprep.subr.bf16.mxu1 %v3727_v41  ;;  %v1182_v41 = vld [vmem:[%s5037_s27 + $0x1a10] sm:$0xff]  ;;  %v1252_v28 = vld [vmem:[%s5037_s27 + $0x1c40] sm:$0xff] }
 0x16a   : > { %3474 = vmatpush1.bf16.msra.mxu0 %v3473_v50  ;;  %v1207_v50 = vld [vmem:[%s5037_s27 + $0x1ad8] sm:$0xff] }
 0x16b   : > { %3730 = vmatpush1.bf16.msra.mxu1 %v3729_v52  ;;  %3476 = vmatprep.subr.bf16.mxu0 %v3475_v53  ;;  %v3493_v52 = vpack.c.bf16 %v1188_v40, %v1180_v38  ;;  %v3749_v53 = vpack.c.bf16 %v1190_v45, %v1182_v41  ;;  %v3751_v58 = vpack.c.bf16 %v1207_v50, %v1199_v48  ;;  %v1260_v40 = vld [vmem:[%s5037_s27 + $0x1c80] sm:$0xff]  ;;  %v1285_v48 = vld [vmem:[%s5037_s27 + $0x1d48] sm:$0xff]  ;;  %v1279_v50 = vld [vmem:[%s5037_s27 + $0x1d18] sm:$0xff] }
 0x16c   : > { %3732 = vmatprep.subr.bf16.mxu1 %v3731_v57  ;;  %v1198_v57 = vld [vmem:[%s5037_s27 + $0x1a90] sm:$0xff]  ;;  %v3511_v38 = vpack.c.bf16 %v1269_v33, %v1261_v32  ;;  %v1268_v41 = vld [vmem:[%s5037_s27 + $0x1cc0] sm:$0xff]  ;;  %v1341_v33 = vld [vmem:[%s5037_s27 + $0x1f08] sm:$0xff] }
 0x16d   : > { %1591 = vmatmul.mubr.f32.vlgmr.msra.gmra.mrb[0].mxu0 %v5345_v51  ;;  %v1334_v32 = vld [vmem:[%s5037_s27 + $0x1ed0] sm:$0xff] }
 0x16e   : > { %3478 = vmatpush1.bf16.msra.mxu0 %v3477_v0  ;;  %1875 = vmatmul.mubr.f32.vlgmr.msra.gmra.mrb[0].mxu1 %v5345_v51  ;;  %v1167_v51 = vld [vmem:[%s5037_s27 + $0x1998] sm:$0xff] }
 0x16f   : > { %3734 = vmatpush1.bf16.msra.mxu1 %v3733_v1  ;;  %3480 = vmatprep.subr.bf16.mxu0 %v3479_v2  ;;  %v3743_v29 = vpack.c.bf16 %v1175_v22, %v1167_v51  ;;  %v1223_v0 = vld [vmem:[%s5037_s27 + $0x1b58] sm:$0xff]  ;;  %v3497_v1 = vpack.c.bf16 %v1204_v56, %v1196_v55  ;;  %v3753_v2 = vpack.c.bf16 %v1206_v59, %v1198_v57  ;;  %v1253_v51 = vld [vmem:[%s5037_s27 + $0x1c48] sm:$0xff]  ;;  %v1276_v56 = vld [vmem:[%s5037_s27 + $0x1d00] sm:$0xff] }
 0x170   : > { %3736 = vmatprep.subr.bf16.mxu1 %v3735_v6  ;;  %1661 = vmatprep.mubr.f32.mxu0 %v5494_v9  ;;  %v1214_v6 = vld [vmem:[%s5037_s27 + $0x1b10] sm:$0xff]  ;;  %v3755_v7 = vpack.c.bf16 %v1223_v0, %v1215_v39  ;;  %v1247_v22 = vld [vmem:[%s5037_s27 + $0x1c18] sm:$0xff]  ;;  %v3507_v26 = vpack.c.bf16 %v1253_v51, %v1245_v21  ;;  %v3515_v55 = vpack.c.bf16 %v1285_v48, %v1277_v47  ;;  %v1284_v57 = vld [vmem:[%s5037_s27 + $0x1d40] sm:$0xff] }
 0x171   : > { %1945 = vmatprep.mubr.f32.mxu1 %v5494_v9  ;;  %v1301_v39 = vld [vmem:[%s5037_s27 + $0x1dc8] sm:$0xff]  ;;  %v1295_v0 = vld [vmem:[%s5037_s27 + $0x1d98] sm:$0xff]  ;;  %v1318_v21 = vld [vmem:[%s5037_s27 + $0x1e50] sm:$0xff] }
 0x172   : > { %3482 = vmatpush1.bf16.msra.mxu0 %v3481_v12  ;;  %v1239_v12 = vld [vmem:[%s5037_s27 + $0x1bd8] sm:$0xff]  ;;  %v1325_v51 = vld [vmem:[%s5037_s27 + $0x1e88] sm:$0xff]  ;;  %v1350_v47 = vld [vmem:[%s5037_s27 + $0x1f50] sm:$0xff] }
 0x173   : > { %3738 = vmatpush1.bf16.msra.mxu1 %v3737_v13  ;;  %3484 = vmatprep.subr.bf16.mxu0 %v3483_v14  ;;  %v3501_v13 = vpack.c.bf16 %v1220_v5, %v1212_v4  ;;  %v3757_v14 = vpack.c.bf16 %v1222_v8, %v1214_v6  ;;  %v3759_v19 = vpack.c.bf16 %v1239_v12, %v1231_v11  ;;  %v1292_v5 = vld [vmem:[%s5037_s27 + $0x1d80] sm:$0xff]  ;;  %v1317_v11 = vld [vmem:[%s5037_s27 + $0x1e48] sm:$0xff]  ;;  %v1311_v12 = vld [vmem:[%s5037_s27 + $0x1e18] sm:$0xff] }
 0x174   : > { %3740 = vmatprep.subr.bf16.mxu1 %v3739_v18  ;;  %v1230_v18 = vld [vmem:[%s5037_s27 + $0x1b90] sm:$0xff]  ;;  %v3519_v4 = vpack.c.bf16 %v1301_v39, %v1293_v62  ;;  %v1300_v6 = vld [vmem:[%s5037_s27 + $0x1dc0] sm:$0xff]  ;;  %v1357_v48 = vld [vmem:[%s5037_s27 + $0x1f88] sm:$0xff] }
 0x175   : > { %v1366_v62 = vld [vmem:[%s5037_s27 + $0x1fd0] sm:$0xff]  ;;  %v353_v39 = vld [vmem:[%s5037_s27 + $0x28] sm:$0xff] }
 0x176   : > { %3486 = vmatpush1.bf16.msra.mxu0 %v3485_v23  ;;  %v1255_v23 = vld [vmem:[%s5037_s27 + $0x1c58] sm:$0xff] }
 0x177   : > { %3742 = vmatpush1.bf16.msra.mxu1 %v3741_v24  ;;  %3488 = vmatprep.subr.bf16.mxu0 %v3487_v25  ;;  %v3505_v24 = vpack.c.bf16 %v1236_v17, %v1228_v16  ;;  %v3761_v25 = vpack.c.bf16 %v1238_v20, %v1230_v18  ;;  %v3763_v30 = vpack.c.bf16 %v1255_v23, %v1247_v22  ;;  %v1308_v17 = vld [vmem:[%s5037_s27 + $0x1e00] sm:$0xff]  ;;  %v1333_v22 = vld [vmem:[%s5037_s27 + $0x1ec8] sm:$0xff]  ;;  %v1327_v23 = vld [vmem:[%s5037_s27 + $0x1e98] sm:$0xff] }
 0x178   : > { %3744 = vmatprep.subr.bf16.mxu1 %v3743_v29  ;;  %v1246_v29 = vld [vmem:[%s5037_s27 + $0x1c10] sm:$0xff]  ;;  %v3523_v16 = vpack.c.bf16 %v1317_v11, %v1309_v10  ;;  %v1316_v18 = vld [vmem:[%s5037_s27 + $0x1e40] sm:$0xff]  ;;  %v369_v11 = vld [vmem:[%s5037_s27 + $0xa8] sm:$0xff] }
 0x179   : > { %v362_v10 = vld [vmem:[%s5037_s27 + $0x70] sm:$0xff] }
 0x17a   : > { %3490 = vmatpush1.bf16.msra.mxu0 %v3489_v35  ;;  %v1271_v35 = vld [vmem:[%s5037_s27 + $0x1cd8] sm:$0xff] }
 0x17b   : > { %3746 = vmatpush1.bf16.msra.mxu1 %v3745_v36  ;;  %3492 = vmatprep.subr.bf16.mxu0 %v3491_v37  ;;  %v3509_v36 = vpack.c.bf16 %v1252_v28, %v1244_v27  ;;  %v3765_v37 = vpack.c.bf16 %v1254_v31, %v1246_v29  ;;  %v3767_v45 = vpack.c.bf16 %v1271_v35, %v1263_v34  ;;  %v1324_v28 = vld [vmem:[%s5037_s27 + $0x1e80] sm:$0xff]  ;;  %v1349_v34 = vld [vmem:[%s5037_s27 + $0x1f48] sm:$0xff]  ;;  %v1343_v35 = vld [vmem:[%s5037_s27 + $0x1f18] sm:$0xff] }
 0x17c   : > { %3748 = vmatprep.subr.bf16.mxu1 %v3747_v43  ;;  %v1262_v43 = vld [vmem:[%s5037_s27 + $0x1c90] sm:$0xff]  ;;  %v3527_v27 = vpack.c.bf16 %v1333_v22, %v1325_v51  ;;  %v1332_v29 = vld [vmem:[%s5037_s27 + $0x1ec0] sm:$0xff]  ;;  %v385_v22 = vld [vmem:[%s5037_s27 + $0x128] sm:$0xff] }
 0x17d   : > { %v378_v51 = vld [vmem:[%s5037_s27 + $0xf0] sm:$0xff] }
 0x17e   : > { %3494 = vmatpush1.bf16.msra.mxu0 %v3493_v52  ;;  %v1287_v52 = vld [vmem:[%s5037_s27 + $0x1d58] sm:$0xff] }
 0x17f   : > { %3750 = vmatpush1.bf16.msra.mxu1 %v3749_v53  ;;  %3496 = vmatprep.subr.bf16.mxu0 %v3495_v54  ;;  %v3513_v53 = vpack.c.bf16 %v1268_v41, %v1260_v40  ;;  %v3769_v54 = vpack.c.bf16 %v1270_v46, %v1262_v43  ;;  %v3771_v59 = vpack.c.bf16 %v1287_v52, %v1279_v50  ;;  %v1340_v41 = vld [vmem:[%s5037_s27 + $0x1f00] sm:$0xff]  ;;  %v1365_v50 = vld [vmem:[%s5037_s27 + $0x1fc8] sm:$0xff]  ;;  %v1359_v52 = vld [vmem:[%s5037_s27 + $0x1f98] sm:$0xff] }
 0x180   : > { %3752 = vmatprep.subr.bf16.mxu1 %v3751_v58  ;;  %v1278_v58 = vld [vmem:[%s5037_s27 + $0x1d10] sm:$0xff]  ;;  %v3531_v40 = vpack.c.bf16 %v1349_v34, %v1341_v33  ;;  %v1348_v43 = vld [vmem:[%s5037_s27 + $0x1f40] sm:$0xff]  ;;  %v401_v34 = vld [vmem:[%s5037_s27 + $0x1a8] sm:$0xff] }
 0x181   : > { %v394_v33 = vld [vmem:[%s5037_s27 + $0x170] sm:$0xff] }
 0x182   : > { %3498 = vmatpush1.bf16.msra.mxu0 %v3497_v1  ;;  %v1303_v1 = vld [vmem:[%s5037_s27 + $0x1dd8] sm:$0xff] }
 0x183   : > { %3754 = vmatpush1.bf16.msra.mxu1 %v3753_v2  ;;  %3500 = vmatprep.subr.bf16.mxu0 %v3499_v3  ;;  %v3517_v2 = vpack.c.bf16 %v1284_v57, %v1276_v56  ;;  %v3773_v3 = vpack.c.bf16 %v1286_v60, %v1278_v58  ;;  %v3775_v8 = vpack.c.bf16 %v1303_v1, %v1295_v0  ;;  %v1356_v57 = vld [vmem:[%s5037_s27 + $0x1f80] sm:$0xff]  ;;  %v361_v0 = vld [vmem:[%s5037_s27 + $0x68] sm:$0xff]  ;;  %v355_v1 = vld [vmem:[%s5037_s27 + $0x38] sm:$0xff] }
 0x184   : > { %3756 = vmatprep.subr.bf16.mxu1 %v3755_v7  ;;  %v1294_v7 = vld [vmem:[%s5037_s27 + $0x1d90] sm:$0xff]  ;;  %v3535_v56 = vpack.c.bf16 %v1365_v50, %v1357_v48  ;;  %v1364_v58 = vld [vmem:[%s5037_s27 + $0x1fc0] sm:$0xff]  ;;  %v417_v48 = vld [vmem:[%s5037_s27 + $0x228] sm:$0xff] }
 0x185   : > { %v419_v50 = vld [vmem:[%s5037_s27 + $0x238] sm:$0xff] }
 0x186   : > { %3502 = vmatpush1.bf16.msra.mxu0 %v3501_v13  ;;  %v1319_v13 = vld [vmem:[%s5037_s27 + $0x1e58] sm:$0xff] }
 0x187   : > { %3758 = vmatpush1.bf16.msra.mxu1 %v3757_v14  ;;  %3504 = vmatprep.subr.bf16.mxu0 %v3503_v15  ;;  %v3521_v14 = vpack.c.bf16 %v1300_v6, %v1292_v5  ;;  %v3777_v15 = vpack.c.bf16 %v1302_v44, %v1294_v7  ;;  %v3779_v20 = vpack.c.bf16 %v1319_v13, %v1311_v12  ;;  %v352_v6 = vld [vmem:[%s5037_s27 + $0x20] sm:$0xff]  ;;  %v377_v12 = vld [vmem:[%s5037_s27 + $0xe8] sm:$0xff]  ;;  %v371_v13 = vld [vmem:[%s5037_s27 + $0xb8] sm:$0xff] }
 0x188   : > { %3760 = vmatprep.subr.bf16.mxu1 %v3759_v19  ;;  %v1310_v19 = vld [vmem:[%s5037_s27 + $0x1e10] sm:$0xff]  ;;  %v3795_v5 = vpack.c.bf16 %v361_v0, %v353_v39  ;;  %v360_v7 = vld [vmem:[%s5037_s27 + $0x60] sm:$0xff]  ;;  %v441_v39 = vld [vmem:[%s5037_s27 + $0x2e8] sm:$0xff] }
 0x189   : > { %v435_v0 = vld [vmem:[%s5037_s27 + $0x2b8] sm:$0xff] }
 0x18a   : > { %3506 = vmatpush1.bf16.msra.mxu0 %v3505_v24  ;;  %v1335_v24 = vld [vmem:[%s5037_s27 + $0x1ed8] sm:$0xff] }
 0x18b   : > { %3762 = vmatpush1.bf16.msra.mxu1 %v3761_v25  ;;  %3508 = vmatprep.subr.bf16.mxu0 %v3507_v26  ;;  %v3525_v25 = vpack.c.bf16 %v1316_v18, %v1308_v17  ;;  %v3781_v26 = vpack.c.bf16 %v1318_v21, %v1310_v19  ;;  %v3783_v31 = vpack.c.bf16 %v1335_v24, %v1327_v23  ;;  %v368_v18 = vld [vmem:[%s5037_s27 + $0xa0] sm:$0xff]  ;;  %v393_v23 = vld [vmem:[%s5037_s27 + $0x168] sm:$0xff]  ;;  %v387_v24 = vld [vmem:[%s5037_s27 + $0x138] sm:$0xff] }
 0x18c   : > { %3764 = vmatprep.subr.bf16.mxu1 %v3763_v30  ;;  %v1326_v30 = vld [vmem:[%s5037_s27 + $0x1e90] sm:$0xff]  ;;  %v3799_v17 = vpack.c.bf16 %v377_v12, %v369_v11  ;;  %v376_v19 = vld [vmem:[%s5037_s27 + $0xe0] sm:$0xff]  ;;  %v457_v11 = vld [vmem:[%s5037_s27 + $0x368] sm:$0xff] }
 0x18d   : > { %v451_v12 = vld [vmem:[%s5037_s27 + $0x338] sm:$0xff] }
 0x18e   : > { %3510 = vmatpush1.bf16.msra.mxu0 %v3509_v36  ;;  %v1351_v36 = vld [vmem:[%s5037_s27 + $0x1f58] sm:$0xff] }
 0x18f   : > { %3766 = vmatpush1.bf16.msra.mxu1 %v3765_v37  ;;  %3512 = vmatprep.subr.bf16.mxu0 %v3511_v38  ;;  %v3529_v37 = vpack.c.bf16 %v1332_v29, %v1324_v28  ;;  %v3785_v38 = vpack.c.bf16 %v1334_v32, %v1326_v30  ;;  %v3787_v46 = vpack.c.bf16 %v1351_v36, %v1343_v35  ;;  %v384_v29 = vld [vmem:[%s5037_s27 + $0x120] sm:$0xff]  ;;  %v409_v35 = vld [vmem:[%s5037_s27 + $0x1e8] sm:$0xff]  ;;  %v411_v36 = vld [vmem:[%s5037_s27 + $0x1f8] sm:$0xff] }
 0x190   : > { %3768 = vmatprep.subr.bf16.mxu1 %v3767_v45  ;;  %v1342_v45 = vld [vmem:[%s5037_s27 + $0x1f10] sm:$0xff]  ;;  %v3803_v28 = vpack.c.bf16 %v393_v23, %v385_v22  ;;  %v392_v30 = vld [vmem:[%s5037_s27 + $0x160] sm:$0xff]  ;;  %v473_v22 = vld [vmem:[%s5037_s27 + $0x3e8] sm:$0xff] }
 0x191   : > { %v467_v23 = vld [vmem:[%s5037_s27 + $0x3b8] sm:$0xff] }
 0x192   : > { %3514 = vmatpush1.bf16.msra.mxu0 %v3513_v53  ;;  %v1367_v53 = vld [vmem:[%s5037_s27 + $0x1fd8] sm:$0xff] }
 0x193   : > { %3770 = vmatpush1.bf16.msra.mxu1 %v3769_v54  ;;  %3516 = vmatprep.subr.bf16.mxu0 %v3515_v55  ;;  %v3533_v54 = vpack.c.bf16 %v1348_v43, %v1340_v41  ;;  %v3789_v55 = vpack.c.bf16 %v1350_v47, %v1342_v45  ;;  %v3791_v60 = vpack.c.bf16 %v1367_v53, %v1359_v52  ;;  %v400_v41 = vld [vmem:[%s5037_s27 + $0x1a0] sm:$0xff]  ;;  %v402_v45 = vld [vmem:[%s5037_s27 + $0x1b0] sm:$0xff]  ;;  %v427_v52 = vld [vmem:[%s5037_s27 + $0x278] sm:$0xff] }
 0x194   : > { %3772 = vmatprep.subr.bf16.mxu1 %v3771_v59  ;;  %v1358_v59 = vld [vmem:[%s5037_s27 + $0x1f90] sm:$0xff]  ;;  %v408_v43 = vld [vmem:[%s5037_s27 + $0x1e0] sm:$0xff] }
 0x195   : > { %v410_v47 = vld [vmem:[%s5037_s27 + $0x1f0] sm:$0xff]  ;;  %v3809_v53 = vpack.c.bf16 %v408_v43, %v400_v41  ;;  %v488_v41 = vld [vmem:[%s5037_s27 + $0x460] sm:$0xff] }
 0x196   : > { %3518 = vmatpush1.bf16.msra.mxu0 %v3517_v2  ;;  %v363_v2 = vld [vmem:[%s5037_s27 + $0x78] sm:$0xff]  ;;  %v482_v43 = vld [vmem:[%s5037_s27 + $0x430] sm:$0xff] }
 0x197   : > { %3774 = vmatpush1.bf16.msra.mxu1 %v3773_v3  ;;  %3520 = vmatprep.subr.bf16.mxu0 %v3519_v4  ;;  %v3537_v3 = vpack.c.bf16 %v1364_v58, %v1356_v57  ;;  %v3793_v4 = vpack.c.bf16 %v1366_v62, %v1358_v59  ;;  %v4051_v44 = vpack.c.bf16 %v363_v2, %v355_v1  ;;  %v424_v57 = vld [vmem:[%s5037_s27 + $0x260] sm:$0xff]  ;;  %v418_v58 = vld [vmem:[%s5037_s27 + $0x230] sm:$0xff]  ;;  %v433_v62 = vld [vmem:[%s5037_s27 + $0x2a8] sm:$0xff] }
 0x198   : > { %3776 = vmatprep.subr.bf16.mxu1 %v3775_v8  ;;  %v354_v8 = vld [vmem:[%s5037_s27 + $0x30] sm:$0xff]  ;;  %v4067_v59 = vpack.c.bf16 %v427_v52, %v419_v50  ;;  %v443_v1 = vld [vmem:[%s5037_s27 + $0x2f8] sm:$0xff] }
 0x199   : > { %v507_v50 = vld [vmem:[%s5037_s27 + $0x4f8] sm:$0xff] }
 0x19a   : > { %3522 = vmatpush1.bf16.msra.mxu0 %v3521_v14  ;;  %v379_v14 = vld [vmem:[%s5037_s27 + $0xf8] sm:$0xff] }
 0x19b   : > { %3778 = vmatpush1.bf16.msra.mxu1 %v3777_v15  ;;  %3524 = vmatprep.subr.bf16.mxu0 %v3523_v16  ;;  %v3797_v15 = vpack.c.bf16 %v360_v7, %v352_v6  ;;  %v4053_v16 = vpack.c.bf16 %v362_v10, %v354_v8  ;;  %v4055_v21 = vpack.c.bf16 %v379_v14, %v371_v13  ;;  %v440_v6 = vld [vmem:[%s5037_s27 + $0x2e0] sm:$0xff]  ;;  %v434_v7 = vld [vmem:[%s5037_s27 + $0x2b0] sm:$0xff]  ;;  %v449_v10 = vld [vmem:[%s5037_s27 + $0x328] sm:$0xff] }
 0x19c   : > { %3780 = vmatprep.subr.bf16.mxu1 %v3779_v20  ;;  %v370_v20 = vld [vmem:[%s5037_s27 + $0xb0] sm:$0xff]  ;;  %v4071_v8 = vpack.c.bf16 %v443_v1, %v435_v0  ;;  %v459_v13 = vld [vmem:[%s5037_s27 + $0x378] sm:$0xff] }
 0x19d   : > { %v523_v0 = vld [vmem:[%s5037_s27 + $0x578] sm:$0xff] }
 0x19e   : > { %3526 = vmatpush1.bf16.msra.mxu0 %v3525_v25  ;;  %v395_v25 = vld [vmem:[%s5037_s27 + $0x178] sm:$0xff] }
 0x19f   : > { %3782 = vmatpush1.bf16.msra.mxu1 %v3781_v26  ;;  %3528 = vmatprep.subr.bf16.mxu0 %v3527_v27  ;;  %v3801_v26 = vpack.c.bf16 %v376_v19, %v368_v18  ;;  %v4057_v27 = vpack.c.bf16 %v378_v51, %v370_v20  ;;  %v4059_v32 = vpack.c.bf16 %v395_v25, %v387_v24  ;;  %v456_v18 = vld [vmem:[%s5037_s27 + $0x360] sm:$0xff]  ;;  %v450_v19 = vld [vmem:[%s5037_s27 + $0x330] sm:$0xff]  ;;  %v465_v51 = vld [vmem:[%s5037_s27 + $0x3a8] sm:$0xff] }
 0x1a0   : > { %3784 = vmatprep.subr.bf16.mxu1 %v3783_v31  ;;  %v386_v31 = vld [vmem:[%s5037_s27 + $0x130] sm:$0xff]  ;;  %v4075_v20 = vpack.c.bf16 %v459_v13, %v451_v12  ;;  %v475_v24 = vld [vmem:[%s5037_s27 + $0x3f8] sm:$0xff] }
 0x1a1   : > { %v539_v12 = vld [vmem:[%s5037_s27 + $0x5f8] sm:$0xff] }
 0x1a2   : > { %3530 = vmatpush1.bf16.msra.mxu0 %v3529_v37  ;;  %v3805_v37 = vpack.c.bf16 %v392_v30, %v384_v29  ;;  %v472_v29 = vld [vmem:[%s5037_s27 + $0x3e0] sm:$0xff]  ;;  %v466_v30 = vld [vmem:[%s5037_s27 + $0x3b0] sm:$0xff] }
 0x1a3   : > { %3786 = vmatpush1.bf16.msra.mxu1 %v3785_v38  ;;  %3532 = vmatprep.subr.bf16.mxu0 %v3531_v40  ;;  %v4061_v38 = vpack.c.bf16 %v394_v33, %v386_v31  ;;  %v3807_v40 = vpack.c.bf16 %v409_v35, %v401_v34  ;;  %v4079_v31 = vpack.c.bf16 %v475_v24, %v467_v23  ;;  %v481_v33 = vld [vmem:[%s5037_s27 + $0x428] sm:$0xff]  ;;  %v483_v35 = vld [vmem:[%s5037_s27 + $0x438] sm:$0xff] }
 0x1a4   : > { %3788 = vmatprep.subr.bf16.mxu1 %v3787_v46  ;;  %v489_v34 = vld [vmem:[%s5037_s27 + $0x468] sm:$0xff]  ;;  %v555_v23 = vld [vmem:[%s5037_s27 + $0x678] sm:$0xff] }
 0x1a6   : > { %3534 = vmatpush1.bf16.msra.mxu0 %v3533_v54  ;;  %v4065_v54 = vpack.c.bf16 %v410_v47, %v402_v45  ;;  %v497_v47 = vld [vmem:[%s5037_s27 + $0x4a8] sm:$0xff] }
 0x1a7   : > { %3790 = vmatpush1.bf16.msra.mxu1 %v3789_v55  ;;  %3536 = vmatprep.subr.bf16.mxu0 %v3535_v56  ;;  %v416_v56 = vld [vmem:[%s5037_s27 + $0x220] sm:$0xff] }
 0x1a8   : > { %3792 = vmatprep.subr.bf16.mxu1 %v3791_v60  ;;  %v426_v60 = vld [vmem:[%s5037_s27 + $0x270] sm:$0xff]  ;;  %v3813_v2 = vpack.c.bf16 %v424_v57, %v416_v56  ;;  %v504_v56 = vld [vmem:[%s5037_s27 + $0x4e0] sm:$0xff] }
 0x1a9   : > { %v498_v57 = vld [vmem:[%s5037_s27 + $0x4b0] sm:$0xff] }
 0x1aa   : > { %3538 = vmatpush1.bf16.msra.mxu0 %v3537_v3  ;;  %v4069_v3 = vpack.c.bf16 %v426_v60, %v418_v58  ;;  %v513_v60 = vld [vmem:[%s5037_s27 + $0x528] sm:$0xff] }
 0x1ab   : > { %3794 = vmatpush1.bf16.msra.mxu1 %v3793_v4  ;;  %3796 = vmatprep.subr.bf16.mxu0 %v3795_v5  ;;  %v3815_v4 = vpack.c.bf16 %v441_v39, %v433_v62  ;;  %v432_v5 = vld [vmem:[%s5037_s27 + $0x2a0] sm:$0xff]  ;;  %v521_v62 = vld [vmem:[%s5037_s27 + $0x568] sm:$0xff]  ;;  %v515_v39 = vld [vmem:[%s5037_s27 + $0x538] sm:$0xff] }
 0x1ac   : > { %4052 = vmatprep.subr.bf16.mxu1 %v4051_v44  ;;  %v442_v44 = vld [vmem:[%s5037_s27 + $0x2f0] sm:$0xff]  ;;  %v3817_v14 = vpack.c.bf16 %v440_v6, %v432_v5  ;;  %v520_v5 = vld [vmem:[%s5037_s27 + $0x560] sm:$0xff] }
 0x1ad   : > { %1662 = vmatmul.mubr.f32.vlgmr.msra.gmra.mrb[0].mxu0 %v5484_v63  ;;  %v514_v6 = vld [vmem:[%s5037_s27 + $0x530] sm:$0xff] }
 0x1ae   : > { %1946 = vmatmul.mubr.f32.vlgmr.msra.gmra.mrb[0].mxu1 %v5484_v63  ;;  %3798 = vmatpush1.bf16.msra.mxu0 %v3797_v15  ;;  %v403_v63 = vld [vmem:[%s5037_s27 + $0x1b8] sm:$0xff]  ;;  %v4073_v15 = vpack.c.bf16 %v442_v44, %v434_v7  ;;  %v4091_v7 = vpack.c.bf16 %v523_v0, %v515_v39  ;;  %v529_v44 = vld [vmem:[%s5037_s27 + $0x5a8] sm:$0xff] }
 0x1af   : > { %4054 = vmatpush1.bf16.msra.mxu1 %v4053_v16  ;;  %3800 = vmatprep.subr.bf16.mxu0 %v3799_v17  ;;  %v4063_v46 = vpack.c.bf16 %v411_v36, %v403_v63  ;;  %v3819_v16 = vpack.c.bf16 %v457_v11, %v449_v10  ;;  %v448_v17 = vld [vmem:[%s5037_s27 + $0x320] sm:$0xff]  ;;  %v491_v63 = vld [vmem:[%s5037_s27 + $0x478] sm:$0xff]  ;;  %v537_v10 = vld [vmem:[%s5037_s27 + $0x5e8] sm:$0xff] }
 0x1b0   : > { %4056 = vmatprep.subr.bf16.mxu1 %v4055_v21  ;;  %2016 = vmatprep.mubr.f32.mxu0 %v5161_v42  ;;  %v458_v21 = vld [vmem:[%s5037_s27 + $0x370] sm:$0xff]  ;;  %v3821_v25 = vpack.c.bf16 %v456_v18, %v448_v17  ;;  %v4083_v45 = vpack.c.bf16 %v491_v63, %v483_v35  ;;  %v531_v11 = vld [vmem:[%s5037_s27 + $0x5b8] sm:$0xff]  ;;  %v536_v17 = vld [vmem:[%s5037_s27 + $0x5e0] sm:$0xff] }
 0x1b1   : > { %2300 = vmatprep.mubr.f32.mxu1 %v5161_v42  ;;  %v425_v42 = vld [vmem:[%s5037_s27 + $0x268] sm:$0xff]  ;;  %v530_v18 = vld [vmem:[%s5037_s27 + $0x5b0] sm:$0xff]  ;;  %v571_v35 = vld [vmem:[%s5037_s27 + $0x6f8] sm:$0xff] }
 0x1b2   : > { %3802 = vmatpush1.bf16.msra.mxu0 %v3801_v26  ;;  %v3811_v55 = vpack.c.bf16 %v425_v42, %v417_v48  ;;  %v4077_v26 = vpack.c.bf16 %v458_v21, %v450_v19  ;;  %v505_v48 = vld [vmem:[%s5037_s27 + $0x4e8] sm:$0xff]  ;;  %v499_v42 = vld [vmem:[%s5037_s27 + $0x4b8] sm:$0xff]  ;;  %v4095_v19 = vpack.c.bf16 %v539_v12, %v531_v11 }
 0x1b3   : > { %4058 = vmatpush1.bf16.msra.mxu1 %v4057_v27  ;;  %3804 = vmatprep.subr.bf16.mxu0 %v3803_v28  ;;  %v3823_v27 = vpack.c.bf16 %v473_v22, %v465_v51  ;;  %v464_v28 = vld [vmem:[%s5037_s27 + $0x3a0] sm:$0xff]  ;;  %v4087_v58 = vpack.c.bf16 %v507_v50, %v499_v42  ;;  %v545_v21 = vld [vmem:[%s5037_s27 + $0x628] sm:$0xff]  ;;  %v547_v22 = vld [vmem:[%s5037_s27 + $0x638] sm:$0xff] }
 0x1b4   : > { %4060 = vmatprep.subr.bf16.mxu1 %v4059_v32  ;;  %v474_v32 = vld [vmem:[%s5037_s27 + $0x3f0] sm:$0xff]  ;;  %v3825_v36 = vpack.c.bf16 %v472_v29, %v464_v28  ;;  %v553_v51 = vld [vmem:[%s5037_s27 + $0x668] sm:$0xff]  ;;  %v552_v28 = vld [vmem:[%s5037_s27 + $0x660] sm:$0xff] }
 0x1b5   : > { %v546_v29 = vld [vmem:[%s5037_s27 + $0x630] sm:$0xff]  ;;  %v587_v42 = vld [vmem:[%s5037_s27 + $0x778] sm:$0xff] }
 0x1b6   : > { %3806 = vmatpush1.bf16.msra.mxu0 %v3805_v37  ;;  %v4081_v37 = vpack.c.bf16 %v474_v32, %v466_v30  ;;  %v4099_v30 = vpack.c.bf16 %v555_v23, %v547_v22  ;;  %v561_v32 = vld [vmem:[%s5037_s27 + $0x6a8] sm:$0xff]  ;;  %v603_v39 = vld [vmem:[%s5037_s27 + $0x7f8] sm:$0xff] }
 0x1b7   : > { %4062 = vmatpush1.bf16.msra.mxu1 %v4061_v38  ;;  %3808 = vmatprep.subr.bf16.mxu0 %v3807_v40  ;;  %v3827_v38 = vpack.c.bf16 %v489_v34, %v481_v33  ;;  %v480_v40 = vld [vmem:[%s5037_s27 + $0x420] sm:$0xff]  ;;  %v569_v33 = vld [vmem:[%s5037_s27 + $0x6e8] sm:$0xff]  ;;  %v563_v34 = vld [vmem:[%s5037_s27 + $0x6b8] sm:$0xff] }
 0x1b8   : > { %4064 = vmatprep.subr.bf16.mxu1 %v4063_v46  ;;  %v490_v46 = vld [vmem:[%s5037_s27 + $0x470] sm:$0xff]  ;;  %v3829_v52 = vpack.c.bf16 %v488_v41, %v480_v40  ;;  %v568_v40 = vld [vmem:[%s5037_s27 + $0x6e0] sm:$0xff]  ;;  %v619_v11 = vld [vmem:[%s5037_s27 + $0x878] sm:$0xff] }
 0x1b9   : > { %v562_v41 = vld [vmem:[%s5037_s27 + $0x6b0] sm:$0xff]  ;;  %v635_v22 = vld [vmem:[%s5037_s27 + $0x8f8] sm:$0xff] }
 0x1ba   : > { %3810 = vmatpush1.bf16.msra.mxu0 %v3809_v53  ;;  %v4085_v53 = vpack.c.bf16 %v490_v46, %v482_v43  ;;  %v4103_v43 = vpack.c.bf16 %v571_v35, %v563_v34  ;;  %v577_v46 = vld [vmem:[%s5037_s27 + $0x728] sm:$0xff]  ;;  %v643_v34 = vld [vmem:[%s5037_s27 + $0x938] sm:$0xff] }
 0x1bb   : > { %4066 = vmatpush1.bf16.msra.mxu1 %v4065_v54  ;;  %3812 = vmatprep.subr.bf16.mxu0 %v3811_v55  ;;  %v3831_v54 = vpack.c.bf16 %v505_v48, %v497_v47  ;;  %v496_v55 = vld [vmem:[%s5037_s27 + $0x4a0] sm:$0xff]  ;;  %v585_v47 = vld [vmem:[%s5037_s27 + $0x768] sm:$0xff]  ;;  %v579_v48 = vld [vmem:[%s5037_s27 + $0x738] sm:$0xff] }
 0x1bc   : > { %4068 = vmatprep.subr.bf16.mxu1 %v4067_v59  ;;  %v506_v59 = vld [vmem:[%s5037_s27 + $0x4f0] sm:$0xff]  ;;  %v3833_v1 = vpack.c.bf16 %v504_v56, %v496_v55  ;;  %v584_v55 = vld [vmem:[%s5037_s27 + $0x760] sm:$0xff]  ;;  %v651_v35 = vld [vmem:[%s5037_s27 + $0x978] sm:$0xff] }
 0x1bd   : > { %v578_v56 = vld [vmem:[%s5037_s27 + $0x730] sm:$0xff] }
 0x1be   : > { %3814 = vmatpush1.bf16.msra.mxu0 %v3813_v2  ;;  %v4089_v2 = vpack.c.bf16 %v506_v59, %v498_v57  ;;  %v4107_v57 = vpack.c.bf16 %v587_v42, %v579_v48  ;;  %v593_v59 = vld [vmem:[%s5037_s27 + $0x7a8] sm:$0xff]  ;;  %v659_v48 = vld [vmem:[%s5037_s27 + $0x9b8] sm:$0xff] }
 0x1bf   : > { %4070 = vmatpush1.bf16.msra.mxu1 %v4069_v3  ;;  %3816 = vmatprep.subr.bf16.mxu0 %v3815_v4  ;;  %v3835_v3 = vpack.c.bf16 %v521_v62, %v513_v60  ;;  %v512_v4 = vld [vmem:[%s5037_s27 + $0x520] sm:$0xff]  ;;  %v601_v60 = vld [vmem:[%s5037_s27 + $0x7e8] sm:$0xff]  ;;  %v595_v62 = vld [vmem:[%s5037_s27 + $0x7b8] sm:$0xff] }
 0x1c0   : > { %4072 = vmatprep.subr.bf16.mxu1 %v4071_v8  ;;  %v522_v8 = vld [vmem:[%s5037_s27 + $0x570] sm:$0xff]  ;;  %v3837_v13 = vpack.c.bf16 %v520_v5, %v512_v4  ;;  %v600_v4 = vld [vmem:[%s5037_s27 + $0x7e0] sm:$0xff]  ;;  %v667_v42 = vld [vmem:[%s5037_s27 + $0x9f8] sm:$0xff] }
 0x1c1   : > { %v594_v5 = vld [vmem:[%s5037_s27 + $0x7b0] sm:$0xff] }
 0x1c2   : > { %3818 = vmatpush1.bf16.msra.mxu0 %v3817_v14  ;;  %v4093_v14 = vpack.c.bf16 %v522_v8, %v514_v6  ;;  %v4111_v6 = vpack.c.bf16 %v603_v39, %v595_v62  ;;  %v609_v8 = vld [vmem:[%s5037_s27 + $0x828] sm:$0xff]  ;;  %v683_v62 = vld [vmem:[%s5037_s27 + $0xa78] sm:$0xff] }
 0x1c3   : > { %4074 = vmatpush1.bf16.msra.mxu1 %v4073_v15  ;;  %3820 = vmatprep.subr.bf16.mxu0 %v3819_v16  ;;  %v3839_v15 = vpack.c.bf16 %v537_v10, %v529_v44  ;;  %v528_v16 = vld [vmem:[%s5037_s27 + $0x5a0] sm:$0xff]  ;;  %v617_v44 = vld [vmem:[%s5037_s27 + $0x868] sm:$0xff]  ;;  %v611_v10 = vld [vmem:[%s5037_s27 + $0x838] sm:$0xff] }
 0x1c4   : > { %4076 = vmatprep.subr.bf16.mxu1 %v4075_v20  ;;  %v538_v20 = vld [vmem:[%s5037_s27 + $0x5f0] sm:$0xff]  ;;  %v3841_v24 = vpack.c.bf16 %v536_v17, %v528_v16  ;;  %v616_v16 = vld [vmem:[%s5037_s27 + $0x860] sm:$0xff] }
 0x1c5   : > { %v610_v17 = vld [vmem:[%s5037_s27 + $0x830] sm:$0xff] }
 0x1c6   : > { %3822 = vmatpush1.bf16.msra.mxu0 %v3821_v25  ;;  %v4097_v25 = vpack.c.bf16 %v538_v20, %v530_v18  ;;  %v4115_v18 = vpack.c.bf16 %v619_v11, %v611_v10  ;;  %v625_v20 = vld [vmem:[%s5037_s27 + $0x8a8] sm:$0xff]  ;;  %v699_v10 = vld [vmem:[%s5037_s27 + $0xaf8] sm:$0xff] }
 0x1c7   : > { %4078 = vmatpush1.bf16.msra.mxu1 %v4077_v26  ;;  %3824 = vmatprep.subr.bf16.mxu0 %v3823_v27  ;;  %v3843_v26 = vpack.c.bf16 %v553_v51, %v545_v21  ;;  %v544_v27 = vld [vmem:[%s5037_s27 + $0x620] sm:$0xff]  ;;  %v633_v21 = vld [vmem:[%s5037_s27 + $0x8e8] sm:$0xff]  ;;  %v627_v51 = vld [vmem:[%s5037_s27 + $0x8b8] sm:$0xff] }
 0x1c8   : > { %4080 = vmatprep.subr.bf16.mxu1 %v4079_v31  ;;  %v554_v31 = vld [vmem:[%s5037_s27 + $0x670] sm:$0xff]  ;;  %v3845_v63 = vpack.c.bf16 %v552_v28, %v544_v27  ;;  %v632_v27 = vld [vmem:[%s5037_s27 + $0x8e0] sm:$0xff] }
 0x1c9   : > { %v626_v28 = vld [vmem:[%s5037_s27 + $0x8b0] sm:$0xff] }
 0x1ca   : > { %3826 = vmatpush1.bf16.msra.mxu0 %v3825_v36  ;;  %v4101_v36 = vpack.c.bf16 %v554_v31, %v546_v29  ;;  %v4119_v29 = vpack.c.bf16 %v635_v22, %v627_v51  ;;  %v641_v31 = vld [vmem:[%s5037_s27 + $0x928] sm:$0xff]  ;;  %v715_v51 = vld [vmem:[%s5037_s27 + $0xb78] sm:$0xff] }
 0x1cb   : > { %4082 = vmatpush1.bf16.msra.mxu1 %v4081_v37  ;;  %3828 = vmatprep.subr.bf16.mxu0 %v3827_v38  ;;  %v3847_v37 = vpack.c.bf16 %v569_v33, %v561_v32  ;;  %v560_v38 = vld [vmem:[%s5037_s27 + $0x6a0] sm:$0xff]  ;;  %v649_v32 = vld [vmem:[%s5037_s27 + $0x968] sm:$0xff] }
 0x1cc   : > { %4084 = vmatprep.subr.bf16.mxu1 %v4083_v45  ;;  %v570_v45 = vld [vmem:[%s5037_s27 + $0x6f0] sm:$0xff]  ;;  %v3849_v50 = vpack.c.bf16 %v568_v40, %v560_v38  ;;  %v4556_v33 = vld [vmem:[%s5152_s24] sm:$0xff] }
 0x1cd   : > { %v640_v38 = vld [vmem:[%s5037_s27 + $0x920] sm:$0xff] }
 0x1ce   : > { %3830 = vmatpush1.bf16.msra.mxu0 %v3829_v52  ;;  %v4105_v52 = vpack.c.bf16 %v570_v45, %v562_v41  ;;  %v648_v40 = vld [vmem:[%s5037_s27 + $0x960] sm:$0xff]  ;;  %v642_v41 = vld [vmem:[%s5037_s27 + $0x930] sm:$0xff] }
 0x1cf   : > { %4086 = vmatpush1.bf16.msra.mxu1 %v4085_v53  ;;  %3832 = vmatprep.subr.bf16.mxu0 %v3831_v54  ;;  %v3851_v53 = vpack.c.bf16 %v585_v47, %v577_v46  ;;  %v576_v54 = vld [vmem:[%s5037_s27 + $0x720] sm:$0xff]  ;;  %v650_v45 = vld [vmem:[%s5037_s27 + $0x970] sm:$0xff]  ;;  %v657_v46 = vld [vmem:[%s5037_s27 + $0x9a8] sm:$0xff] }
 0x1d0   : > { %4088 = vmatprep.subr.bf16.mxu1 %v4087_v58  ;;  %v586_v58 = vld [vmem:[%s5037_s27 + $0x770] sm:$0xff]  ;;  %v3853_v0 = vpack.c.bf16 %v584_v55, %v576_v54  ;;  %v665_v47 = vld [vmem:[%s5037_s27 + $0x9e8] sm:$0xff]  ;;  %v656_v54 = vld [vmem:[%s5037_s27 + $0x9a0] sm:$0xff] }
 0x1d1   : > { %v664_v55 = vld [vmem:[%s5037_s27 + $0x9e0] sm:$0xff] }
 0x1d2   : > { %3834 = vmatpush1.bf16.msra.mxu0 %v3833_v1  ;;  %v4109_v1 = vpack.c.bf16 %v586_v58, %v578_v56  ;;  %v658_v56 = vld [vmem:[%s5037_s27 + $0x9b0] sm:$0xff]  ;;  %v3873_v39 = vpack.c.bf16 %v664_v55, %v656_v54 }
 0x1d3   : > { %4090 = vmatpush1.bf16.msra.mxu1 %v4089_v2  ;;  %3836 = vmatprep.subr.bf16.mxu0 %v3835_v3  ;;  %v3855_v2 = vpack.c.bf16 %v601_v60, %v593_v59  ;;  %v592_v3 = vld [vmem:[%s5037_s27 + $0x7a0] sm:$0xff]  ;;  %v666_v58 = vld [vmem:[%s5037_s27 + $0x9f0] sm:$0xff]  ;;  %v673_v59 = vld [vmem:[%s5037_s27 + $0xa28] sm:$0xff] }
 0x1d4   : > { %4092 = vmatprep.subr.bf16.mxu1 %v4091_v7  ;;  %v602_v7 = vld [vmem:[%s5037_s27 + $0x7f0] sm:$0xff]  ;;  %v3857_v12 = vpack.c.bf16 %v600_v4, %v592_v3  ;;  %v675_v60 = vld [vmem:[%s5037_s27 + $0xa38] sm:$0xff]  ;;  %v680_v3 = vld [vmem:[%s5037_s27 + $0xa60] sm:$0xff] }
 0x1d5   : > { %v674_v4 = vld [vmem:[%s5037_s27 + $0xa30] sm:$0xff] }
 0x1d6   : > { %3838 = vmatpush1.bf16.msra.mxu0 %v3837_v13  ;;  %v4113_v13 = vpack.c.bf16 %v602_v7, %v594_v5  ;;  %v4131_v5 = vpack.c.bf16 %v683_v62, %v675_v60  ;;  %v689_v7 = vld [vmem:[%s5037_s27 + $0xaa8] sm:$0xff]  ;;  %v738_v54 = vld [vmem:[%s5037_s27 + $0xc30] sm:$0xff] }
 0x1d7   : > { %4094 = vmatpush1.bf16.msra.mxu1 %v4093_v14  ;;  %3840 = vmatprep.subr.bf16.mxu0 %v3839_v15  ;;  %v3859_v14 = vpack.c.bf16 %v617_v44, %v609_v8  ;;  %v608_v15 = vld [vmem:[%s5037_s27 + $0x820] sm:$0xff]  ;;  %v697_v8 = vld [vmem:[%s5037_s27 + $0xae8] sm:$0xff]  ;;  %v691_v44 = vld [vmem:[%s5037_s27 + $0xab8] sm:$0xff] }
 0x1d8   : > { %4096 = vmatprep.subr.bf16.mxu1 %v4095_v19  ;;  %v618_v19 = vld [vmem:[%s5037_s27 + $0x870] sm:$0xff]  ;;  %v3861_v23 = vpack.c.bf16 %v616_v16, %v608_v15  ;;  %v696_v15 = vld [vmem:[%s5037_s27 + $0xae0] sm:$0xff] }
 0x1d9   : > { %v690_v16 = vld [vmem:[%s5037_s27 + $0xab0] sm:$0xff] }
 0x1da   : > { %3842 = vmatpush1.bf16.msra.mxu0 %v3841_v24  ;;  %v4117_v24 = vpack.c.bf16 %v618_v19, %v610_v17  ;;  %v4135_v17 = vpack.c.bf16 %v699_v10, %v691_v44  ;;  %v705_v19 = vld [vmem:[%s5037_s27 + $0xb28] sm:$0xff] }
 0x1db   : > { %4098 = vmatpush1.bf16.msra.mxu1 %v4097_v25  ;;  %3844 = vmatprep.subr.bf16.mxu0 %v3843_v26  ;;  %v3863_v25 = vpack.c.bf16 %v633_v21, %v625_v20  ;;  %v624_v26 = vld [vmem:[%s5037_s27 + $0x8a0] sm:$0xff]  ;;  %v713_v20 = vld [vmem:[%s5037_s27 + $0xb68] sm:$0xff]  ;;  %v707_v21 = vld [vmem:[%s5037_s27 + $0xb38] sm:$0xff] }
 0x1dc   : > { %4100 = vmatprep.subr.bf16.mxu1 %v4099_v30  ;;  %v634_v30 = vld [vmem:[%s5037_s27 + $0x8f0] sm:$0xff] }
 0x1de   : > { %3846 = vmatpush1.bf16.msra.mxu0 %v3845_v63  ;;  %v3865_v63 = vpack.c.bf16 %v632_v27, %v624_v26  ;;  %v712_v26 = vld [vmem:[%s5037_s27 + $0xb60] sm:$0xff]  ;;  %v706_v27 = vld [vmem:[%s5037_s27 + $0xb30] sm:$0xff] }
 0x1df   : > { %4102 = vmatpush1.bf16.msra.mxu1 %v4101_v36  ;;  %3848 = vmatprep.subr.bf16.mxu0 %v3847_v37  ;;  %v4121_v36 = vpack.c.bf16 %v634_v30, %v626_v28  ;;  %v3867_v37 = vpack.c.bf16 %v649_v32, %v641_v31  ;;  %v4139_v28 = vpack.c.bf16 %v715_v51, %v707_v21  ;;  %v721_v30 = vld [vmem:[%s5037_s27 + $0xba8] sm:$0xff]  ;;  %v723_v32 = vld [vmem:[%s5037_s27 + $0xbb8] sm:$0xff] }
 0x1e0   : > { %4104 = vmatprep.subr.bf16.mxu1 %v4103_v43  ;;  %v4123_v43 = vpack.c.bf16 %v651_v35, %v643_v34  ;;  %v729_v31 = vld [vmem:[%s5037_s27 + $0xbe8] sm:$0xff] }
 0x1e2   : > { %3850 = vmatpush1.bf16.msra.mxu0 %v3849_v50  ;;  %v3869_v50 = vpack.c.bf16 %v648_v40, %v640_v38  ;;  %v722_v38 = vld [vmem:[%s5037_s27 + $0xbb0] sm:$0xff] }
 0x1e3   : > { %4106 = vmatpush1.bf16.msra.mxu1 %v4105_v52  ;;  %3852 = vmatprep.subr.bf16.mxu0 %v3851_v53  ;;  %v4125_v52 = vpack.c.bf16 %v650_v45, %v642_v41  ;;  %v3871_v53 = vpack.c.bf16 %v665_v47, %v657_v46  ;;  %v730_v41 = vld [vmem:[%s5037_s27 + $0xbf0] sm:$0xff]  ;;  %v745_v45 = vld [vmem:[%s5037_s27 + $0xc68] sm:$0xff]  ;;  %v739_v46 = vld [vmem:[%s5037_s27 + $0xc38] sm:$0xff] }
 0x1e4   : > { %4108 = vmatprep.subr.bf16.mxu1 %v4107_v57  ;;  %v4127_v57 = vpack.c.bf16 %v667_v42, %v659_v48  ;;  %v747_v47 = vld [vmem:[%s5037_s27 + $0xc78] sm:$0xff]  ;;  %v4145_v42 = vpack.c.bf16 %v730_v41, %v722_v38  ;;  %v810_v38 = vld [vmem:[%s5037_s27 + $0xe70] sm:$0xff]  ;;  %v825_v41 = vld [vmem:[%s5037_s27 + $0xee8] sm:$0xff] }
 0x1e5   : > { %v4147_v55 = vpack.c.bf16 %v747_v47, %v739_v46 }
 0x1e6   : > { %3854 = vmatpush1.bf16.msra.mxu0 %v3853_v0  ;;  %v4129_v0 = vpack.c.bf16 %v666_v58, %v658_v56  ;;  %v746_v56 = vld [vmem:[%s5037_s27 + $0xc70] sm:$0xff]  ;;  %v761_v58 = vld [vmem:[%s5037_s27 + $0xce8] sm:$0xff] }
 0x1e7   : > { %4110 = vmatpush1.bf16.msra.mxu1 %v4109_v1  ;;  %3856 = vmatprep.subr.bf16.mxu0 %v3855_v2  ;;  %v672_v2 = vld [vmem:[%s5037_s27 + $0xa20] sm:$0xff]  ;;  %v4149_v62 = vpack.c.bf16 %v746_v56, %v738_v54  ;;  %v826_v54 = vld [vmem:[%s5037_s27 + $0xef0] sm:$0xff]  ;;  %v841_v56 = vld [vmem:[%s5037_s27 + $0xf68] sm:$0xff] }
 0x1e8   : > { %4112 = vmatprep.subr.bf16.mxu1 %v4111_v6  ;;  %v682_v6 = vld [vmem:[%s5037_s27 + $0xa70] sm:$0xff]  ;;  %v3877_v11 = vpack.c.bf16 %v680_v3, %v672_v2 }
 0x1e9   : > { %v754_v2 = vld [vmem:[%s5037_s27 + $0xcb0] sm:$0xff] }
 0x1ea   : > { %3858 = vmatpush1.bf16.msra.mxu0 %v3857_v12  ;;  %v4133_v12 = vpack.c.bf16 %v682_v6, %v674_v4  ;;  %v762_v4 = vld [vmem:[%s5037_s27 + $0xcf0] sm:$0xff]  ;;  %v777_v6 = vld [vmem:[%s5037_s27 + $0xd68] sm:$0xff] }
 0x1eb   : > { %4114 = vmatpush1.bf16.msra.mxu1 %v4113_v13  ;;  %3860 = vmatprep.subr.bf16.mxu0 %v3859_v14  ;;  %v3879_v13 = vpack.c.bf16 %v697_v8, %v689_v7  ;;  %v688_v14 = vld [vmem:[%s5037_s27 + $0xaa0] sm:$0xff]  ;;  %v771_v7 = vld [vmem:[%s5037_s27 + $0xd38] sm:$0xff]  ;;  %v4153_v10 = vpack.c.bf16 %v762_v4, %v754_v2  ;;  %v842_v2 = vld [vmem:[%s5037_s27 + $0xf70] sm:$0xff] }
 0x1ec   : > { %4116 = vmatprep.subr.bf16.mxu1 %v4115_v18  ;;  %v698_v18 = vld [vmem:[%s5037_s27 + $0xaf0] sm:$0xff]  ;;  %v3881_v22 = vpack.c.bf16 %v696_v15, %v688_v14  ;;  %v779_v8 = vld [vmem:[%s5037_s27 + $0xd78] sm:$0xff]  ;;  %v857_v4 = vld [vmem:[%s5037_s27 + $0xfe8] sm:$0xff] }
 0x1ed   : > { %2017 = vmatmul.mubr.f32.vlgmr.msra.gmra.mrb[2].mxu0 %v4556_v33  ;;  %v770_v14 = vld [vmem:[%s5037_s27 + $0xd30] sm:$0xff]  ;;  %v4155_v15 = vpack.c.bf16 %v779_v8, %v771_v7 }
 0x1ee   : > { %3862 = vmatpush1.bf16.msra.mxu0 %v3861_v23  ;;  %2301 = vmatmul.mubr.f32.vlgmr.msra.gmra.mrb[2].mxu1 %v4556_v33  ;;  %v4137_v23 = vpack.c.bf16 %v698_v18, %v690_v16  ;;  %v731_v33 = vld [vmem:[%s5037_s27 + $0xbf8] sm:$0xff]  ;;  %v778_v16 = vld [vmem:[%s5037_s27 + $0xd70] sm:$0xff]  ;;  %v793_v18 = vld [vmem:[%s5037_s27 + $0xde8] sm:$0xff] }
 0x1ef   : > { %4118 = vmatpush1.bf16.msra.mxu1 %v4117_v24  ;;  %3864 = vmatprep.subr.bf16.mxu0 %v3863_v25  ;;  %v3883_v24 = vpack.c.bf16 %v713_v20, %v705_v19  ;;  %v704_v25 = vld [vmem:[%s5037_s27 + $0xb20] sm:$0xff]  ;;  %v4143_v40 = vpack.c.bf16 %v731_v33, %v723_v32  ;;  %v787_v19 = vld [vmem:[%s5037_s27 + $0xdb8] sm:$0xff]  ;;  %v4157_v51 = vpack.c.bf16 %v778_v16, %v770_v14  ;;  %v858_v14 = vld [vmem:[%s5037_s27 + $0xff0] sm:$0xff] }
 0x1f0   : > { %4120 = vmatprep.subr.bf16.mxu1 %v4119_v29  ;;  %2087 = vmatprep.mubr.f32.mxu0 %v5258_v49  ;;  %v714_v29 = vld [vmem:[%s5037_s27 + $0xb70] sm:$0xff]  ;;  %v3885_v34 = vpack.c.bf16 %v712_v26, %v704_v25  ;;  %v795_v20 = vld [vmem:[%s5037_s27 + $0xdf8] sm:$0xff]  ;;  %v873_v16 = vld [vmem:[%s5037_s27 + $0x1068] sm:$0xff] }
 0x1f1   : > { %2371 = vmatprep.mubr.f32.mxu1 %v5258_v49  ;;  %v681_v49 = vld [vmem:[%s5037_s27 + $0xa68] sm:$0xff]  ;;  %v4141_v35 = vpack.c.bf16 %v714_v29, %v706_v27  ;;  %v786_v25 = vld [vmem:[%s5037_s27 + $0xdb0] sm:$0xff]  ;;  %v4159_v26 = vpack.c.bf16 %v795_v20, %v787_v19 }
 0x1f2   : > { %3866 = vmatpush1.bf16.msra.mxu0 %v3865_v63  ;;  %v3875_v1 = vpack.c.bf16 %v681_v49, %v673_v59  ;;  %v3887_v63 = vpack.c.bf16 %v729_v31, %v721_v30  ;;  %v755_v59 = vld [vmem:[%s5037_s27 + $0xcb8] sm:$0xff]  ;;  %v794_v27 = vld [vmem:[%s5037_s27 + $0xdf0] sm:$0xff]  ;;  %v809_v29 = vld [vmem:[%s5037_s27 + $0xe68] sm:$0xff] }
 0x1f3   : > { %4122 = vmatpush1.bf16.msra.mxu1 %v4121_v36  ;;  %3868 = vmatprep.subr.bf16.mxu0 %v3867_v37  ;;  %v720_v36 = vld [vmem:[%s5037_s27 + $0xba0] sm:$0xff]  ;;  %v763_v49 = vld [vmem:[%s5037_s27 + $0xcf8] sm:$0xff]  ;;  %v4161_v33 = vpack.c.bf16 %v794_v27, %v786_v25  ;;  %v874_v25 = vld [vmem:[%s5037_s27 + $0x1070] sm:$0xff] }
 0x1f4   : > { %4124 = vmatprep.subr.bf16.mxu1 %v4123_v43  ;;  %v728_v37 = vld [vmem:[%s5037_s27 + $0xbe0] sm:$0xff]  ;;  %v737_v43 = vld [vmem:[%s5037_s27 + $0xc28] sm:$0xff]  ;;  %v4151_v3 = vpack.c.bf16 %v763_v49, %v755_v59  ;;  %v803_v30 = vld [vmem:[%s5037_s27 + $0xe38] sm:$0xff] }
 0x1f5   : > { %v3889_v48 = vpack.c.bf16 %v728_v37, %v720_v36  ;;  %v811_v31 = vld [vmem:[%s5037_s27 + $0xe78] sm:$0xff]  ;;  %v802_v36 = vld [vmem:[%s5037_s27 + $0xe30] sm:$0xff]  ;;  %v889_v27 = vld [vmem:[%s5037_s27 + $0x10e8] sm:$0xff] }
 0x1f6   : > { %3870 = vmatpush1.bf16.msra.mxu0 %v3869_v50  ;;  %v3891_v50 = vpack.c.bf16 %v745_v45, %v737_v43  ;;  %v4163_v37 = vpack.c.bf16 %v811_v31, %v803_v30  ;;  %v819_v43 = vld [vmem:[%s5037_s27 + $0xeb8] sm:$0xff]  ;;  %v4165_v47 = vpack.c.bf16 %v810_v38, %v802_v36  ;;  %v890_v36 = vld [vmem:[%s5037_s27 + $0x10f0] sm:$0xff]  ;;  %v905_v38 = vld [vmem:[%s5037_s27 + $0x1168] sm:$0xff] }
 0x1f7   : > { %4126 = vmatpush1.bf16.msra.mxu1 %v4125_v52  ;;  %3872 = vmatprep.subr.bf16.mxu0 %v3871_v53  ;;  %v736_v52 = vld [vmem:[%s5037_s27 + $0xc20] sm:$0xff]  ;;  %v827_v45 = vld [vmem:[%s5037_s27 + $0xef8] sm:$0xff] }
 0x1f8   : > { %4128 = vmatprep.subr.bf16.mxu1 %v4127_v57  ;;  %v744_v53 = vld [vmem:[%s5037_s27 + $0xc60] sm:$0xff]  ;;  %v753_v57 = vld [vmem:[%s5037_s27 + $0xca8] sm:$0xff] }
 0x1f9   : > { %v3893_v60 = vpack.c.bf16 %v744_v53, %v736_v52  ;;  %v818_v52 = vld [vmem:[%s5037_s27 + $0xeb0] sm:$0xff]  ;;  %v4167_v53 = vpack.c.bf16 %v827_v45, %v819_v43  ;;  %v907_v43 = vld [vmem:[%s5037_s27 + $0x1178] sm:$0xff] }
 0x1fa   : > { %3874 = vmatpush1.bf16.msra.mxu0 %v3873_v39  ;;  %v3895_v39 = vpack.c.bf16 %v761_v58, %v753_v57  ;;  %v835_v57 = vld [vmem:[%s5037_s27 + $0xf38] sm:$0xff]  ;;  %v4169_v49 = vpack.c.bf16 %v826_v54, %v818_v52  ;;  %v913_v54 = vld [vmem:[%s5037_s27 + $0x11a8] sm:$0xff] }
 0x1fb   : > { %4130 = vmatpush1.bf16.msra.mxu1 %v4129_v0  ;;  %3876 = vmatprep.subr.bf16.mxu0 %v3875_v1  ;;  %v752_v0 = vld [vmem:[%s5037_s27 + $0xca0] sm:$0xff]  ;;  %v843_v58 = vld [vmem:[%s5037_s27 + $0xf78] sm:$0xff] }
 0x1fc   : > { %4132 = vmatprep.subr.bf16.mxu1 %v4131_v5  ;;  %v760_v1 = vld [vmem:[%s5037_s27 + $0xce0] sm:$0xff]  ;;  %v769_v5 = vld [vmem:[%s5037_s27 + $0xd28] sm:$0xff] }
 0x1fd   : > { %v3897_v44 = vpack.c.bf16 %v760_v1, %v752_v0  ;;  %v834_v0 = vld [vmem:[%s5037_s27 + $0xf30] sm:$0xff]  ;;  %v4171_v1 = vpack.c.bf16 %v843_v58, %v835_v57  ;;  %v923_v57 = vld [vmem:[%s5037_s27 + $0x11f8] sm:$0xff] }
 0x1fe   : > { %3878 = vmatpush1.bf16.msra.mxu0 %v3877_v11  ;;  %v3899_v11 = vpack.c.bf16 %v777_v6, %v769_v5  ;;  %v851_v5 = vld [vmem:[%s5037_s27 + $0xfb8] sm:$0xff]  ;;  %v4173_v8 = vpack.c.bf16 %v842_v2, %v834_v0  ;;  %v929_v2 = vld [vmem:[%s5037_s27 + $0x1228] sm:$0xff] }
 0x1ff   : > { %4134 = vmatpush1.bf16.msra.mxu1 %v4133_v12  ;;  %3880 = vmatprep.subr.bf16.mxu0 %v3879_v13  ;;  %v768_v12 = vld [vmem:[%s5037_s27 + $0xd20] sm:$0xff]  ;;  %v859_v6 = vld [vmem:[%s5037_s27 + $0xff8] sm:$0xff] }
 0x200   : > { %4136 = vmatprep.subr.bf16.mxu1 %v4135_v17  ;;  %v776_v13 = vld [vmem:[%s5037_s27 + $0xd60] sm:$0xff]  ;;  %v785_v17 = vld [vmem:[%s5037_s27 + $0xda8] sm:$0xff] }
 0x201   : > { %v3901_v21 = vpack.c.bf16 %v776_v13, %v768_v12  ;;  %v850_v12 = vld [vmem:[%s5037_s27 + $0xfb0] sm:$0xff]  ;;  %v4175_v13 = vpack.c.bf16 %v859_v6, %v851_v5 }
 0x202   : > { %3882 = vmatpush1.bf16.msra.mxu0 %v3881_v22  ;;  %v3903_v22 = vpack.c.bf16 %v793_v18, %v785_v17  ;;  %v867_v17 = vld [vmem:[%s5037_s27 + $0x1038] sm:$0xff]  ;;  %v4177_v20 = vpack.c.bf16 %v858_v14, %v850_v12  ;;  %v938_v12 = vld [vmem:[%s5037_s27 + $0x1270] sm:$0xff]  ;;  %v953_v14 = vld [vmem:[%s5037_s27 + $0x12e8] sm:$0xff] }
 0x203   : > { %4138 = vmatpush1.bf16.msra.mxu1 %v4137_v23  ;;  %3884 = vmatprep.subr.bf16.mxu0 %v3883_v24  ;;  %v784_v23 = vld [vmem:[%s5037_s27 + $0xda0] sm:$0xff]  ;;  %v875_v18 = vld [vmem:[%s5037_s27 + $0x1078] sm:$0xff] }
 0x204   : > { %4140 = vmatprep.subr.bf16.mxu1 %v4139_v28  ;;  %v792_v24 = vld [vmem:[%s5037_s27 + $0xde0] sm:$0xff]  ;;  %v801_v28 = vld [vmem:[%s5037_s27 + $0xe28] sm:$0xff] }
 0x205   : > { %v3905_v32 = vpack.c.bf16 %v792_v24, %v784_v23  ;;  %v866_v23 = vld [vmem:[%s5037_s27 + $0x1030] sm:$0xff]  ;;  %v4179_v24 = vpack.c.bf16 %v875_v18, %v867_v17 }
 0x206   : > { %3886 = vmatpush1.bf16.msra.mxu0 %v3885_v34  ;;  %v3907_v34 = vpack.c.bf16 %v809_v29, %v801_v28  ;;  %v883_v28 = vld [vmem:[%s5037_s27 + $0x10b8] sm:$0xff]  ;;  %v4181_v31 = vpack.c.bf16 %v874_v25, %v866_v23  ;;  %v954_v23 = vld [vmem:[%s5037_s27 + $0x12f0] sm:$0xff]  ;;  %v969_v25 = vld [vmem:[%s5037_s27 + $0x1368] sm:$0xff] }
 0x207   : > { %4142 = vmatpush1.bf16.msra.mxu1 %v4141_v35  ;;  %3888 = vmatprep.subr.bf16.mxu0 %v3887_v63  ;;  %v800_v35 = vld [vmem:[%s5037_s27 + $0xe20] sm:$0xff]  ;;  %v891_v29 = vld [vmem:[%s5037_s27 + $0x10f8] sm:$0xff] }
 0x208   : > { %4144 = vmatprep.subr.bf16.mxu1 %v4143_v40  ;;  %v808_v63 = vld [vmem:[%s5037_s27 + $0xe60] sm:$0xff]  ;;  %v817_v40 = vld [vmem:[%s5037_s27 + $0xea8] sm:$0xff] }
 0x209   : > { %v3909_v46 = vpack.c.bf16 %v808_v63, %v800_v35  ;;  %v882_v35 = vld [vmem:[%s5037_s27 + $0x10b0] sm:$0xff]  ;;  %v4183_v63 = vpack.c.bf16 %v891_v29, %v883_v28 }
 0x20a   : > { %3890 = vmatpush1.bf16.msra.mxu0 %v3889_v48  ;;  %v3911_v48 = vpack.c.bf16 %v825_v41, %v817_v40  ;;  %v4557_v40 = vld [vmem:[%s5152_s24 + $0x8] sm:$0xff]  ;;  %v899_v41 = vld [vmem:[%s5037_s27 + $0x1138] sm:$0xff] }
 0x20b   : > { %4146 = vmatpush1.bf16.msra.mxu1 %v4145_v42  ;;  %3892 = vmatprep.subr.bf16.mxu0 %v3891_v50  ;;  %v816_v42 = vld [vmem:[%s5037_s27 + $0xea0] sm:$0xff]  ;;  %v4187_v52 = vpack.c.bf16 %v907_v43, %v899_v41 }
 0x20c   : > { %4148 = vmatprep.subr.bf16.mxu1 %v4147_v55  ;;  %v824_v50 = vld [vmem:[%s5037_s27 + $0xee0] sm:$0xff]  ;;  %v833_v55 = vld [vmem:[%s5037_s27 + $0xf28] sm:$0xff] }
 0x20d   : > { %v3913_v59 = vpack.c.bf16 %v824_v50, %v816_v42  ;;  %v904_v42 = vld [vmem:[%s5037_s27 + $0x1160] sm:$0xff]  ;;  %v898_v50 = vld [vmem:[%s5037_s27 + $0x1130] sm:$0xff] }
 0x20e   : > { %3894 = vmatpush1.bf16.msra.mxu0 %v3893_v60  ;;  %v3915_v60 = vpack.c.bf16 %v841_v56, %v833_v55  ;;  %v921_v55 = vld [vmem:[%s5037_s27 + $0x11e8] sm:$0xff]  ;;  %v915_v56 = vld [vmem:[%s5037_s27 + $0x11b8] sm:$0xff] }
 0x20f   : > { %4150 = vmatpush1.bf16.msra.mxu1 %v4149_v62  ;;  %3896 = vmatprep.subr.bf16.mxu0 %v3895_v39  ;;  %v832_v62 = vld [vmem:[%s5037_s27 + $0xf20] sm:$0xff]  ;;  %v4191_v0 = vpack.c.bf16 %v923_v57, %v915_v56 }
 0x210   : > { %4152 = vmatprep.subr.bf16.mxu1 %v4151_v3  ;;  %v840_v39 = vld [vmem:[%s5037_s27 + $0xf60] sm:$0xff]  ;;  %v849_v3 = vld [vmem:[%s5037_s27 + $0xfa8] sm:$0xff] }
 0x211   : > { %v3917_v7 = vpack.c.bf16 %v840_v39, %v832_v62  ;;  %v920_v62 = vld [vmem:[%s5037_s27 + $0x11e0] sm:$0xff]  ;;  %v914_v39 = vld [vmem:[%s5037_s27 + $0x11b0] sm:$0xff] }
 0x212   : > { %3898 = vmatpush1.bf16.msra.mxu0 %v3897_v44  ;;  %v3919_v44 = vpack.c.bf16 %v857_v4, %v849_v3  ;;  %v931_v3 = vld [vmem:[%s5037_s27 + $0x1238] sm:$0xff] }
 0x213   : > { %4154 = vmatpush1.bf16.msra.mxu1 %v4153_v10  ;;  %3900 = vmatprep.subr.bf16.mxu0 %v3899_v11  ;;  %v848_v10 = vld [vmem:[%s5037_s27 + $0xfa0] sm:$0xff]  ;;  %v939_v4 = vld [vmem:[%s5037_s27 + $0x1278] sm:$0xff] }
 0x214   : > { %4156 = vmatprep.subr.bf16.mxu1 %v4155_v15  ;;  %v856_v11 = vld [vmem:[%s5037_s27 + $0xfe0] sm:$0xff]  ;;  %v865_v15 = vld [vmem:[%s5037_s27 + $0x1028] sm:$0xff] }
 0x215   : > { %v3921_v19 = vpack.c.bf16 %v856_v11, %v848_v10  ;;  %v930_v10 = vld [vmem:[%s5037_s27 + $0x1230] sm:$0xff]  ;;  %v4195_v11 = vpack.c.bf16 %v939_v4, %v931_v3 }
 0x216   : > { %3902 = vmatpush1.bf16.msra.mxu0 %v3901_v21  ;;  %v3923_v21 = vpack.c.bf16 %v873_v16, %v865_v15  ;;  %v947_v15 = vld [vmem:[%s5037_s27 + $0x12b8] sm:$0xff]  ;;  %v4197_v18 = vpack.c.bf16 %v938_v12, %v930_v10  ;;  %v1025_v10 = vld [vmem:[%s5037_s27 + $0x1528] sm:$0xff] }
 0x217   : > { %4158 = vmatpush1.bf16.msra.mxu1 %v4157_v51  ;;  %3904 = vmatprep.subr.bf16.mxu0 %v3903_v22  ;;  %v864_v51 = vld [vmem:[%s5037_s27 + $0x1020] sm:$0xff]  ;;  %v955_v16 = vld [vmem:[%s5037_s27 + $0x12f8] sm:$0xff] }
 0x218   : > { %4160 = vmatprep.subr.bf16.mxu1 %v4159_v26  ;;  %v872_v22 = vld [vmem:[%s5037_s27 + $0x1060] sm:$0xff]  ;;  %v881_v26 = vld [vmem:[%s5037_s27 + $0x10a8] sm:$0xff]  ;;  %v1027_v12 = vld [vmem:[%s5037_s27 + $0x1538] sm:$0xff] }
 0x219   : > { %v3925_v30 = vpack.c.bf16 %v872_v22, %v864_v51  ;;  %v946_v51 = vld [vmem:[%s5037_s27 + $0x12b0] sm:$0xff]  ;;  %v4199_v22 = vpack.c.bf16 %v955_v16, %v947_v15 }
 0x21a   : > { %3906 = vmatpush1.bf16.msra.mxu0 %v3905_v32  ;;  %v3927_v32 = vpack.c.bf16 %v889_v27, %v881_v26  ;;  %v963_v26 = vld [vmem:[%s5037_s27 + $0x1338] sm:$0xff]  ;;  %v4201_v29 = vpack.c.bf16 %v954_v23, %v946_v51  ;;  %v1041_v51 = vld [vmem:[%s5037_s27 + $0x15a8] sm:$0xff] }
 0x21b   : > { %4162 = vmatpush1.bf16.msra.mxu1 %v4161_v33  ;;  %3908 = vmatprep.subr.bf16.mxu0 %v3907_v34  ;;  %v880_v33 = vld [vmem:[%s5037_s27 + $0x10a0] sm:$0xff]  ;;  %v971_v27 = vld [vmem:[%s5037_s27 + $0x1378] sm:$0xff] }
 0x21c   : > { %4164 = vmatprep.subr.bf16.mxu1 %v4163_v37  ;;  %v888_v34 = vld [vmem:[%s5037_s27 + $0x10e0] sm:$0xff]  ;;  %v897_v37 = vld [vmem:[%s5037_s27 + $0x1128] sm:$0xff]  ;;  %v1043_v23 = vld [vmem:[%s5037_s27 + $0x15b8] sm:$0xff] }
 0x21d   : > { %v3929_v45 = vpack.c.bf16 %v888_v34, %v880_v33  ;;  %v962_v33 = vld [vmem:[%s5037_s27 + $0x1330] sm:$0xff]  ;;  %v4203_v34 = vpack.c.bf16 %v971_v27, %v963_v26 }
 0x21e   : > { %3910 = vmatpush1.bf16.msra.mxu0 %v3909_v46  ;;  %v4185_v46 = vpack.c.bf16 %v890_v36, %v882_v35  ;;  %v970_v35 = vld [vmem:[%s5037_s27 + $0x1370] sm:$0xff]  ;;  %v985_v36 = vld [vmem:[%s5037_s27 + $0x13e8] sm:$0xff] }
 0x21f   : > { %4166 = vmatpush1.bf16.msra.mxu1 %v4165_v47  ;;  %3912 = vmatprep.subr.bf16.mxu0 %v3911_v48  ;;  %v3931_v47 = vpack.c.bf16 %v905_v38, %v897_v37  ;;  %v896_v48 = vld [vmem:[%s5037_s27 + $0x1120] sm:$0xff]  ;;  %v979_v37 = vld [vmem:[%s5037_s27 + $0x13b8] sm:$0xff]  ;;  %v4205_v41 = vpack.c.bf16 %v970_v35, %v962_v33  ;;  %v1057_v33 = vld [vmem:[%s5037_s27 + $0x1628] sm:$0xff] }
 0x220   : > { %4168 = vmatprep.subr.bf16.mxu1 %v4167_v53  ;;  %v906_v53 = vld [vmem:[%s5037_s27 + $0x1170] sm:$0xff]  ;;  %v3933_v58 = vpack.c.bf16 %v904_v42, %v896_v48  ;;  %v987_v38 = vld [vmem:[%s5037_s27 + $0x13f8] sm:$0xff] }
 0x221   : > { %v4207_v48 = vpack.c.bf16 %v987_v38, %v979_v37  ;;  %v986_v42 = vld [vmem:[%s5037_s27 + $0x13f0] sm:$0xff]  ;;  %v1059_v35 = vld [vmem:[%s5037_s27 + $0x1638] sm:$0xff] }
 0x222   : > { %3914 = vmatpush1.bf16.msra.mxu0 %v3913_v59  ;;  %v4189_v59 = vpack.c.bf16 %v906_v53, %v898_v50  ;;  %v993_v50 = vld [vmem:[%s5037_s27 + $0x1428] sm:$0xff]  ;;  %v995_v53 = vld [vmem:[%s5037_s27 + $0x1438] sm:$0xff] }
 0x223   : > { %4170 = vmatpush1.bf16.msra.mxu1 %v4169_v49  ;;  %3916 = vmatprep.subr.bf16.mxu0 %v3915_v60  ;;  %v3935_v49 = vpack.c.bf16 %v921_v55, %v913_v54  ;;  %v912_v60 = vld [vmem:[%s5037_s27 + $0x11a0] sm:$0xff]  ;;  %v1003_v54 = vld [vmem:[%s5037_s27 + $0x1478] sm:$0xff] }
 0x224   : > { %4172 = vmatprep.subr.bf16.mxu1 %v4171_v1  ;;  %v922_v1 = vld [vmem:[%s5037_s27 + $0x11f0] sm:$0xff]  ;;  %v3937_v5 = vpack.c.bf16 %v920_v62, %v912_v60  ;;  %v4211_v60 = vpack.c.bf16 %v1003_v54, %v995_v53 }
 0x225   : > { %v4193_v6 = vpack.c.bf16 %v922_v1, %v914_v39  ;;  %v1002_v62 = vld [vmem:[%s5037_s27 + $0x1470] sm:$0xff]  ;;  %v1009_v39 = vld [vmem:[%s5037_s27 + $0x14a8] sm:$0xff]  ;;  %v1011_v1 = vld [vmem:[%s5037_s27 + $0x14b8] sm:$0xff] }
 0x226   : > { %3918 = vmatpush1.bf16.msra.mxu0 %v3917_v7 }
 0x227   : > { %4174 = vmatpush1.bf16.msra.mxu1 %v4173_v8  ;;  %3920 = vmatprep.subr.bf16.mxu0 %v3919_v44  ;;  %v928_v8 = vld [vmem:[%s5037_s27 + $0x1220] sm:$0xff] }
 0x228   : > { %4176 = vmatprep.subr.bf16.mxu1 %v4175_v13  ;;  %v936_v44 = vld [vmem:[%s5037_s27 + $0x1260] sm:$0xff]  ;;  %v945_v13 = vld [vmem:[%s5037_s27 + $0x12a8] sm:$0xff] }
 0x229   : > { %v3941_v17 = vpack.c.bf16 %v936_v44, %v928_v8  ;;  %v1018_v44 = vld [vmem:[%s5037_s27 + $0x14f0] sm:$0xff] }
 0x22a   : > { %3922 = vmatpush1.bf16.msra.mxu0 %v3921_v19  ;;  %v3943_v19 = vpack.c.bf16 %v953_v14, %v945_v13  ;;  %v1035_v13 = vld [vmem:[%s5037_s27 + $0x1578] sm:$0xff] }
 0x22b   : > { %4178 = vmatpush1.bf16.msra.mxu1 %v4177_v20  ;;  %3924 = vmatprep.subr.bf16.mxu0 %v3923_v21  ;;  %v944_v20 = vld [vmem:[%s5037_s27 + $0x12a0] sm:$0xff] }
 0x22c   : > { %4180 = vmatprep.subr.bf16.mxu1 %v4179_v24  ;;  %v952_v21 = vld [vmem:[%s5037_s27 + $0x12e0] sm:$0xff]  ;;  %v961_v24 = vld [vmem:[%s5037_s27 + $0x1328] sm:$0xff] }
 0x22d   : > { %2088 = vmatmul.mubr.f32.vlgmr.msra.gmra.mrb[2].mxu0 %v4557_v40  ;;  %v3945_v28 = vpack.c.bf16 %v952_v21, %v944_v20  ;;  %v4219_v20 = vpack.c.bf16 %v1035_v13, %v1027_v12  ;;  %v1034_v21 = vld [vmem:[%s5037_s27 + $0x1570] sm:$0xff] }
 0x22e   : > { %3926 = vmatpush1.bf16.msra.mxu0 %v3925_v30  ;;  %2372 = vmatmul.mubr.f32.vlgmr.msra.gmra.mrb[2].mxu1 %v4557_v40  ;;  %v3947_v30 = vpack.c.bf16 %v969_v25, %v961_v24  ;;  %v1051_v24 = vld [vmem:[%s5037_s27 + $0x15f8] sm:$0xff] }
 0x22f   : > { %4182 = vmatpush1.bf16.msra.mxu1 %v4181_v31  ;;  %3928 = vmatprep.subr.bf16.mxu0 %v3927_v32  ;;  %v960_v31 = vld [vmem:[%s5037_s27 + $0x1320] sm:$0xff] }
 0x230   : > { %4184 = vmatprep.subr.bf16.mxu1 %v4183_v63  ;;  %2158 = vmatprep.mubr.f32.mxu0 %v5355_v61  ;;  %v968_v32 = vld [vmem:[%s5037_s27 + $0x1360] sm:$0xff]  ;;  %v977_v63 = vld [vmem:[%s5037_s27 + $0x13a8] sm:$0xff] }
 0x231   : > { %2442 = vmatprep.mubr.f32.mxu1 %v5355_v61  ;;  %v937_v61 = vld [vmem:[%s5037_s27 + $0x1268] sm:$0xff]  ;;  %v3949_v40 = vpack.c.bf16 %v968_v32, %v960_v31  ;;  %v3951_v43 = vpack.c.bf16 %v985_v36, %v977_v63  ;;  %v4223_v31 = vpack.c.bf16 %v1051_v24, %v1043_v23  ;;  %v1050_v32 = vld [vmem:[%s5037_s27 + $0x15f0] sm:$0xff]  ;;  %v1067_v63 = vld [vmem:[%s5037_s27 + $0x1678] sm:$0xff] }
 0x232   : > { %3930 = vmatpush1.bf16.msra.mxu0 %v3929_v45  ;;  %v3939_v7 = vpack.c.bf16 %v937_v61, %v929_v2  ;;  %v976_v45 = vld [vmem:[%s5037_s27 + $0x13a0] sm:$0xff]  ;;  %v1019_v2 = vld [vmem:[%s5037_s27 + $0x14f8] sm:$0xff] }
 0x233   : > { %4186 = vmatpush1.bf16.msra.mxu1 %v4185_v46  ;;  %3932 = vmatprep.subr.bf16.mxu0 %v3931_v47  ;;  %v984_v46 = vld [vmem:[%s5037_s27 + $0x13e0] sm:$0xff]  ;;  %v978_v47 = vld [vmem:[%s5037_s27 + $0x13b0] sm:$0xff]  ;;  %v4215_v8 = vpack.c.bf16 %v1019_v2, %v1011_v1 }
 0x234   : > { %4188 = vmatprep.subr.bf16.mxu1 %v4187_v52  ;;  %v1001_v52 = vld [vmem:[%s5037_s27 + $0x1468] sm:$0xff]  ;;  %v3953_v55 = vpack.c.bf16 %v984_v46, %v976_v45  ;;  %v4209_v56 = vpack.c.bf16 %v986_v42, %v978_v47  ;;  %v4227_v45 = vpack.c.bf16 %v1067_v63, %v1059_v35  ;;  %v1066_v46 = vld [vmem:[%s5037_s27 + $0x1670] sm:$0xff]  ;;  %v1075_v42 = vld [vmem:[%s5037_s27 + $0x16b8] sm:$0xff] }
 0x235   : > { %v3955_v57 = vpack.c.bf16 %v1001_v52, %v993_v50  ;;  %v1073_v47 = vld [vmem:[%s5037_s27 + $0x16a8] sm:$0xff]  ;;  %v1083_v50 = vld [vmem:[%s5037_s27 + $0x16f8] sm:$0xff] }
 0x236   : > { %3934 = vmatpush1.bf16.msra.mxu0 %v3933_v58  ;;  %v992_v58 = vld [vmem:[%s5037_s27 + $0x1420] sm:$0xff] }
 0x237   : > { %4190 = vmatpush1.bf16.msra.mxu1 %v4189_v59  ;;  %3936 = vmatprep.subr.bf16.mxu0 %v3935_v49  ;;  %v1000_v59 = vld [vmem:[%s5037_s27 + $0x1460] sm:$0xff]  ;;  %v994_v49 = vld [vmem:[%s5037_s27 + $0x1430] sm:$0xff] }
 0x238   : > { %4192 = vmatprep.subr.bf16.mxu1 %v4191_v0  ;;  %v1017_v0 = vld [vmem:[%s5037_s27 + $0x14e8] sm:$0xff]  ;;  %v3957_v61 = vpack.c.bf16 %v1000_v59, %v992_v58  ;;  %v4213_v3 = vpack.c.bf16 %v1002_v62, %v994_v49  ;;  %v4231_v58 = vpack.c.bf16 %v1083_v50, %v1075_v42  ;;  %v1082_v59 = vld [vmem:[%s5037_s27 + $0x16f0] sm:$0xff]  ;;  %v1091_v62 = vld [vmem:[%s5037_s27 + $0x1738] sm:$0xff] }
 0x239   : > { %v3959_v4 = vpack.c.bf16 %v1017_v0, %v1009_v39  ;;  %v1089_v49 = vld [vmem:[%s5037_s27 + $0x1728] sm:$0xff]  ;;  %v1099_v39 = vld [vmem:[%s5037_s27 + $0x1778] sm:$0xff] }
 0x23a   : > { %3938 = vmatpush1.bf16.msra.mxu0 %v3937_v5  ;;  %v1008_v5 = vld [vmem:[%s5037_s27 + $0x14a0] sm:$0xff] }
 0x23b   : > { %4194 = vmatpush1.bf16.msra.mxu1 %v4193_v6  ;;  %3940 = vmatprep.subr.bf16.mxu0 %v3939_v7  ;;  %v1016_v6 = vld [vmem:[%s5037_s27 + $0x14e0] sm:$0xff]  ;;  %v1010_v7 = vld [vmem:[%s5037_s27 + $0x14b0] sm:$0xff] }
 0x23c   : > { %4196 = vmatprep.subr.bf16.mxu1 %v4195_v11  ;;  %v1033_v11 = vld [vmem:[%s5037_s27 + $0x1568] sm:$0xff]  ;;  %v3961_v14 = vpack.c.bf16 %v1016_v6, %v1008_v5  ;;  %v4217_v15 = vpack.c.bf16 %v1018_v44, %v1010_v7  ;;  %v4235_v5 = vpack.c.bf16 %v1099_v39, %v1091_v62  ;;  %v1098_v6 = vld [vmem:[%s5037_s27 + $0x1770] sm:$0xff]  ;;  %v1107_v44 = vld [vmem:[%s5037_s27 + $0x17b8] sm:$0xff] }
 0x23d   : > { %v3963_v16 = vpack.c.bf16 %v1033_v11, %v1025_v10  ;;  %v1105_v7 = vld [vmem:[%s5037_s27 + $0x17a8] sm:$0xff]  ;;  %v1115_v10 = vld [vmem:[%s5037_s27 + $0x17f8] sm:$0xff] }
 0x23e   : > { %3942 = vmatpush1.bf16.msra.mxu0 %v3941_v17  ;;  %v1024_v17 = vld [vmem:[%s5037_s27 + $0x1520] sm:$0xff] }
 0x23f   : > { %4198 = vmatpush1.bf16.msra.mxu1 %v4197_v18  ;;  %3944 = vmatprep.subr.bf16.mxu0 %v3943_v19  ;;  %v1032_v18 = vld [vmem:[%s5037_s27 + $0x1560] sm:$0xff]  ;;  %v1026_v19 = vld [vmem:[%s5037_s27 + $0x1530] sm:$0xff] }
 0x240   : > { %4200 = vmatprep.subr.bf16.mxu1 %v4199_v22  ;;  %v1049_v22 = vld [vmem:[%s5037_s27 + $0x15e8] sm:$0xff]  ;;  %v3965_v25 = vpack.c.bf16 %v1032_v18, %v1024_v17  ;;  %v4221_v26 = vpack.c.bf16 %v1034_v21, %v1026_v19  ;;  %v4239_v17 = vpack.c.bf16 %v1115_v10, %v1107_v44  ;;  %v1114_v18 = vld [vmem:[%s5037_s27 + $0x17f0] sm:$0xff]  ;;  %v1123_v21 = vld [vmem:[%s5037_s27 + $0x1838] sm:$0xff] }
 0x241   : > { %v3967_v27 = vpack.c.bf16 %v1049_v22, %v1041_v51  ;;  %v1121_v19 = vld [vmem:[%s5037_s27 + $0x1828] sm:$0xff]  ;;  %v1131_v51 = vld [vmem:[%s5037_s27 + $0x1878] sm:$0xff] }
 0x242   : > { %3946 = vmatpush1.bf16.msra.mxu0 %v3945_v28  ;;  %v1040_v28 = vld [vmem:[%s5037_s27 + $0x15a0] sm:$0xff] }
 0x243   : > { %4202 = vmatpush1.bf16.msra.mxu1 %v4201_v29  ;;  %3948 = vmatprep.subr.bf16.mxu0 %v3947_v30  ;;  %v1048_v29 = vld [vmem:[%s5037_s27 + $0x15e0] sm:$0xff]  ;;  %v1042_v30 = vld [vmem:[%s5037_s27 + $0x15b0] sm:$0xff] }
 0x244   : > { %4204 = vmatprep.subr.bf16.mxu1 %v4203_v34  ;;  %v1065_v34 = vld [vmem:[%s5037_s27 + $0x1668] sm:$0xff]  ;;  %v3969_v36 = vpack.c.bf16 %v1048_v29, %v1040_v28  ;;  %v4225_v37 = vpack.c.bf16 %v1050_v32, %v1042_v30  ;;  %v4243_v28 = vpack.c.bf16 %v1131_v51, %v1123_v21  ;;  %v1130_v29 = vld [vmem:[%s5037_s27 + $0x1870] sm:$0xff]  ;;  %v1139_v32 = vld [vmem:[%s5037_s27 + $0x18b8] sm:$0xff] }
 0x245   : > { %v3971_v38 = vpack.c.bf16 %v1065_v34, %v1057_v33  ;;  %v1137_v30 = vld [vmem:[%s5037_s27 + $0x18a8] sm:$0xff]  ;;  %v1147_v33 = vld [vmem:[%s5037_s27 + $0x18f8] sm:$0xff] }
 0x246   : > { %3950 = vmatpush1.bf16.msra.mxu0 %v3949_v40  ;;  %v1056_v40 = vld [vmem:[%s5037_s27 + $0x1620] sm:$0xff] }
 0x247   : > { %4206 = vmatpush1.bf16.msra.mxu1 %v4205_v41  ;;  %3952 = vmatprep.subr.bf16.mxu0 %v3951_v43  ;;  %v1064_v41 = vld [vmem:[%s5037_s27 + $0x1660] sm:$0xff]  ;;  %v1058_v43 = vld [vmem:[%s5037_s27 + $0x1630] sm:$0xff] }
 0x248   : > { %4208 = vmatprep.subr.bf16.mxu1 %v4207_v48  ;;  %v1081_v48 = vld [vmem:[%s5037_s27 + $0x16e8] sm:$0xff]  ;;  %v3973_v52 = vpack.c.bf16 %v1064_v41, %v1056_v40  ;;  %v4229_v53 = vpack.c.bf16 %v1066_v46, %v1058_v43  ;;  %v4247_v40 = vpack.c.bf16 %v1147_v33, %v1139_v32  ;;  %v1146_v41 = vld [vmem:[%s5037_s27 + $0x18f0] sm:$0xff] }
 0x249   : > { %v3975_v54 = vpack.c.bf16 %v1081_v48, %v1073_v47  ;;  %v1153_v43 = vld [vmem:[%s5037_s27 + $0x1928] sm:$0xff]  ;;  %v4558_v46 = vld [vmem:[%s5152_s24 + $0x10] sm:$0xff]  ;;  %v1155_v47 = vld [vmem:[%s5037_s27 + $0x1938] sm:$0xff] }
 0x24a   : > { %3954 = vmatpush1.bf16.msra.mxu0 %v3953_v55  ;;  %v1072_v55 = vld [vmem:[%s5037_s27 + $0x16a0] sm:$0xff]  ;;  %v1163_v48 = vld [vmem:[%s5037_s27 + $0x1978] sm:$0xff] }
 0x24b   : > { %4210 = vmatpush1.bf16.msra.mxu1 %v4209_v56  ;;  %3956 = vmatprep.subr.bf16.mxu0 %v3955_v57  ;;  %v1080_v56 = vld [vmem:[%s5037_s27 + $0x16e0] sm:$0xff]  ;;  %v1074_v57 = vld [vmem:[%s5037_s27 + $0x16b0] sm:$0xff] }
 0x24c   : > { %4212 = vmatprep.subr.bf16.mxu1 %v4211_v60  ;;  %v1097_v60 = vld [vmem:[%s5037_s27 + $0x1768] sm:$0xff]  ;;  %v3977_v0 = vpack.c.bf16 %v1080_v56, %v1072_v55  ;;  %v4233_v1 = vpack.c.bf16 %v1082_v59, %v1074_v57  ;;  %v1154_v55 = vld [vmem:[%s5037_s27 + $0x1930] sm:$0xff]  ;;  %v4251_v56 = vpack.c.bf16 %v1163_v48, %v1155_v47  ;;  %v1235_v47 = vld [vmem:[%s5037_s27 + $0x1bb8] sm:$0xff] }
 0x24d   : > { %v3979_v2 = vpack.c.bf16 %v1097_v60, %v1089_v49  ;;  %v1162_v57 = vld [vmem:[%s5037_s27 + $0x1970] sm:$0xff]  ;;  %v1177_v59 = vld [vmem:[%s5037_s27 + $0x19e8] sm:$0xff]  ;;  %v1171_v49 = vld [vmem:[%s5037_s27 + $0x19b8] sm:$0xff] }
 0x24e   : > { %3958 = vmatpush1.bf16.msra.mxu0 %v3957_v61  ;;  %v1088_v61 = vld [vmem:[%s5037_s27 + $0x1720] sm:$0xff]  ;;  %v1179_v60 = vld [vmem:[%s5037_s27 + $0x19f8] sm:$0xff]  ;;  %v4253_v39 = vpack.c.bf16 %v1162_v57, %v1154_v55 }
 0x24f   : > { %4214 = vmatpush1.bf16.msra.mxu1 %v4213_v3  ;;  %3960 = vmatprep.subr.bf16.mxu0 %v3959_v4  ;;  %v1096_v3 = vld [vmem:[%s5037_s27 + $0x1760] sm:$0xff]  ;;  %v1090_v4 = vld [vmem:[%s5037_s27 + $0x1730] sm:$0xff]  ;;  %v1243_v48 = vld [vmem:[%s5037_s27 + $0x1bf8] sm:$0xff] }
 0x250   : > { %4216 = vmatprep.subr.bf16.mxu1 %v4215_v8  ;;  %v1113_v8 = vld [vmem:[%s5037_s27 + $0x17e8] sm:$0xff]  ;;  %v3981_v11 = vpack.c.bf16 %v1096_v3, %v1088_v61  ;;  %v4237_v12 = vpack.c.bf16 %v1098_v6, %v1090_v4  ;;  %v1170_v61 = vld [vmem:[%s5037_s27 + $0x19b0] sm:$0xff]  ;;  %v4255_v3 = vpack.c.bf16 %v1179_v60, %v1171_v49  ;;  %v1187_v6 = vld [vmem:[%s5037_s27 + $0x1a38] sm:$0xff]  ;;  %v4271_v60 = vpack.c.bf16 %v1243_v48, %v1235_v47 }
 0x251   : > { %v3983_v13 = vpack.c.bf16 %v1113_v8, %v1105_v7  ;;  %v1178_v4 = vld [vmem:[%s5037_s27 + $0x19f0] sm:$0xff]  ;;  %v1195_v7 = vld [vmem:[%s5037_s27 + $0x1a78] sm:$0xff]  ;;  %v1232_v57 = vld [vmem:[%s5037_s27 + $0x1ba0] sm:$0xff] }
 0x252   : > { %3962 = vmatpush1.bf16.msra.mxu0 %v3961_v14  ;;  %v1104_v14 = vld [vmem:[%s5037_s27 + $0x17a0] sm:$0xff]  ;;  %v4257_v44 = vpack.c.bf16 %v1178_v4, %v1170_v61  ;;  %v1259_v61 = vld [vmem:[%s5037_s27 + $0x1c78] sm:$0xff]  ;;  %v1313_v47 = vld [vmem:[%s5037_s27 + $0x1e28] sm:$0xff] }
 0x253   : > { %4218 = vmatpush1.bf16.msra.mxu1 %v4217_v15  ;;  %3964 = vmatprep.subr.bf16.mxu0 %v3963_v16  ;;  %v1112_v15 = vld [vmem:[%s5037_s27 + $0x17e0] sm:$0xff]  ;;  %v1106_v16 = vld [vmem:[%s5037_s27 + $0x17b0] sm:$0xff]  ;;  %v1321_v48 = vld [vmem:[%s5037_s27 + $0x1e68] sm:$0xff] }
 0x254   : > { %4220 = vmatprep.subr.bf16.mxu1 %v4219_v20  ;;  %v1129_v20 = vld [vmem:[%s5037_s27 + $0x1868] sm:$0xff]  ;;  %v3985_v22 = vpack.c.bf16 %v1112_v15, %v1104_v14  ;;  %v4241_v23 = vpack.c.bf16 %v1114_v18, %v1106_v16  ;;  %v4259_v14 = vpack.c.bf16 %v1195_v7, %v1187_v6  ;;  %v1194_v15 = vld [vmem:[%s5037_s27 + $0x1a70] sm:$0xff]  ;;  %v1203_v18 = vld [vmem:[%s5037_s27 + $0x1ab8] sm:$0xff] }
 0x255   : > { %v3987_v24 = vpack.c.bf16 %v1129_v20, %v1121_v19  ;;  %v1201_v16 = vld [vmem:[%s5037_s27 + $0x1aa8] sm:$0xff]  ;;  %v1211_v19 = vld [vmem:[%s5037_s27 + $0x1af8] sm:$0xff]  ;;  %v1256_v6 = vld [vmem:[%s5037_s27 + $0x1c60] sm:$0xff] }
 0x256   : > { %3966 = vmatpush1.bf16.msra.mxu0 %v3965_v25  ;;  %v1120_v25 = vld [vmem:[%s5037_s27 + $0x1820] sm:$0xff]  ;;  %v1250_v7 = vld [vmem:[%s5037_s27 + $0x1c30] sm:$0xff] }
 0x257   : > { %4222 = vmatpush1.bf16.msra.mxu1 %v4221_v26  ;;  %3968 = vmatprep.subr.bf16.mxu0 %v3967_v27  ;;  %v1128_v26 = vld [vmem:[%s5037_s27 + $0x1860] sm:$0xff]  ;;  %v1122_v27 = vld [vmem:[%s5037_s27 + $0x1830] sm:$0xff] }
 0x258   : > { %4224 = vmatprep.subr.bf16.mxu1 %v4223_v31  ;;  %v1145_v31 = vld [vmem:[%s5037_s27 + $0x18e8] sm:$0xff]  ;;  %v3989_v34 = vpack.c.bf16 %v1128_v26, %v1120_v25  ;;  %v4245_v35 = vpack.c.bf16 %v1130_v29, %v1122_v27  ;;  %v4263_v25 = vpack.c.bf16 %v1211_v19, %v1203_v18  ;;  %v1210_v26 = vld [vmem:[%s5037_s27 + $0x1af0] sm:$0xff]  ;;  %v1219_v29 = vld [vmem:[%s5037_s27 + $0x1b38] sm:$0xff] }
 0x259   : > { %v3991_v63 = vpack.c.bf16 %v1145_v31, %v1137_v30  ;;  %v1217_v27 = vld [vmem:[%s5037_s27 + $0x1b28] sm:$0xff]  ;;  %v1227_v30 = vld [vmem:[%s5037_s27 + $0x1b78] sm:$0xff]  ;;  %v1272_v18 = vld [vmem:[%s5037_s27 + $0x1ce0] sm:$0xff] }
 0x25a   : > { %3970 = vmatpush1.bf16.msra.mxu0 %v3969_v36  ;;  %v1136_v36 = vld [vmem:[%s5037_s27 + $0x18a0] sm:$0xff]  ;;  %v1266_v19 = vld [vmem:[%s5037_s27 + $0x1cb0] sm:$0xff] }
 0x25b   : > { %4226 = vmatpush1.bf16.msra.mxu1 %v4225_v37  ;;  %3972 = vmatprep.subr.bf16.mxu0 %v3971_v38  ;;  %v1144_v37 = vld [vmem:[%s5037_s27 + $0x18e0] sm:$0xff]  ;;  %v1138_v38 = vld [vmem:[%s5037_s27 + $0x18b0] sm:$0xff] }
 0x25c   : > { %4228 = vmatprep.subr.bf16.mxu1 %v4227_v45  ;;  %v1161_v45 = vld [vmem:[%s5037_s27 + $0x1968] sm:$0xff]  ;;  %v3993_v42 = vpack.c.bf16 %v1144_v37, %v1136_v36  ;;  %v4249_v50 = vpack.c.bf16 %v1146_v41, %v1138_v38  ;;  %v4267_v37 = vpack.c.bf16 %v1227_v30, %v1219_v29  ;;  %v1226_v38 = vld [vmem:[%s5037_s27 + $0x1b70] sm:$0xff]  ;;  %v1288_v29 = vld [vmem:[%s5037_s27 + $0x1d60] sm:$0xff] }
 0x25d   : > { %v1241_v41 = vld [vmem:[%s5037_s27 + $0x1be8] sm:$0xff]  ;;  %v1282_v30 = vld [vmem:[%s5037_s27 + $0x1d30] sm:$0xff] }
 0x25e   : > { %3974 = vmatpush1.bf16.msra.mxu0 %v3973_v52  ;;  %v3995_v52 = vpack.c.bf16 %v1161_v45, %v1153_v43  ;;  %v337_v45 = vld [vmem:[#allocation2] sm:$0xff] }
 0x25f   : > { %4230 = vmatpush1.bf16.msra.mxu1 %v4229_v53  ;;  %3976 = vmatprep.subr.bf16.mxu0 %v3975_v54  ;;  %v1152_v53 = vld [vmem:[%s5037_s27 + $0x1920] sm:$0xff] }
 0x260   : > { %4232 = vmatprep.subr.bf16.mxu1 %v4231_v58  ;;  %v1160_v54 = vld [vmem:[%s5037_s27 + $0x1960] sm:$0xff]  ;;  %v1169_v58 = vld [vmem:[%s5037_s27 + $0x19a8] sm:$0xff] }
 0x261   : > { %v3997_v62 = vpack.c.bf16 %v1160_v54, %v1152_v53 }
 0x262   : > { %3978 = vmatpush1.bf16.msra.mxu0 %v3977_v0  ;;  %v3999_v0 = vpack.c.bf16 %v1177_v59, %v1169_v58  ;;  %v1240_v58 = vld [vmem:[%s5037_s27 + $0x1be0] sm:$0xff]  ;;  %v1234_v59 = vld [vmem:[%s5037_s27 + $0x1bb0] sm:$0xff] }
 0x263   : > { %4234 = vmatpush1.bf16.msra.mxu1 %v4233_v1  ;;  %3980 = vmatprep.subr.bf16.mxu0 %v3979_v2  ;;  %v1168_v1 = vld [vmem:[%s5037_s27 + $0x19a0] sm:$0xff] }
 0x264   : > { %4236 = vmatprep.subr.bf16.mxu1 %v4235_v5  ;;  %v1176_v2 = vld [vmem:[%s5037_s27 + $0x19e0] sm:$0xff]  ;;  %v1185_v5 = vld [vmem:[%s5037_s27 + $0x1a28] sm:$0xff] }
 0x265   : > { %v4001_v8 = vpack.c.bf16 %v1176_v2, %v1168_v1  ;;  %v1251_v2 = vld [vmem:[%s5037_s27 + $0x1c38] sm:$0xff] }
 0x266   : > { %3982 = vmatpush1.bf16.msra.mxu0 %v3981_v11  ;;  %v1184_v11 = vld [vmem:[%s5037_s27 + $0x1a20] sm:$0xff] }
 0x267   : > { %4238 = vmatpush1.bf16.msra.mxu1 %v4237_v12  ;;  %3984 = vmatprep.subr.bf16.mxu0 %v3983_v13  ;;  %v1192_v12 = vld [vmem:[%s5037_s27 + $0x1a60] sm:$0xff]  ;;  %v1186_v13 = vld [vmem:[%s5037_s27 + $0x1a30] sm:$0xff] }
 0x268   : > { %4240 = vmatprep.subr.bf16.mxu1 %v4239_v17  ;;  %v1209_v17 = vld [vmem:[%s5037_s27 + $0x1ae8] sm:$0xff]  ;;  %v4005_v20 = vpack.c.bf16 %v1192_v12, %v1184_v11  ;;  %v4261_v21 = vpack.c.bf16 %v1194_v15, %v1186_v13  ;;  %v1267_v12 = vld [vmem:[%s5037_s27 + $0x1cb8] sm:$0xff] }
 0x269   : > { %v4007_v51 = vpack.c.bf16 %v1209_v17, %v1201_v16  ;;  %v1273_v11 = vld [vmem:[%s5037_s27 + $0x1ce8] sm:$0xff]  ;;  %v1275_v13 = vld [vmem:[%s5037_s27 + $0x1cf8] sm:$0xff]  ;;  %v1264_v17 = vld [vmem:[%s5037_s27 + $0x1ca0] sm:$0xff] }
 0x26a   : > { %3986 = vmatpush1.bf16.msra.mxu0 %v3985_v22  ;;  %v1200_v22 = vld [vmem:[%s5037_s27 + $0x1aa0] sm:$0xff] }
 0x26b   : > { %4242 = vmatpush1.bf16.msra.mxu1 %v4241_v23  ;;  %3988 = vmatprep.subr.bf16.mxu0 %v3987_v24  ;;  %v1208_v23 = vld [vmem:[%s5037_s27 + $0x1ae0] sm:$0xff]  ;;  %v1202_v24 = vld [vmem:[%s5037_s27 + $0x1ab0] sm:$0xff] }
 0x26c   : > { %4244 = vmatprep.subr.bf16.mxu1 %v4243_v28  ;;  %v1225_v28 = vld [vmem:[%s5037_s27 + $0x1b68] sm:$0xff]  ;;  %v4009_v31 = vpack.c.bf16 %v1208_v23, %v1200_v22  ;;  %v4265_v32 = vpack.c.bf16 %v1210_v26, %v1202_v24  ;;  %v1283_v23 = vld [vmem:[%s5037_s27 + $0x1d38] sm:$0xff] }
 0x26d   : > { %2159 = vmatmul.mubr.f32.vlgmr.msra.gmra.mrb[2].mxu0 %v4558_v46  ;;  %v4011_v33 = vpack.c.bf16 %v1225_v28, %v1217_v27  ;;  %v1289_v22 = vld [vmem:[%s5037_s27 + $0x1d68] sm:$0xff]  ;;  %v1291_v24 = vld [vmem:[%s5037_s27 + $0x1d78] sm:$0xff]  ;;  %v1280_v28 = vld [vmem:[%s5037_s27 + $0x1d20] sm:$0xff] }
 0x26e   : > { %3990 = vmatpush1.bf16.msra.mxu0 %v3989_v34  ;;  %2443 = vmatmul.mubr.f32.vlgmr.msra.gmra.mrb[2].mxu1 %v4558_v46  ;;  %v1216_v34 = vld [vmem:[%s5037_s27 + $0x1b20] sm:$0xff] }
 0x26f   : > { %4246 = vmatpush1.bf16.msra.mxu1 %v4245_v35  ;;  %3992 = vmatprep.subr.bf16.mxu0 %v3991_v63  ;;  %v1224_v35 = vld [vmem:[%s5037_s27 + $0x1b60] sm:$0xff]  ;;  %v1218_v63 = vld [vmem:[%s5037_s27 + $0x1b30] sm:$0xff] }
 0x270   : > { %4248 = vmatprep.subr.bf16.mxu1 %v4247_v40  ;;  %2229 = vmatprep.mubr.f32.mxu0 %v5494_v9  ;;  %v1233_v40 = vld [vmem:[%s5037_s27 + $0x1ba8] sm:$0xff]  ;;  %v4013_v53 = vpack.c.bf16 %v1224_v35, %v1216_v34  ;;  %v4269_v55 = vpack.c.bf16 %v1226_v38, %v1218_v63  ;;  %v1299_v35 = vld [vmem:[%s5037_s27 + $0x1db8] sm:$0xff] }
 0x271   : > { %2513 = vmatprep.mubr.f32.mxu1 %v5494_v9  ;;  %v1193_v9 = vld [vmem:[%s5037_s27 + $0x1a68] sm:$0xff]  ;;  %v1307_v63 = vld [vmem:[%s5037_s27 + $0x1df8] sm:$0xff] }
 0x272   : > { %3994 = vmatpush1.bf16.msra.mxu0 %v3993_v42  ;;  %v4003_v10 = vpack.c.bf16 %v1193_v9, %v1185_v5  ;;  %v1248_v9 = vld [vmem:[%s5037_s27 + $0x1c20] sm:$0xff]  ;;  %v1305_v34 = vld [vmem:[%s5037_s27 + $0x1de8] sm:$0xff] }
 0x273   : > { %4250 = vmatpush1.bf16.msra.mxu1 %v4249_v50  ;;  %3996 = vmatprep.subr.bf16.mxu0 %v3995_v52  ;;  %v338_v50 = vld [vmem:[#allocation2 + $0x8] sm:$0xff] }
 0x274   : > { %4252 = vmatprep.subr.bf16.mxu1 %v4251_v56  ;;  %v4015_v56 = vpack.c.bf16 %v1241_v41, %v1233_v40  ;;  %v1296_v40 = vld [vmem:[%s5037_s27 + $0x1da0] sm:$0xff] }
 0x275   : > { %v1304_v41 = vld [vmem:[%s5037_s27 + $0x1de0] sm:$0xff] }
 0x276   : > { %3998 = vmatpush1.bf16.msra.mxu0 %v3997_v62  ;;  %v1242_v62 = vld [vmem:[%s5037_s27 + $0x1bf0] sm:$0xff] }
 0x277   : > { %4254 = vmatpush1.bf16.msra.mxu1 %v4253_v39  ;;  %4000 = vmatprep.subr.bf16.mxu0 %v3999_v0  ;;  %v1249_v39 = vld [vmem:[%s5037_s27 + $0x1c28] sm:$0xff]  ;;  %v4273_v4 = vpack.c.bf16 %v1242_v62, %v1234_v59  ;;  %v1322_v59 = vld [vmem:[%s5037_s27 + $0x1e70] sm:$0xff]  ;;  %v1331_v62 = vld [vmem:[%s5037_s27 + $0x1eb8] sm:$0xff] }
 0x278   : > { %4256 = vmatprep.subr.bf16.mxu1 %v4255_v3  ;;  %v1257_v0 = vld [vmem:[%s5037_s27 + $0x1c68] sm:$0xff]  ;;  %v4017_v3 = vpack.c.bf16 %v1240_v58, %v1232_v57  ;;  %v1314_v57 = vld [vmem:[%s5037_s27 + $0x1e30] sm:$0xff] }
 0x279   : > { %v4019_v5 = vpack.c.bf16 %v1257_v0, %v1249_v39  ;;  %v1339_v39 = vld [vmem:[%s5037_s27 + $0x1ef8] sm:$0xff] }
 0x27a   : > { %4002 = vmatpush1.bf16.msra.mxu0 %v4001_v8  ;;  %v4275_v8 = vpack.c.bf16 %v1259_v61, %v1251_v2  ;;  %v1328_v61 = vld [vmem:[%s5037_s27 + $0x1ea0] sm:$0xff] }
 0x27b   : > { %4258 = vmatpush1.bf16.msra.mxu1 %v4257_v44  ;;  %4004 = vmatprep.subr.bf16.mxu0 %v4003_v10  ;;  %v1258_v44 = vld [vmem:[%s5037_s27 + $0x1c70] sm:$0xff]  ;;  %v1265_v10 = vld [vmem:[%s5037_s27 + $0x1ca8] sm:$0xff] }
 0x27c   : > { %4260 = vmatprep.subr.bf16.mxu1 %v4259_v14  ;;  %v4021_v14 = vpack.c.bf16 %v1256_v6, %v1248_v9  ;;  %v4277_v15 = vpack.c.bf16 %v1258_v44, %v1250_v7  ;;  %v4023_v16 = vpack.c.bf16 %v1273_v11, %v1265_v10  ;;  %v1338_v9 = vld [vmem:[%s5037_s27 + $0x1ef0] sm:$0xff]  ;;  %v1345_v6 = vld [vmem:[%s5037_s27 + $0x1f28] sm:$0xff]  ;;  %v1355_v44 = vld [vmem:[%s5037_s27 + $0x1f78] sm:$0xff] }
 0x27d   : > { %v1353_v7 = vld [vmem:[%s5037_s27 + $0x1f68] sm:$0xff] }
 0x27e   : > { %4006 = vmatpush1.bf16.msra.mxu0 %v4005_v20  ;;  %v4279_v20 = vpack.c.bf16 %v1275_v13, %v1267_v12  ;;  %v4043_v12 = vpack.c.bf16 %v1353_v7, %v1345_v6  ;;  %v1344_v13 = vld [vmem:[%s5037_s27 + $0x1f20] sm:$0xff]  ;;  %v2580_v6 = vld [vmem:[#allocation9 + $0x20] sm:$0xff] (!%p3129_p4)  ;;  %v2581_v7 = vld [vmem:[#allocation9 + $0x28] sm:$0xff] (!%p3129_p4) }
 0x27f   : > { %4262 = vmatpush1.bf16.msra.mxu1 %v4261_v21  ;;  %4008 = vmatprep.subr.bf16.mxu0 %v4007_v51  ;;  %v1274_v21 = vld [vmem:[%s5037_s27 + $0x1cf0] sm:$0xff]  ;;  %v1281_v51 = vld [vmem:[%s5037_s27 + $0x1d28] sm:$0xff] }
 0x280   : > { %v1663_v36 = vpop.f32.mrb[0].mxu0  ;;  %4264 = vmatprep.subr.bf16.mxu1 %v4263_v25  ;;  %v4025_v25 = vpack.c.bf16 %v1272_v18, %v1264_v17  ;;  %v4281_v26 = vpack.c.bf16 %v1274_v21, %v1266_v19  ;;  %v4027_v27 = vpack.c.bf16 %v1289_v22, %v1281_v51  ;;  %v1354_v17 = vld [vmem:[%s5037_s27 + $0x1f70] sm:$0xff]  ;;  %v1361_v18 = vld [vmem:[%s5037_s27 + $0x1fa8] sm:$0xff]  ;;  %v1371_v21 = vld [vmem:[%s5037_s27 + $0x1ff8] sm:$0xff] }
 0x281   : > { %v1947_v43 = vpop.f32.mrb[0].mxu1  ;;  %v1665_v46 = vpop.f32.mrb[1].mxu0  ;;  %v1369_v19 = vld [vmem:[%s5037_s27 + $0x1fe8] sm:$0xff] }
 0x282   : > { %v2528_v42 = vcombine.low %v1663_v36, %v1665_v46  ;;  %v1949_v52 = vpop.f32.mrb[1].mxu1  ;;  %4010 = vmatpush1.bf16.msra.mxu0 %v4009_v31  ;;  %v4283_v31 = vpack.c.bf16 %v1291_v24, %v1283_v23  ;;  %v4029_v36 = vpack.c.bf16 %v1288_v29, %v1280_v28  ;;  %v1306_v46 = vld [vmem:[%s5037_s27 + $0x1df0] sm:$0xff]  ;;  %v4047_v23 = vpack.c.bf16 %v1369_v19, %v1361_v18  ;;  %v1360_v24 = vld [vmem:[%s5037_s27 + $0x1fa0] sm:$0xff] }
 0x283   : > { %v2529_v54 = vcombine.low %v1947_v43, %v1949_v52  ;;  %4266 = vmatpush1.bf16.msra.mxu1 %v4265_v32  ;;  %4012 = vmatprep.subr.bf16.mxu0 %v4011_v33  ;;  %v1290_v32 = vld [vmem:[%s5037_s27 + $0x1d70] sm:$0xff]  ;;  %v1297_v33 = vld [vmem:[%s5037_s27 + $0x1da8] sm:$0xff]  ;;  %v4033_v52 = vpack.c.bf16 %v1304_v41, %v1296_v40  ;;  %v2583_v19 = vld [vmem:[#allocation9 + $0x38] sm:$0xff] (!%p3129_p4) }
 0x284   : > { %v2536_v49 = vadd.f32 %v2528_v42, %v337_v45  ;;  %4268 = vmatprep.subr.bf16.mxu1 %v4267_v37  ;;  %v4285_v37 = vpack.c.bf16 %v1290_v32, %v1282_v30  ;;  %v4031_v38 = vpack.c.bf16 %v1305_v34, %v1297_v33  ;;  %v1298_v43 = vld [vmem:[%s5037_s27 + $0x1db0] sm:$0xff]  ;;  %v4287_v45 = vpack.c.bf16 %v1307_v63, %v1299_v35  ;;  %v1315_v42 = vld [vmem:[%s5037_s27 + $0x1e38] sm:$0xff] }
 0x285   : > { %v2537_v1 = vadd.f32 %v2529_v54, %v338_v50  ;;  %v1323_v50 = vld [vmem:[%s5037_s27 + $0x1e78] sm:$0xff]  ;;  %v4035_v54 = vpack.c.bf16 %v1321_v48, %v1313_v47  ;;  %v1370_v28 = vld [vmem:[%s5037_s27 + $0x1ff0] sm:$0xff] }
 0x286   : > { %2540 = vst [vmem:[#allocation2] sm:$0xff] %v2536_v49  ;;  %4014 = vmatpush1.bf16.msra.mxu0 %v4013_v53  ;;  %v4289_v53 = vpack.c.bf16 %v1306_v46, %v1298_v43  ;;  %v4291_v58 = vpack.c.bf16 %v1323_v50, %v1315_v42  ;;  %v1329_v49 = vld [vmem:[%s5037_s27 + $0x1ea8] sm:$0xff]  ;;  %v339_v34 = vld [vmem:[#allocation2 + $0x10] sm:$0xff] }
 0x287   : > { %2541 = vst [vmem:[#allocation2 + $0x8] sm:$0xff] %v2537_v1  ;;  %4270 = vmatpush1.bf16.msra.mxu1 %v4269_v55  ;;  %4016 = vmatprep.subr.bf16.mxu0 %v4015_v56  ;;  %v1312_v55 = vld [vmem:[%s5037_s27 + $0x1e20] sm:$0xff]  ;;  %v4293_v1 = vpack.c.bf16 %v1322_v59, %v1314_v57  ;;  %v2592_v43 = vld [vmem:[#allocation9 + $0x80] sm:$0xff] (!%p3129_p4)  ;;  %v2577_v48 = vld [vmem:[#allocation9 + $0x8] sm:$0xff] (!%p3129_p4) }
 0x288   : > { %4272 = vmatprep.subr.bf16.mxu1 %v4271_v60  ;;  %v1320_v56 = vld [vmem:[%s5037_s27 + $0x1e60] sm:$0xff]  ;;  %v1337_v60 = vld [vmem:[%s5037_s27 + $0x1ee8] sm:$0xff]  ;;  %v2625_v50 = vld [vmem:[#allocation9 + $0x188] sm:$0xff] (!%p3129_p4) }
 0x289   : > { %v4037_v0 = vpack.c.bf16 %v1320_v56, %v1312_v55  ;;  %v4039_v2 = vpack.c.bf16 %v1337_v60, %v1329_v49  ;;  %v2576_v46 = vld [vmem:[#allocation9] sm:$0xff] (!%p3129_p4)  ;;  %v2609_v55 = vld [vmem:[#allocation9 + $0x108] sm:$0xff] (!%p3129_p4)  ;;  %v2594_v56 = vld [vmem:[#allocation9 + $0x90] sm:$0xff] (!%p3129_p4) }
 0x28a   : > { %4018 = vmatpush1.bf16.msra.mxu0 %v4017_v3  ;;  %v1336_v3 = vld [vmem:[%s5037_s27 + $0x1ee0] sm:$0xff]  ;;  %v2624_v42 = vld [vmem:[#allocation9 + $0x180] sm:$0xff] (!%p3129_p4)  ;;  %v2578_v59 = vld [vmem:[#allocation9 + $0x10] sm:$0xff] (!%p3129_p4) }
 0x28b   : > { %4274 = vmatpush1.bf16.msra.mxu1 %v4273_v4  ;;  %4020 = vmatprep.subr.bf16.mxu0 %v4019_v5  ;;  %v1330_v4 = vld [vmem:[%s5037_s27 + $0x1eb0] sm:$0xff]  ;;  %v4295_v5 = vpack.c.bf16 %v1339_v39, %v1331_v62  ;;  %v4041_v10 = vpack.c.bf16 %v1336_v3, %v1328_v61  ;;  %v2579_v49 = vld [vmem:[#allocation9 + $0x18] sm:$0xff] (!%p3129_p4)  ;;  %v2626_v39 = vld [vmem:[#allocation9 + $0x190] sm:$0xff] (!%p3129_p4) }
 0x28c   : > { %4276 = vmatprep.subr.bf16.mxu1 %v4275_v8  ;;  %v1347_v8 = vld [vmem:[%s5037_s27 + $0x1f38] sm:$0xff]  ;;  %v4297_v11 = vpack.c.bf16 %v1338_v9, %v1330_v4  ;;  %v4313_v62 = vpack.c.bf16 (!%p3129_p4), %v2579_v49, %v2578_v59  ;;  %v2611_v61 = vld [vmem:[#allocation9 + $0x118] sm:$0xff] (!%p3129_p4)  ;;  %v2596_v3 = vld [vmem:[#allocation9 + $0xa0] sm:$0xff] (!%p3129_p4) }
 0x28d   : > { %v2597_v4 = vld [vmem:[#allocation9 + $0xa8] sm:$0xff] (!%p3129_p4)  ;;  %v2620_v49 = vld [vmem:[#allocation9 + $0x160] sm:$0xff] (!%p3129_p4) }
 0x28e   : > { %4022 = vmatpush1.bf16.msra.mxu0 %v4021_v14  ;;  %v1352_v14 = vld [vmem:[%s5037_s27 + $0x1f60] sm:$0xff]  ;;  %v4315_v9 = vpack.c.bf16 (!%p3129_p4), %v2597_v4, %v2596_v3  ;;  %v2638_v3 = vld [vmem:[#allocation9 + $0x1f0] sm:$0xff] (!%p3129_p4) }
 0x28f   : > { %4278 = vmatpush1.bf16.msra.mxu1 %v4277_v15  ;;  %4024 = vmatprep.subr.bf16.mxu0 %v4023_v16  ;;  %v1346_v15 = vld [vmem:[%s5037_s27 + $0x1f30] sm:$0xff]  ;;  %v4299_v16 = vpack.c.bf16 %v1355_v44, %v1347_v8  ;;  %v4045_v51 = vpack.c.bf16 %v1352_v14, %v1344_v13  ;;  %v2628_v8 = vld [vmem:[#allocation9 + $0x1a0] sm:$0xff] (!%p3129_p4)  ;;  %v2598_v14 = vld [vmem:[#allocation9 + $0xb0] sm:$0xff] (!%p3129_p4) }
 0x290   : > { %4280 = vmatprep.subr.bf16.mxu1 %v4279_v20  ;;  %v1363_v20 = vld [vmem:[%s5037_s27 + $0x1fb8] sm:$0xff]  ;;  %v4301_v22 = vpack.c.bf16 %v1354_v17, %v1346_v15  ;;  %v2629_v44 = vld [vmem:[#allocation9 + $0x1a8] sm:$0xff] (!%p3129_p4)  ;;  %v2599_v15 = vld [vmem:[#allocation9 + $0xb8] sm:$0xff] (!%p3129_p4) }
 0x291   : > { %v4347_v13 = vpack.c.bf16 (!%p3129_p4), %v2629_v44, %v2628_v8  ;;  %v4319_v18 = vpack.c.bf16 (!%p3129_p4), %v2599_v15, %v2598_v14  ;;  %v2639_v4 = vld [vmem:[#allocation9 + $0x1f8] sm:$0xff] (!%p3129_p4)  ;;  %v2590_v8 = vld [vmem:[#allocation9 + $0x70] sm:$0xff] (!%p3129_p4)  ;;  %v2657_v14 = vld [vmem:[#allocation9 + $0x288] sm:$0xff] (!%p3129_p4) }
 0x292   : > { %4026 = vmatpush1.bf16.msra.mxu0 %v4025_v25  ;;  %v1368_v25 = vld [vmem:[%s5037_s27 + $0x1fe0] sm:$0xff]  ;;  %v2688_v15 = vld [vmem:[#allocation9 + $0x380] sm:$0xff] (!%p3129_p4) }
 0x293   : > { %4282 = vmatpush1.bf16.msra.mxu1 %v4281_v26  ;;  %4028 = vmatprep.subr.bf16.mxu0 %v4027_v27  ;;  %v4303_v26 = vpack.c.bf16 %v1371_v21, %v1363_v20  ;;  %v1362_v27 = vld [vmem:[%s5037_s27 + $0x1fb0] sm:$0xff]  ;;  %v4049_v29 = vpack.c.bf16 %v1368_v25, %v1360_v24  ;;  %v2630_v20 = vld [vmem:[#allocation9 + $0x1b0] sm:$0xff] (!%p3129_p4)  ;;  %v2631_v21 = vld [vmem:[#allocation9 + $0x1b8] sm:$0xff] (!%p3129_p4) }
 0x294   : > { %4284 = vmatprep.subr.bf16.mxu1 %v4283_v31  ;;  %v4305_v30 = vpack.c.bf16 %v1370_v28, %v1362_v27  ;;  %v4559_v31 = vld [vmem:[%s5152_s24 + $0x18] sm:$0xff]  ;;  %v2600_v24 = vld [vmem:[#allocation9 + $0xc0] sm:$0xff] (!%p3129_p4)  ;;  %v2601_v25 = vld [vmem:[#allocation9 + $0xc8] sm:$0xff] (!%p3129_p4) }
 0x295   : > { %v2632_v27 = vld [vmem:[#allocation9 + $0x1c0] sm:$0xff] (!%p3129_p4)  ;;  %v2633_v28 = vld [vmem:[#allocation9 + $0x1c8] sm:$0xff] (!%p3129_p4)  ;;  %v2591_v44 = vld [vmem:[#allocation9 + $0x78] sm:$0xff] (!%p3129_p4) }
 0x296   : > { %4030 = vmatpush1.bf16.msra.mxu0 %v4029_v36  ;;  %v340_v36 = vld [vmem:[#allocation2 + $0x18] sm:$0xff] }
 0x297   : > { %4286 = vmatpush1.bf16.msra.mxu1 %v4285_v37  ;;  %4032 = vmatprep.subr.bf16.mxu0 %v4031_v38 }
 0x298   : > { %4288 = vmatprep.subr.bf16.mxu1 %v4287_v45  ;;  %v2593_v45 = vld [vmem:[#allocation9 + $0x88] sm:$0xff] (!%p3129_p4) }
 0x299   : > { %v4307_v47 = vpack.c.bf16 (!%p3129_p4), %v2593_v45, %v2592_v43  ;;  %v2586_v45 = vld [vmem:[#allocation9 + $0x50] sm:$0xff] (!%p3129_p4) }
 0x29a   : > { %4034 = vmatpush1.bf16.msra.mxu0 %v4033_v52  ;;  %v4309_v52 = vpack.c.bf16 (!%p3129_p4), %v2577_v48, %v2576_v46  ;;  %v2587_v46 = vld [vmem:[#allocation9 + $0x58] sm:$0xff] (!%p3129_p4) }
 0x29b   : > { %4290 = vmatpush1.bf16.msra.mxu1 %v4289_v53  ;;  %4036 = vmatprep.subr.bf16.mxu0 %v4035_v54  ;;  %v4339_v53 = vpack.c.bf16 (!%p3129_p4), %v2625_v50, %v2624_v42  ;;  %v2608_v54 = vld [vmem:[#allocation9 + $0x100] sm:$0xff] (!%p3129_p4)  ;;  %v2619_v42 = vld [vmem:[#allocation9 + $0x158] sm:$0xff] (!%p3129_p4) }
 0x29c   : > { %4292 = vmatprep.subr.bf16.mxu1 %v4291_v58  ;;  %v4341_v57 = vpack.c.bf16 (!%p3129_p4), %v2609_v55, %v2608_v54  ;;  %v2595_v58 = vld [vmem:[#allocation9 + $0x98] sm:$0xff] (!%p3129_p4)  ;;  %v2604_v50 = vld [vmem:[#allocation9 + $0xe0] sm:$0xff] (!%p3129_p4)  ;;  %v2637_v54 = vld [vmem:[#allocation9 + $0x1e8] sm:$0xff] (!%p3129_p4)  ;;  %v4329_v55 = vpack.c.bf16 (!%p3129_p4), %v2587_v46, %v2586_v45 }
 0x29d   : > { %v4311_v60 = vpack.c.bf16 (!%p3129_p4), %v2595_v58, %v2594_v56  ;;  %v2588_v56 = vld [vmem:[#allocation9 + $0x60] sm:$0xff] (!%p3129_p4)  ;;  %v2642_v45 = vld [vmem:[#allocation9 + $0x210] sm:$0xff] (!%p3129_p4)  ;;  %v2643_v46 = vld [vmem:[#allocation9 + $0x218] sm:$0xff] (!%p3129_p4) }
 0x29e   : > { %4038 = vmatpush1.bf16.msra.mxu0 %v4037_v0  ;;  %v2627_v0 = vld [vmem:[#allocation9 + $0x198] sm:$0xff] (!%p3129_p4) }
 0x29f   : > { %4294 = vmatpush1.bf16.msra.mxu1 %v4293_v1  ;;  %4040 = vmatprep.subr.bf16.mxu0 %v4039_v2  ;;  %v2610_v1 = vld [vmem:[#allocation9 + $0x110] sm:$0xff] (!%p3129_p4)  ;;  %v4343_v2 = vpack.c.bf16 (!%p3129_p4), %v2627_v0, %v2626_v39 }
 0x2a0   : > { %4296 = vmatprep.subr.bf16.mxu1 %v4295_v5  ;;  %v4345_v5 = vpack.c.bf16 (!%p3129_p4), %v2611_v61, %v2610_v1  ;;  %v2606_v0 = vld [vmem:[#allocation9 + $0xf0] sm:$0xff] (!%p3129_p4)  ;;  %v2607_v1 = vld [vmem:[#allocation9 + $0xf8] sm:$0xff] (!%p3129_p4)  ;;  %v2549_v61 = vld [vmem:[#allocation2 + $0x8] sm:$0xff] (!%p3129_p4) }
 0x2a2   : > { %4042 = vmatpush1.bf16.msra.mxu0 %v4041_v10  ;;  %v2612_v10 = vld [vmem:[#allocation9 + $0x120] sm:$0xff] (!%p3129_p4) }
 0x2a3   : > { %4298 = vmatpush1.bf16.msra.mxu1 %v4297_v11  ;;  %4044 = vmatprep.subr.bf16.mxu0 %v4043_v12  ;;  %v2613_v11 = vld [vmem:[#allocation9 + $0x128] sm:$0xff] (!%p3129_p4)  ;;  %v4317_v12 = vpack.c.bf16 (!%p3129_p4), %v2581_v7, %v2580_v6  ;;  %v4335_v7 = vpack.c.bf16 (!%p3129_p4), %v2607_v1, %v2606_v0  ;;  %v2663_v0 = vld [vmem:[#allocation9 + $0x2b8] sm:$0xff] (!%p3129_p4)  ;;  %v2694_v1 = vld [vmem:[#allocation9 + $0x3b0] sm:$0xff] (!%p3129_p4) }
 0x2a4   : > { %4300 = vmatprep.subr.bf16.mxu1 %v4299_v16  ;;  %v2582_v16 = vld [vmem:[#allocation9 + $0x30] sm:$0xff] (!%p3129_p4)  ;;  %v4349_v17 = vpack.c.bf16 (!%p3129_p4), %v2613_v11, %v2612_v10  ;;  %v4367_v11 = vpack.c.bf16 (!%p3129_p4), %v2639_v4, %v2638_v3 }
 0x2a5   : > { %v2622_v10 = vld [vmem:[#allocation9 + $0x170] sm:$0xff] (!%p3129_p4) }
 0x2a6   : > { %4046 = vmatpush1.bf16.msra.mxu0 %v4045_v51  ;;  %v4351_v51 = vpack.c.bf16 (!%p3129_p4), %v2631_v21, %v2630_v20 }
 0x2a7   : > { %4302 = vmatpush1.bf16.msra.mxu1 %v4301_v22  ;;  %4048 = vmatprep.subr.bf16.mxu0 %v4047_v23  ;;  %v2614_v22 = vld [vmem:[#allocation9 + $0x130] sm:$0xff] (!%p3129_p4)  ;;  %v2615_v23 = vld [vmem:[#allocation9 + $0x138] sm:$0xff] (!%p3129_p4) }
 0x2a8   : > { %4304 = vmatprep.subr.bf16.mxu1 %v4303_v26  ;;  %v4321_v26 = vpack.c.bf16 (!%p3129_p4), %v2583_v19, %v2582_v16  ;;  %v2689_v16 = vld [vmem:[#allocation9 + $0x388] sm:$0xff] (!%p3129_p4) }
 0x2a9   : > { %v4403_v20 = vpack.c.bf16 (!%p3129_p4), %v2689_v16, %v2688_v15  ;;  %v2696_v15 = vld [vmem:[#allocation9 + $0x3c0] sm:$0xff] (!%p3129_p4)  ;;  %v2697_v16 = vld [vmem:[#allocation9 + $0x3c8] sm:$0xff] (!%p3129_p4) }
 0x2aa   : > { %4050 = vmatpush1.bf16.msra.mxu0 %v4049_v29  ;;  %v4353_v29 = vpack.c.bf16 (!%p3129_p4), %v2615_v23, %v2614_v22 }
 0x2ab   : > { %4306 = vmatpush1.bf16.msra.mxu1 %v4305_v30  ;;  %4308 = vmatprep.subr.bf16.mxu0 (!%p3129_p4), %v4307_v47  ;;  %v4323_v30 = vpack.c.bf16 (!%p3129_p4), %v2601_v25, %v2600_v24  ;;  %v2618_v47 = vld [vmem:[#allocation9 + $0x150] sm:$0xff] (!%p3129_p4) }
 0x2ac   : > { %4340 = vmatprep.subr.bf16.mxu1 (!%p3129_p4), %v4339_v53  ;;  %v2636_v53 = vld [vmem:[#allocation9 + $0x1e0] sm:$0xff] (!%p3129_p4)  ;;  %v4361_v58 = vpack.c.bf16 (!%p3129_p4), %v2619_v42, %v2618_v47  ;;  %v2674_v47 = vld [vmem:[#allocation9 + $0x310] sm:$0xff] (!%p3129_p4)  ;;  %v2675_v42 = vld [vmem:[#allocation9 + $0x318] sm:$0xff] (!%p3129_p4) }
 0x2ad   : > { %2230 = vmatmul.mubr.f32.vlgmr.msra.gmra.mrb[2].mxu0 %v4559_v31  ;;  %v4363_v39 = vpack.c.bf16 (!%p3129_p4), %v2637_v54, %v2636_v53  ;;  %v2692_v53 = vld [vmem:[#allocation9 + $0x3a0] sm:$0xff] (!%p3129_p4)  ;;  %v2693_v54 = vld [vmem:[#allocation9 + $0x3a8] sm:$0xff] (!%p3129_p4) }
 0x2ae   : > { %2514 = vmatmul.mubr.f32.vlgmr.msra.gmra.mrb[2].mxu1 %v4559_v31  ;;  %4310 = vmatpush3.bf16.msra.mxu0 (!%p3129_p4), %v4309_v52  ;;  %v2584_v31 = vld [vmem:[#allocation9 + $0x40] sm:$0xff] (!%p3129_p4)  ;;  %v2605_v52 = vld [vmem:[#allocation9 + $0xe8] sm:$0xff] (!%p3129_p4) }
 0x2af   : > { %4342 = vmatpush3.bf16.msra.mxu1 (!%p3129_p4), %v4341_v57  ;;  %4312 = vmatprep.subr.bf16.mxu0 (!%p3129_p4), %v4311_v60  ;;  %v2589_v57 = vld [vmem:[#allocation9 + $0x68] sm:$0xff] (!%p3129_p4)  ;;  %v4331_v59 = vpack.c.bf16 (!%p3129_p4), %v2605_v52, %v2604_v50  ;;  %v2660_v50 = vld [vmem:[#allocation9 + $0x2a0] sm:$0xff] (!%p3129_p4) }
 0x2b0   : > { %4344 = vmatprep.subr.bf16.mxu1 (!%p3129_p4), %v4343_v2  ;;  %v2621_v60 = vld [vmem:[#allocation9 + $0x168] sm:$0xff] (!%p3129_p4) }
 0x2b1   : > { %v4365_v6 = vpack.c.bf16 (!%p3129_p4), %v2621_v60, %v2620_v49  ;;  %v2661_v52 = vld [vmem:[#allocation9 + $0x2a8] sm:$0xff] (!%p3129_p4)  ;;  %v2676_v49 = vld [vmem:[#allocation9 + $0x320] sm:$0xff] (!%p3129_p4)  ;;  %v4411_v60 = vpack.c.bf16 (!%p3129_p4), %v2693_v54, %v2692_v53  ;;  %v2670_v53 = vld [vmem:[#allocation9 + $0x2f0] sm:$0xff] (!%p3129_p4) }
 0x2b2   : > { %4314 = vmatpush3.bf16.msra.mxu0 (!%p3129_p4), %v4313_v62  ;;  %v2548_v62 = vld [vmem:[#allocation2] sm:$0xff] (!%p3129_p4) }
 0x2b3   : > { %4346 = vmatpush3.bf16.msra.mxu1 (!%p3129_p4), %v4345_v5  ;;  %4316 = vmatprep.subr.bf16.mxu0 (!%p3129_p4), %v4315_v9  ;;  %v3130_v2 = vmul.f32 (!%p3129_p4), -1.442695, %v2548_v62  ;;  %v3131_v5 = vmul.f32 (!%p3129_p4), -1.442695, %v2549_v61  ;;  %v4333_v9 = vpack.c.bf16 (!%p3129_p4), %v2589_v57, %v2588_v56  ;;  %v4409_v56 = vpack.c.bf16 (!%p3129_p4), %v2675_v42, %v2674_v47  ;;  %v2677_v62 = vld [vmem:[#allocation9 + $0x328] sm:$0xff] (!%p3129_p4)  ;;  %v2671_v54 = vld [vmem:[#allocation9 + $0x2f8] sm:$0xff] (!%p3129_p4) }
 0x2b4   : > { %4348 = vmatprep.subr.bf16.mxu1 (!%p3129_p4), %v4347_v13  ;;  %v2656_v13 = vld [vmem:[#allocation9 + $0x280] sm:$0xff] (!%p3129_p4)  ;;  %v4379_v57 = vpack.c.bf16 (!%p3129_p4), %v2661_v52, %v2660_v50  ;;  %v2653_v47 = vld [vmem:[#allocation9 + $0x268] sm:$0xff] (!%p3129_p4) }
 0x2b5   : > { %4560 = vpow2.f32 (!%p3129_p4), %v3130_v2  ;;  %v4371_v19 = vpack.c.bf16 (!%p3129_p4), %v2657_v14, %v2656_v13  ;;  %v2695_v2 = vld [vmem:[#allocation9 + $0x3b8] sm:$0xff] (!%p3129_p4)  ;;  %v2665_v13 = vld [vmem:[#allocation9 + $0x2c8] sm:$0xff] (!%p3129_p4) }
 0x2b6   : > { %4318 = vmatpush3.bf16.msra.mxu0 (!%p3129_p4), %v4317_v12  ;;  %4562 = vpow2.f32 (!%p3129_p4), %v3131_v5  ;;  %v2623_v12 = vld [vmem:[#allocation9 + $0x178] sm:$0xff] (!%p3129_p4)  ;;  %v4413_v5 = vpack.c.bf16 (!%p3129_p4), %v2677_v62, %v2676_v49  ;;  %v2685_v52 = vld [vmem:[#allocation9 + $0x368] sm:$0xff] (!%p3129_p4)  ;;  %v2654_v62 = vld [vmem:[#allocation9 + $0x270] sm:$0xff] (!%p3129_p4) }
 0x2b7   : > { %4350 = vmatpush3.bf16.msra.mxu1 (!%p3129_p4), %v4349_v17  ;;  %4320 = vmatprep.subr.bf16.mxu0 (!%p3129_p4), %v4319_v18  ;;  %v4337_v17 = vpack.c.bf16 (!%p3129_p4), %v2591_v44, %v2590_v8  ;;  %v4369_v18 = vpack.c.bf16 (!%p3129_p4), %v2623_v12, %v2622_v10  ;;  %v2678_v8 = vld [vmem:[#allocation9 + $0x330] sm:$0xff] (!%p3129_p4)  ;;  %v4415_v10 = vpack.c.bf16 (!%p3129_p4), %v2695_v2, %v2694_v1  ;;  %v2664_v12 = vld [vmem:[#allocation9 + $0x2c0] sm:$0xff] (!%p3129_p4)  ;;  %v2687_v2 = vld [vmem:[#allocation9 + $0x378] sm:$0xff] (!%p3129_p4) }
 0x2b8   : > { %4352 = vmatprep.subr.bf16.mxu1 (!%p3129_p4), %v4351_v51  ;;  %v2686_v1 = vld [vmem:[#allocation9 + $0x370] sm:$0xff] (!%p3129_p4) }
 0x2ba   : > { %4322 = vmatpush3.bf16.msra.mxu0 (!%p3129_p4), %v4321_v26 }
 0x2bb   : > { %4354 = vmatpush3.bf16.msra.mxu1 (!%p3129_p4), %v4353_v29  ;;  %4324 = vmatprep.subr.bf16.mxu0 (!%p3129_p4), %v4323_v30  ;;  %v2641_v29 = vld [vmem:[#allocation9 + $0x208] sm:$0xff] (!%p3129_p4)  ;;  %v2672_v30 = vld [vmem:[#allocation9 + $0x300] sm:$0xff] (!%p3129_p4) }
 0x2bf   : > { %v4561_v21 = vpop.eup (!%p3129_p4), %4560 }
 0x2c0   : > { %v4563_v51 = vpop.eup (!%p3129_p4), %4562  ;;  %v2564_v22 = vadd.f32 (!%p3129_p4), 1.0, %v4561_v21  ;;  %v2649_v21 = vld [vmem:[#allocation9 + $0x248] sm:$0xff] (!%p3129_p4) }
 0x2c1   : > { %v2565_v23 = vadd.f32 (!%p3129_p4), 1.0, %v4563_v51  ;;  %v2680_v51 = vld [vmem:[#allocation9 + $0x340] sm:$0xff] (!%p3129_p4) }
 0x2c2   : > { %4564 = vrcp.f32 (!%p3129_p4), %v2564_v22  ;;  %v4419_v22 = vpack.c.bf16 (!%p3129_p4), %v2697_v16, %v2696_v15 }
 0x2c3   : > { %4566 = vrcp.f32 (!%p3129_p4), %v2565_v23  ;;  %v2681_v23 = vld [vmem:[#allocation9 + $0x348] sm:$0xff] (!%p3129_p4) }
 0x380   : > { %v2231_v32 = vpop.f32.mrb[2].mxu0 }
 0x381   : > { %v2515_v33 = vpop.f32.mrb[2].mxu1  ;;  %v2233_v35 = vpop.f32.mrb[3].mxu0  ;;  %2547 = sbr.rel (%p3129_p4) target bundleno = 1197 (0x4ad), region = 68 }
 0x382   : > { %v2530_v63 = vcombine.low %v2231_v32, %v2233_v35  ;;  %v2517_v37 = vpop.f32.mrb[3].mxu1  ;;  %v2585_v32 = vld [vmem:[#allocation9 + $0x48] sm:$0xff] (!%p3129_p4) }
 0x383   : > { %v2531_v38 = vcombine.low %v2515_v33, %v2517_v37  ;;  %v2616_v33 = vld [vmem:[#allocation9 + $0x140] sm:$0xff] (!%p3129_p4)  ;;  %v2617_v35 = vld [vmem:[#allocation9 + $0x148] sm:$0xff] (!%p3129_p4)  ;;  %v2634_v37 = vld [vmem:[#allocation9 + $0x1d0] sm:$0xff] (!%p3129_p4) }
 0x384   : > { %v2538_v40 = vadd.f32 %v2530_v63, %v339_v34  ;;  %v4355_v34 = vpack.c.bf16 (!%p3129_p4), %v2633_v28, %v2632_v27  ;;  %v2602_v63 = vld [vmem:[#allocation9 + $0xd0] sm:$0xff] (!%p3129_p4)  ;;  %v2640_v28 = vld [vmem:[#allocation9 + $0x200] sm:$0xff] (!%p3129_p4) }
 0x385   : > { %v2539_v41 = vadd.f32 %v2531_v38, %v340_v36  ;;  %v2603_v36 = vld [vmem:[#allocation9 + $0xd8] sm:$0xff] (!%p3129_p4) }
 0x386   : > { %2542 = vst [vmem:[#allocation2 + $0x10] sm:$0xff] %v2538_v40  ;;  %v2635_v38 = vld [vmem:[#allocation9 + $0x1d8] sm:$0xff] (!%p3129_p4)  ;;  %v4325_v40 = vpack.c.bf16 (!%p3129_p4), %v2585_v32, %v2584_v31  ;;  %v4327_v43 = vpack.c.bf16 (!%p3129_p4), %v2603_v36, %v2602_v63  ;;  %4356 = vmatprep.subr.bf16.mxu1 (!%p3129_p4), %v4355_v34  ;;  %v2673_v31 = vld [vmem:[#allocation9 + $0x308] sm:$0xff] (!%p3129_p4)  ;;  %v2658_v32 = vld [vmem:[#allocation9 + $0x290] sm:$0xff] (!%p3129_p4)  ;;  %v4565_v34 = vpop.eup (!%p3129_p4), %4564 }
 0x387   : > { %2543 = vst [vmem:[#allocation2 + $0x18] sm:$0xff] %v2539_v41  ;;  %v4357_v41 = vpack.c.bf16 (!%p3129_p4), %v2617_v35, %v2616_v33  ;;  %v4359_v48 = vpack.c.bf16 (!%p3129_p4), %v2635_v38, %v2634_v37  ;;  %v2659_v33 = vld [vmem:[#allocation9 + $0x298] sm:$0xff] (!%p3129_p4)  ;;  %v2690_v35 = vld [vmem:[#allocation9 + $0x390] sm:$0xff] (!%p3129_p4)  ;;  %v4567_v36 = vpop.eup (!%p3129_p4), %4566  ;;  %v2715_v37 = vcombine.high (!%p3129_p4), %v4565_v34, %v4565_v34  ;;  %v4373_v38 = vpack.c.bf16 (!%p3129_p4), %v2641_v29, %v2640_v28 }
 0x388   : > { %4326 = vmatpush3.bf16.msra.mxu0 %v4325_v40  ;;  %v2691_v63 = vld [vmem:[#allocation9 + $0x398] sm:$0xff]  ;;  %v2716_v40 = vcombine.high %v4567_v36, %v4567_v36  ;;  %v4421_v29 = vpack.c.bf16 %v2681_v23, %v2680_v51 }
 0x389   : > { %4358 = vmatpush3.bf16.msra.mxu1 %v4357_v41  ;;  %4328 = vmatprep.subr.bf16.mxu0 %v4327_v43  ;;  %v4405_v41 = vpack.c.bf16 %v2673_v31, %v2672_v30  ;;  %v4375_v43 = vpack.c.bf16 %v2659_v33, %v2658_v32  ;;  %v2650_v31 = vld [vmem:[#allocation9 + $0x250] sm:$0xff]  ;;  %v2651_v32 = vld [vmem:[#allocation9 + $0x258] sm:$0xff] }
 0x38a   : > { %4360 = vmatprep.subr.bf16.mxu1 %v4359_v48  ;;  %2787 = vmatprep.mubr.f32.mxu0 %v2715_v37  ;;  %v4407_v48 = vpack.c.bf16 %v2691_v63, %v2690_v35  ;;  %v2682_v33 = vld [vmem:[#allocation9 + $0x350] sm:$0xff]  ;;  %v2683_v35 = vld [vmem:[#allocation9 + $0x358] sm:$0xff]  ;;  %v2668_v63 = vld [vmem:[#allocation9 + $0x2e0] sm:$0xff] }
 0x38b   : > { %2857 = vmatprep.mubr.f32.mxu1 %v2716_v40  ;;  %v2700_v37 = vld [vmem:[#allocation9 + $0x3e0] sm:$0xff]  ;;  %v4393_v40 = vpack.c.bf16 %v2651_v32, %v2650_v31 }
 0x38c   : > { %4330 = vmatpush3.bf16.msra.mxu0 %v4329_v55  ;;  %v4377_v55 = vpack.c.bf16 %v2643_v46, %v2642_v45  ;;  %v2652_v46 = vld [vmem:[#allocation9 + $0x260] sm:$0xff] }
 0x38d   : > { %4362 = vmatpush3.bf16.msra.mxu1 %v4361_v58  ;;  %4332 = vmatprep.subr.bf16.mxu0 %v4331_v59  ;;  %v2550_v24 = vld [vmem:[#allocation2 + $0x10] sm:$0xff]  ;;  %v2644_v58 = vld [vmem:[#allocation9 + $0x220] sm:$0xff] }
 0x38e   : > { %4364 = vmatprep.subr.bf16.mxu1 %v4363_v39  ;;  %v2551_v25 = vld [vmem:[#allocation2 + $0x18] sm:$0xff]  ;;  %v3132_v26 = vmul.f32 -1.442695, %v2550_v24  ;;  %v2645_v59 = vld [vmem:[#allocation9 + $0x228] sm:$0xff] }
 0x38f   : > { %v3133_v27 = vmul.f32 -1.442695, %v2551_v25  ;;  %v2662_v39 = vld [vmem:[#allocation9 + $0x2b0] sm:$0xff]  ;;  %v4381_v3 = vpack.c.bf16 %v2645_v59, %v2644_v58  ;;  %v2667_v25 = vld [vmem:[#allocation9 + $0x2d8] sm:$0xff]  ;;  %v4397_v59 = vpack.c.bf16 %v2653_v47, %v2652_v46 }
 0x390   : > { %4334 = vmatpush3.bf16.msra.mxu0 %v4333_v9  ;;  %4568 = vpow2.f32 %v3132_v26  ;;  %v4383_v9 = vpack.c.bf16 %v2663_v0, %v2662_v39  ;;  %v2666_v24 = vld [vmem:[#allocation9 + $0x2d0] sm:$0xff]  ;;  %v2655_v39 = vld [vmem:[#allocation9 + $0x278] sm:$0xff] }
 0x391   : > { %4366 = vmatpush3.bf16.msra.mxu1 %v4365_v6  ;;  %4336 = vmatprep.subr.bf16.mxu0 %v4335_v7  ;;  %4570 = vpow2.f32 %v3133_v27  ;;  %v2646_v6 = vld [vmem:[#allocation9 + $0x230] sm:$0xff]  ;;  %v2647_v7 = vld [vmem:[#allocation9 + $0x238] sm:$0xff]  ;;  %v4391_v30 = vpack.c.bf16 %v2667_v25, %v2666_v24 }
 0x392   : > { %4368 = vmatprep.subr.bf16.mxu1 %v4367_v11  ;;  %v2679_v11 = vld [vmem:[#allocation9 + $0x338] sm:$0xff]  ;;  %v2698_v26 = vld [vmem:[#allocation9 + $0x3d0] sm:$0xff] }
 0x393   : > { %v2699_v27 = vld [vmem:[#allocation9 + $0x3d8] sm:$0xff] }
 0x394   : > { %4338 = vmatpush3.bf16.msra.mxu0 %v4337_v17  ;;  %v4385_v17 = vpack.c.bf16 %v2647_v7, %v2646_v6 }
 0x395   : > { %4370 = vmatpush3.bf16.msra.mxu1 %v4369_v18  ;;  %4372 = vmatprep.subr.bf16.mxu0 %v4371_v19  ;;  %v4417_v18 = vpack.c.bf16 %v2679_v11, %v2678_v8  ;;  %v4387_v19 = vpack.c.bf16 %v2665_v13, %v2664_v12 }
 0x396   : > { %4404 = vmatprep.subr.bf16.mxu1 %v4403_v20  ;;  %v2648_v20 = vld [vmem:[#allocation9 + $0x240] sm:$0xff] }
 0x397   : > { %2788 = vmatmul.mubr.f32.vlgmr.msra.gmra.mrb[0].mxu0 %v4565_v34  ;;  %v4389_v28 = vpack.c.bf16 %v2649_v21, %v2648_v20  ;;  %v4423_v34 = vpack.c.bf16 %v2699_v27, %v2698_v26 }
 0x398   : > { %4374 = vmatpush3.bf16.msra.mxu0 %v4373_v38  ;;  %2858 = vmatmul.mubr.f32.vlgmr.msra.gmra.mrb[0].mxu1 %v4567_v36  ;;  %v2669_v36 = vld [vmem:[#allocation9 + $0x2e8] sm:$0xff] }
 0x399   : > { %4406 = vmatpush3.bf16.msra.mxu1 %v4405_v41  ;;  %4376 = vmatprep.subr.bf16.mxu0 %v4375_v43  ;;  %v2701_v38 = vld [vmem:[#allocation9 + $0x3e8] sm:$0xff]  ;;  %v4425_v43 = vpack.c.bf16 %v2683_v35, %v2682_v33  ;;  %v4395_v45 = vpack.c.bf16 %v2669_v36, %v2668_v63 }
 0x39a   : > { %4408 = vmatprep.subr.bf16.mxu1 %v4407_v48  ;;  %v4569_v61 = vpop.eup %4568  ;;  %v2684_v48 = vld [vmem:[#allocation9 + $0x360] sm:$0xff]  ;;  %v4427_v50 = vpack.c.bf16 %v2701_v38, %v2700_v37 }
 0x39b   : > { %v4571_v4 = vpop.eup %4570  ;;  %v2566_v44 = vadd.f32 1.0, %v4569_v61  ;;  %v4429_v49 = vpack.c.bf16 %v2685_v52, %v2684_v48  ;;  %v4401_v61 = vpack.c.bf16 %v2655_v39, %v2654_v62 }
 0x39c   : > { %4378 = vmatpush3.bf16.msra.mxu0 %v4377_v55  ;;  %v2567_v14 = vadd.f32 1.0, %v4571_v4 }
 0x39d   : > { %4410 = vmatpush3.bf16.msra.mxu1 %v4409_v56  ;;  %4380 = vmatprep.subr.bf16.mxu0 %v4379_v57  ;;  %4572 = vrcp.f32 %v2566_v44  ;;  %v2702_v56 = vld [vmem:[#allocation9 + $0x3f0] sm:$0xff]  ;;  %v2703_v57 = vld [vmem:[#allocation9 + $0x3f8] sm:$0xff] }
 0x39e   : > { %4412 = vmatprep.subr.bf16.mxu1 %v4411_v60  ;;  %4574 = vrcp.f32 %v2567_v14  ;;  %v4399_v60 = vpack.c.bf16 %v2671_v54, %v2670_v53  ;;  %v4431_v0 = vpack.c.bf16 %v2703_v57, %v2702_v56 }
 0x3a0   : > { %4382 = vmatpush3.bf16.msra.mxu0 %v4381_v3  ;;  %v4433_v3 = vpack.c.bf16 %v2687_v2, %v2686_v1 }
 0x3a1   : > { %4414 = vmatpush3.bf16.msra.mxu1 %v4413_v5  ;;  %4384 = vmatprep.subr.bf16.mxu0 %v4383_v9  ;;  %v3134_v5 = vld [vmem:[#allocation11] ss:$0 sm:$0xff] }
 0x3a2   : > { %4416 = vmatprep.subr.bf16.mxu1 %v4415_v10 }
 0x3a4   : > { %4386 = vmatpush3.bf16.msra.mxu0 %v4385_v17 }
 0x3a5   : > { %4418 = vmatpush3.bf16.msra.mxu1 %v4417_v18  ;;  %4388 = vmatprep.subr.bf16.mxu0 %v4387_v19 }
 0x3a6   : > { %4420 = vmatprep.subr.bf16.mxu1 %v4419_v22 }
 0x3a7   : > { %v4573_v41 = vpop.eup %4572 }
 0x3a8   : > { %4390 = vmatpush3.bf16.msra.mxu0 %v4389_v28  ;;  %v4575_v42 = vpop.eup %4574  ;;  %v2717_v55 = vcombine.high %v4573_v41, %v4573_v41 }
 0x3a9   : > { %4422 = vmatpush3.bf16.msra.mxu1 %v4421_v29  ;;  %4392 = vmatprep.subr.bf16.mxu0 %v4391_v30  ;;  %v2718_v58 = vcombine.high %v4575_v42, %v4575_v42 }
 0x3aa   : > { %4424 = vmatprep.subr.bf16.mxu1 %v4423_v34  ;;  %2927 = vmatprep.mubr.f32.mxu0 %v2717_v55 }
 0x3ab   : > { %2997 = vmatprep.mubr.f32.mxu1 %v2718_v58 }
 0x3ac   : > { %4394 = vmatpush3.bf16.msra.mxu0 %v4393_v40 }
 0x3ad   : > { %4426 = vmatpush3.bf16.msra.mxu1 %v4425_v43  ;;  %4396 = vmatprep.subr.bf16.mxu0 %v4395_v45 }
 0x3ae   : > { %4428 = vmatprep.subr.bf16.mxu1 %v4427_v50 }
 0x3b0   : > { %4398 = vmatpush3.bf16.msra.mxu0 %v4397_v59 }
 0x3b1   : > { %4430 = vmatpush3.bf16.msra.mxu1 %v4429_v49  ;;  %4400 = vmatprep.subr.bf16.mxu0 %v4399_v60 }
 0x3b2   : > { %4432 = vmatprep.subr.bf16.mxu1 %v4431_v0 }
 0x3b4   : > { %4402 = vmatpush3.bf16.msra.mxu0 %v4401_v61 }
 0x3b5   : > { %4434 = vmatpush3.bf16.msra.mxu1 %v4433_v3 }
 0x3b7   : > { %2928 = vmatmul.mubr.f32.vlgmr.msra.gmra.mrb[2].mxu0 %v4573_v41 }
 0x3b8   : > { %2998 = vmatmul.mubr.f32.vlgmr.msra.gmra.mrb[2].mxu1 %v4575_v42 }
 0x46a   : > { %v3175_v4 = vpop.f32.mrb[0].mxu0 }
 0x46b   : > { %v3176_v9 = vpop.f32.mrb[1].mxu0  ;;  %v3210_v6 = vpop.f32.mrb[0].mxu1 }
 0x46c   : > { %v3177_v7 = vadd.f32 %v3176_v9, %v3175_v4  ;;  %v3211_v8 = vpop.f32.mrb[1].mxu1 }
 0x46d   : > { %v3212_v44 = vadd.f32 %v3211_v8, %v3210_v6 }
 0x46e   : > { %v2790_v10 = vadd.f32 %v3177_v7, %v3134_v5 }
 0x470   : > { %v2860_v11 = vadd.f32 %v3212_v44, %v2790_v10 }
 0x48a   : > { %v3245_v12 = vpop.f32.mrb[2].mxu0 }
 0x48b   : > { %v3246_v13 = vpop.f32.mrb[3].mxu0  ;;  %v3280_v14 = vpop.f32.mrb[2].mxu1 }
 0x48c   : > { %v3247_v15 = vadd.f32 %v3246_v13, %v3245_v12  ;;  %v3281_v16 = vpop.f32.mrb[3].mxu1 }
 0x48d   : > { %v3282_v17 = vadd.f32 %v3281_v16, %v3280_v14 }
 0x48e   : > { %v2930_v18 = vadd.f32 %v3247_v15, %v2860_v11 }
 0x490   : > { %v3000_v19 = vadd.f32 %v3282_v17, %v2930_v18 }
 0x492   : > { %v3135_v20 = vmul.f32 -1.442695, %v3000_v19 }
 0x494   : > { %4576 = vpow2.f32 %v3135_v20 }
 0x49e   : > { %v4577_v21 = vpop.eup %4576 }
 0x49f   : > { %v3006_v51 = vadd.f32 1.0, %v4577_v21 }
 0x4a1   : > { %4578 = vrcp.f32 %v3006_v51 }
 0x4ab   : > { %v4579_v22 = vpop.eup %4578 }
 0x4ac   : > { %3009 = vst [vmem:[#allocation12] sm:$0xf] %v4579_v22 }
 0x4ad PF: > { %p4507_p5 = scmp.eq.s32.totalorder %s4861_s22, 2  ;;  %s4811_s11 = smov [#allocation12]  }
 0x4ae   : > { %s3017_s16 = sshll.u32 %s4811_s11, 4  ;;  %s3018_s16 = int_to_ptr.vmem [resolvable:$true] %s3017_s16 }
 0x4af   : > { %s4722_s18 = scalar_lea.vmem %s3018_s16, 64  ;;  %p4729_p6 = scmp.lt.s32.totalorder %s3018_s16, %s3018_s16 }
 0x4b0   : > { %p4723_p12 = scmp.ne.s32.totalorder %s3018_s16, %s4722_s18  ;;  %p4730_p13 = scmp.lt.s32.totalorder %s4722_s18, %s4722_s18 }
 0x4b2   : > { %p4724_p0 = pnand %p4723_p12, %p4507_p5  ;;  %p4731_p3 = por %p4730_p13, %p4729_p6 }
 0x4b4   : > { %p4725_p2 = pneg %p4724_p0 }
 0x4b6   : > { %p4732_p7 = pnand %p4731_p3, %p4725_p2 }
 0x4b8   : > { %4735 = shalt.err (!%p4732_p7)
}
 0x4b9   : > { %s4736_s7 = scalar_lea.hbm %s6178_s5, 64 }
 0x4ba   : > { %p4737_p8 = scmp.ne.s32.totalorder %s6178_s5, %s4736_s7  ;;  %p4742_p11 = scmp.lt.u32.totalorder %s4736_s7, %s6178_s5 }
 0x4bc   : > { %p4738_p10 = pnand %p4737_p8, %p4507_p5 }
 0x4be   : > { %p4739_p9 = pneg %p4738_p10 }
 0x4c0   : > { %p4744_p1 = pnand %p4742_p11, %p4739_p9 }
 0x4c2   : > { %4747 = shalt.err (!%p4744_p1)
}
 0x4c3   : > { %4478 = dma.vmem_to_hbm [thread:$0]  (%p4507_p5), %s3018_s16, 64, %s6178_s5, [#allocation5]  }
 0x4c4   : > { %4781 = dma.done.wait (%p4507_p5), [#allocation5], 64  }
 0x4c5   : > { %4783 = vsyncadd (%p4507_p5), [#allocation5], 4294967232 }
 0x4c6 PF: > { %p18_p4 = scmp.ge.s32.totalorder %s4975_s12, 5   ;;  %s6196_s18 = smov %s4790_s19 }
 0x4c7   : > { %s6197_s19 = smov %s4794_s20  ;;  %s6198_s20 = smov %s4986_s9 }
 0x4c8   : > { %s6199_s21 = smov %s4975_s12  ;;  %20 = sbr.rel (!%p18_p4) target bundleno = 6 (0x6), region = 103 }
 0x4cf   :  { %3030 = vsyncpa [#allocation4], 1 }
 0x4d0   :  { %3032 = vsyncpa [#allocation4 + $0x1], 1 }
 0x4d1   :  { %3033 = vsyncpa [#allocation7], 1 }
 0x4d2   :  { %3035 = vsyncpa [#allocation7 + $0x1], 1 }
 0x4d3   :  { %3036 = vsyncpa [#allocation10], 1 }
 0x4d4   :  { %3037 = vsyncpa [#allocation5], 1 }
 0x4d5   :  { %3039 = vsyncpa [#allocation5 + $0x1], 1 }

</bundles_post_ra>
